<compile_context>
chip_gen: v6e
topology: v6e:2x2x1
jax: 0.10.0
libtpu: 0.0.40
codegen_flags: <defaults>
</compile_context>

<pallas_src>
import functools

import jax
import jax.numpy as jnp
import numpy as np
from jax.experimental import pallas as pl
from jax.experimental.pallas import tpu as pltpu


I3D_FEAT = 384 + 384 + 128 + 128      # 1024 channels per I3D stream
HIDDEN = 256                          # predictor layer1 output channels
COUT_PAD = 128                        # (num_classes + 2) padded to one lane tile
CLIP_CHANNELS = 3


def _pool_budgets():
    """Generation-aware (per-stream block budget, vmem_limit_bytes)."""
    mib = 1024 * 1024
    try:
        cap = pltpu.get_tpu_info().vmem_capacity_bytes
    except Exception:               # defensive: fall back to v7x-safe numbers
        cap = None
    if cap is not None and cap >= 96 * mib:   # v5e / v6e: 128 MiB physical VMEM
        return 24 * mib, 96 * mib
    return 8 * mib, 48 * mib                  # v7x: 64 MiB physical VMEM


# ---------------------------------------------------------------------------
# Pallas kernels
# ---------------------------------------------------------------------------
def wpool_kernel(clip_ref, wsel_ref, out_ref):
    """Weighted spatial sum-pool of one (batch-squeezed) clip block.

    clip_ref : (C, tblk, HW)  clip block, spatial dims pre-flattened so the
               lane axis is dense (HW = 256 for 16x16 frames).
    wsel_ref : (C, HW, C)     per-channel one-hot spatial weights:
               wsel[c, :, c] = w_spatial, zeros elsewhere.
    out_ref  : (tblk, C)      out[t, c] = sum_hw clip[c, t, hw] * w_spatial[hw]

    The reduce over HW runs on the MXU (one small matmul per channel), landing
    the result directly in (t, c) layout with no in-kernel transpose.
    """
    acc = jnp.zeros(out_ref.shape, jnp.float32)
    for c in range(clip_ref.shape[0]):            # static loop, C == 3
        acc = acc + jnp.dot(clip_ref[c].astype(jnp.float32), wsel_ref[c],
                            preferred_element_type=jnp.float32)
    out_ref[...] = acc


def head_kernel(rows_ref, wp_ref, bp_ref, w1_ref, s1_ref, c1_ref, w2_ref,
                b2_ref, out_ref, *, seq, seq_valid):
    """Stand-in feature projection + predictor head for a block of clips.

    rows_ref: (bblk*seq, 2C) f32  pooled rows of both streams (stream1|stream2)
    wp_ref  : (2C, 2F)       f32  block-diag projection weight (1/HW folded in)
    bp_ref  : (1, 2F)        f32  projection bias (stream1 | stream2)
    w1_ref  : (2F, H1)       bf16 layer1 1x1x1 conv weight (no bias)
    s1_ref  : (1, H1)        f32  folded BatchNorm scale  gamma/sqrt(var+eps)
    c1_ref  : (1, H1)        f32  folded BatchNorm offset beta - mean*scale
    w2_ref  : (H1, Cout)     bf16 layer2 1x1x1 conv weight (Cout padded to 128)
    b2_ref  : (1, Cout)      f32  layer2 bias
    out_ref : (bblk, 1, Cout) f32 sigmoid(max over valid time steps)
    """
    rows = rows_ref[...].astype(jnp.float32)                   # (M, 2C), 2C==6
    # stand-in I3D.extract_features: K=6 projection as rank-1 VPU updates (a
    # K=6 MXU pass is dominated by weight-load/drain latency; keep the MXU for
    # the two big matmuls below).
    f = rows[:, 0:1] * wp_ref[0:1, :]
    for k in range(1, rows.shape[1]):                          # static, 6 terms
        f = f + rows[:, k:k + 1] * wp_ref[k:k + 1, :]
    f = jnp.maximum(f + bp_ref[...], 0.0)                      # (M, 2F) f32
    # predictor layer1: conv1x1x1 (no bias) + folded BN + ReLU
    h = jnp.dot(f.astype(jnp.bfloat16), w1_ref[...],
                preferred_element_type=jnp.float32)
    h = jnp.maximum(h * s1_ref[...] + c1_ref[...], 0.0)        # (M, H1)
    # predictor layer2: conv1x1x1 + bias
    p = jnp.dot(h.astype(jnp.bfloat16), w2_ref[...],
                preferred_element_type=jnp.float32) + b2_ref[...]   # (M, Cout)
    bblk = out_ref.shape[0]
    p = p.reshape(bblk, seq, -1)            # seq % 8 == 0 -> copy-free reshape
    if seq_valid != seq:                    # padded steps must not win the max
        t_idx = jax.lax.broadcasted_iota(jnp.int32, p.shape, 1)
        p = jnp.where(t_idx < seq_valid, p, -jnp.inf)
    out_ref[...] = jax.nn.sigmoid(jnp.max(p, axis=1, keepdims=True))


# ---------------------------------------------------------------------------
# pallas_call wrappers
# ---------------------------------------------------------------------------
def _largest_divisor_leq(n, cap):
    cap = int(max(1, min(n, cap)))
    for d in range(cap, 0, -1):
        if n % d == 0:
            return d
    return 1


def run_wpool(clip, w_spatial, *, budget=None, vmem_limit=None):
    """Weighted spatial sum-pool of a clip: (B, C, T, H, W) -> (B, T, C)."""
    B, C, T, H, W = clip.shape
    HW = H * W
    default_budget, default_limit = _pool_budgets()
    budget = default_budget if budget is None else budget
    vmem_limit = default_limit if vmem_limit is None else vmem_limit

    clip_flat = clip.reshape(B, C, T, HW)    # free: NCTHW is contiguous over HW
    w_flat = w_spatial.reshape(HW).astype(jnp.float32)
    # one-hot weight stack so the MXU reduce lands directly in (t, c) layout
    wsel = w_flat[None, :, None] * jnp.eye(C, dtype=jnp.float32)[:, None, :]

    bytes_per_t = C * HW * clip.dtype.itemsize
    if T * bytes_per_t <= budget:
        tblk = T                                    # whole time axis, one block
    else:
        tblk = min(T, max(8, (budget // bytes_per_t) // 8 * 8))
    nt = pl.cdiv(T, tblk)

    return pl.pallas_call(
        wpool_kernel,
        out_shape=jax.ShapeDtypeStruct((B, T, C), jnp.float32),
        grid_spec=pltpu.PrefetchScalarGridSpec(
            num_scalar_prefetch=0,
            grid=(B, nt),
            in_specs=[
                pl.BlockSpec((None, C, tblk, HW), lambda b, t: (b, 0, t, 0)),
                pl.BlockSpec((C, HW, C), lambda b, t: (0, 0, 0)),
            ],
            out_specs=pl.BlockSpec((None, tblk, C), lambda b, t: (b, t, 0)),
        ),
        compiler_params=pltpu.CompilerParams(
            # every (b, t) step writes a disjoint output slab -> both axes can
            # be sharded across v7x's two TensorCores
            dimension_semantics=("parallel", "parallel"),
            vmem_limit_bytes=vmem_limit,
        ),
    )(clip_flat, wsel)


def _head_batch_block(batch, seq):
    # Flatten enough clips per grid step that the MXU M dim approaches 256
    # rows, but keep >= 2 grid steps so both v7x TensorCores get work.
    cap = max(1, 256 // seq)
    if batch >= 2:
        cap = min(cap, batch // 2)
    return _largest_divisor_leq(batch, cap)


def run_head(rows, wp_bd, bp, w1, s1, c1, w2, b2, *, batch, seq, seq_valid):
    r_total, c2 = rows.shape
    assert r_total == batch * seq and seq % 8 == 0
    f2 = wp_bd.shape[1]
    h1 = w1.shape[1]
    cout = w2.shape[1]
    bblk = _head_batch_block(batch, seq)
    rows_blk = bblk * seq
    _, vmem_limit = _pool_budgets()

    def const(shape):
        # constant index_map -> weight block is DMA'd once, stays VMEM-resident
        return pl.BlockSpec(shape, lambda i: (0,) * len(shape))

    kernel = functools.partial(head_kernel, seq=seq, seq_valid=seq_valid)
    return pl.pallas_call(
        kernel,
        out_shape=jax.ShapeDtypeStruct((batch, 1, cout), jnp.float32),
        grid_spec=pltpu.PrefetchScalarGridSpec(
            num_scalar_prefetch=0,
            grid=(batch // bblk,),
            in_specs=[
                pl.BlockSpec((rows_blk, c2), lambda i: (i, 0)),
                const((c2, f2)),
                const((1, f2)),
                const((f2, h1)),
                const((1, h1)),
                const((1, h1)),
                const((h1, cout)),
                const((1, cout)),
            ],
            out_specs=pl.BlockSpec((bblk, 1, cout), lambda i: (i, 0, 0)),
        ),
        compiler_params=pltpu.CompilerParams(
            dimension_semantics=("parallel",),
            vmem_limit_bytes=vmem_limit,
        ),
    )(rows, wp_bd, bp, w1, s1, c1, w2, b2)


# ---------------------------------------------------------------------------
# Parameters (deterministic, synthetic)
# ---------------------------------------------------------------------------
def make_params(key, num_classes):
    ks = jax.random.split(key, 9)
    std = 0.02

    def rnd(k, shape):
        return (std * jax.random.normal(k, shape)).astype(jnp.float32)

    # TODO(synk): stand-in I3D extractor projections (3 -> 1024) per stream.
    wp1 = rnd(ks[0], (CLIP_CHANNELS, I3D_FEAT))
    bp1 = rnd(ks[1], (1, I3D_FEAT))
    wp2 = rnd(ks[2], (CLIP_CHANNELS, I3D_FEAT))
    bp2 = rnd(ks[3], (1, I3D_FEAT))

    # predictor layer1: Conv3d(2048 -> 256, 1x1x1, bias=False) + BatchNorm3d
    w1 = rnd(ks[4], (2 * I3D_FEAT, HIDDEN))
    gamma = 1.0 + 0.1 * jax.random.normal(ks[5], (1, HIDDEN)).astype(jnp.float32)
    beta = rnd(ks[6], (1, HIDDEN))
    run_mean = jnp.zeros((1, HIDDEN), jnp.float32)
    run_var = jnp.ones((1, HIDDEN), jnp.float32)
    eps = 1e-3  # Unit3D's BatchNorm3d eps
    s1 = gamma / jnp.sqrt(run_var + eps)
    c1 = beta - run_mean * s1

    # predictor layer2: Conv3d(256 -> num_classes + 2, 1x1x1, bias=True).
    # Output channels zero-padded to 128 lanes (padded lanes give sigmoid(0)=0.5
    # and are sliced away before returning).
    cout = num_classes + 2
    w2 = jnp.zeros((HIDDEN, COUT_PAD), jnp.float32).at[:, :cout].set(
        rnd(ks[7], (HIDDEN, cout)))
    b2 = jnp.zeros((1, COUT_PAD), jnp.float32).at[:, :cout].set(
        rnd(ks[8], (1, cout)))

    return dict(wp1=wp1, bp1=bp1, wp2=wp2, bp2=bp2,
                w1=w1, s1=s1, c1=c1, w2=w2, b2=b2)


def _block_diag(a, b):
    ca, fa = a.shape
    cb, fb = b.shape
    top = jnp.concatenate([a, jnp.zeros((ca, fb), a.dtype)], axis=1)
    bot = jnp.concatenate([jnp.zeros((cb, fa), b.dtype), b], axis=1)
    return jnp.concatenate([top, bot], axis=0)


def _interp_matrix(n_out, n_in):
    """1-D linear-resize matrix M (n_out, n_in) s.t. resize(x) == M @ x.

    Built by resizing the identity, so it matches jax.image.resize /
    F.interpolate(mode='trilinear', align_corners=False) exactly.
    """
    return jax.image.resize(jnp.eye(n_in, dtype=jnp.float32), (n_out, n_in),
                            method="linear")


# ---------------------------------------------------------------------------
# TAL_Net forward (inference path)
# ---------------------------------------------------------------------------
@functools.partial(jax.jit, static_argnames=("num_classes",))
def tal_net_forward(params, cabin_clips, face_clips, num_classes):
    B, C, T, H, W = cabin_clips.shape
    _, _, Tf, Hf, Wf = face_clips.shape

    # Trilinear resize + spatial mean is linear, so instead of materializing
    # face_rs = F.interpolate(face, (T, H, W)) in HBM we pool the native clip
    # with the spatial interpolation column-sums folded into the weights and
    # apply the tiny temporal interpolation matrix in XLA.
    a_t = _interp_matrix(T, Tf)                       # (T, Tf)
    a_h = _interp_matrix(H, Hf)                       # (H, Hf)
    a_w = _interp_matrix(W, Wf)                       # (W, Wf)
    w_face = jnp.outer(jnp.sum(a_h, axis=0), jnp.sum(a_w, axis=0))   # (Hf, Wf)

    # Pallas kernel 1 (per stream): weighted spatial sum-pool, native layout.
    pooled_cab = run_wpool(cabin_clips, jnp.ones((H, W), jnp.float32))  # (B,T,C)
    pooled_face = run_wpool(face_clips, w_face)                         # (B,Tf,C)
    pooled_face = jnp.einsum("ts,bsc->btc", a_t, pooled_face)           # (B,T,C)

    # Tiny glue (a few KB): concat streams, pad time to a sublane multiple.
    rows = jnp.concatenate([pooled_cab, pooled_face], axis=-1)          # (B,T,2C)
    seq_p = ((T + 7) // 8) * 8
    if seq_p != T:
        rows = jnp.pad(rows, ((0, 0), (0, seq_p - T), (0, 0)))
    rows = rows.reshape(B * seq_p, 2 * C)                               # f32

    # Fold the 1/(H*W) of the spatial mean into the projection weights and pack
    # both streams' projections into one block-diagonal operand (f32, VPU path).
    inv_hw = 1.0 / float(H * W)
    wp_bd = _block_diag(params["wp1"] * inv_hw, params["wp2"] * inv_hw)
    bp = jnp.concatenate([params["bp1"], params["bp2"]], axis=-1)       # (1, 2F)

    # Pallas kernel 2: projection + predictor head (dropouts are identity).
    scores = run_head(rows, wp_bd, bp,
                      params["w1"].astype(jnp.bfloat16),
                      params["s1"], params["c1"],
                      params["w2"].astype(jnp.bfloat16), params["b2"],
                      batch=B, seq=seq_p, seq_valid=T)                  # (B,1,128)
    scores = scores[:, 0, :]
    class_scores = scores[:, :num_classes]
    start_scores = scores[:, num_classes]
    end_scores = scores[:, num_classes + 1]
    return class_scores, start_scores, end_scores


def reference_forward(params, cabin_clips, face_clips, num_classes):
    """Pure-JAX (f32) reference of the same math, for a sanity check."""
    B, C, T, H, W = cabin_clips.shape
    face_rs = jax.image.resize(face_clips, (B, C, T, H, W), method="trilinear")

    def extract(clip, wp, bp):
        pooled = jnp.mean(clip, axis=(3, 4))            # (B, C, T) spatial mean
        pooled = jnp.transpose(pooled, (0, 2, 1))       # (B, T, C)
        return jnp.maximum(jnp.einsum("btc,cf->btf", pooled, wp) + bp, 0.0)

    feat = jnp.concatenate(
        [extract(cabin_clips, params["wp1"], params["bp1"]),
         extract(face_rs, params["wp2"], params["bp2"])], axis=-1)
    h = jnp.einsum("btc,ch->bth", feat, params["w1"])
    h = jnp.maximum(h * params["s1"] + params["c1"], 0.0)
    p = jnp.einsum("bth,ho->bto", h, params["w2"]) + params["b2"]
    scores = jax.nn.sigmoid(jnp.max(p, axis=1))
    return (scores[:, :num_classes], scores[:, num_classes],
            scores[:, num_classes + 1])


# ---------------------------------------------------------------------------
if __name__ == "__main__":
    num_classes = 3
    B, C, T, H, W = 2, 3, 8, 16, 16

    key = jax.random.PRNGKey(0)
    k_params, k_cabin, k_face, k_tile = jax.random.split(key, 4)
    params = make_params(k_params, num_classes)

    cabin_clips = jax.random.normal(k_cabin, (B, C, T, H, W), jnp.float32)
    face_clips = jax.random.normal(k_face, (B, C, 8, 8, 8), jnp.float32)

    cls_s, start_s, end_s = tal_net_forward(params, cabin_clips, face_clips,
                                            num_classes)
    jax.block_until_ready((cls_s, start_s, end_s))

    # sanity check against a pure-JAX f32 reference (bf16 MXU operands -> loose)
    r_cls, r_start, r_end = reference_forward(params, cabin_clips, face_clips,
                                              num_classes)
    np.testing.assert_allclose(np.asarray(cls_s), np.asarray(r_cls),
                               rtol=2e-2, atol=2e-2)
    np.testing.assert_allclose(np.asarray(start_s), np.asarray(r_start),
                               rtol=2e-2, atol=2e-2)
    np.testing.assert_allclose(np.asarray(end_s), np.asarray(r_end),
                               rtol=2e-2, atol=2e-2)
    assert cls_s.shape == (B, num_classes)
    assert start_s.shape == (B,) and end_s.shape == (B,)

    # --- exercise the tiled-T pool path (nt > 1) against a plain-XLA sum ----
    big = jax.random.normal(k_tile, (2, 3, 16, 16, 16), jnp.float32)
    tiny_budget = 8 * 3 * 16 * 16 * 4               # forces tblk = 8, nt = 2
    tiled = run_wpool(big, jnp.ones((16, 16), jnp.float32), budget=tiny_budget)
    ref_tiled = jnp.transpose(jnp.sum(big, axis=(3, 4)), (0, 2, 1))
    np.testing.assert_allclose(np.asarray(tiled), np.asarray(ref_tiled),
                               rtol=1e-2, atol=1e-1)

    # --- exercise the padded / masked time path (T not a multiple of 8) -----
    cabin12 = jax.random.normal(jax.random.PRNGKey(2), (B, C, 12, H, W),
                                jnp.float32)
    p_cls, p_start, p_end = tal_net_forward(params, cabin12, face_clips,
                                            num_classes)
    r12 = reference_forward(params, cabin12, face_clips, num_classes)
    np.testing.assert_allclose(np.asarray(p_cls), np.asarray(r12[0]),
                               rtol=2e-2, atol=2e-2)
    np.testing.assert_allclose(np.asarray(p_start), np.asarray(r12[1]),
                               rtol=2e-2, atol=2e-2)
    np.testing.assert_allclose(np.asarray(p_end), np.asarray(r12[2]),
                               rtol=2e-2, atol=2e-2)

    print("KERNEL_OK")
</pallas_src>

<mosaic_0001>
module attributes {stable_mosaic.version = 11 : i64} {
  func.func @wpool_kernel(%arg0: i32, %arg1: i32, %arg2: memref<1x3x8x64xf32, #tpu.memory_space<vmem>>, %arg3: memref<3x64x3xf32, #tpu.memory_space<vmem>>, %arg4: memref<1x8x3xf32, #tpu.memory_space<vmem>>) attributes {dimension_semantics = [#tpu.dimension_semantics<parallel>, #tpu.dimension_semantics<parallel>], iteration_bounds = array<i64: 2, 1>, scalar_prefetch = 0 : i64, scratch_operands = 0 : i64, tpu.core_type = #tpu.core_type<tc>, window_params = [{transform_indices = @transform_0, window_bounds = array<i64: 1, 3, 8, 64>}, {pipeline_mode = #tpu.pipeline_mode<synchronous>, transform_indices = @transform_1, window_bounds = array<i64: 3, 64, 3>}, {transform_indices = @transform_2, window_bounds = array<i64: 1, 8, 3>}]} {
    %cst = arith.constant 0.000000e+00 : f32
    %0 = vector.broadcast %cst : f32 to vector<8x3xf32>
    %c0 = arith.constant 0 : index
    %c0_0 = arith.constant 0 : index
    %c0_1 = arith.constant 0 : index
    %c0_2 = arith.constant 0 : index
    %1 = vector.load %arg2[%c0, %c0_0, %c0_1, %c0_2] : memref<1x3x8x64xf32, #tpu.memory_space<vmem>>, vector<1x1x8x64xf32>
    %2 = vector.shape_cast %1 : vector<1x1x8x64xf32> to vector<8x64xf32>
    %c0_3 = arith.constant 0 : index
    %c0_4 = arith.constant 0 : index
    %c0_5 = arith.constant 0 : index
    %3 = vector.load %arg3[%c0_3, %c0_4, %c0_5] : memref<3x64x3xf32, #tpu.memory_space<vmem>>, vector<1x64x3xf32>
    %4 = vector.shape_cast %3 : vector<1x64x3xf32> to vector<64x3xf32>
    %cst_6 = arith.constant dense<0.000000e+00> : vector<8x3xf32>
    %5 = tpu.matmul %2, %4, %cst_6 {dimension_numbers = #tpu.dot_dimension_numbers<[1], [0], [0], [1], [0, 0, 1, 1], [], []>} : vector<8x64xf32>, vector<64x3xf32>, vector<8x3xf32> -> vector<8x3xf32>
    %6 = arith.addf %0, %5 : vector<8x3xf32>
    %c0_7 = arith.constant 0 : index
    %c1 = arith.constant 1 : index
    %c0_8 = arith.constant 0 : index
    %c0_9 = arith.constant 0 : index
    %7 = vector.load %arg2[%c0_7, %c1, %c0_8, %c0_9] : memref<1x3x8x64xf32, #tpu.memory_space<vmem>>, vector<1x1x8x64xf32>
    %8 = vector.shape_cast %7 : vector<1x1x8x64xf32> to vector<8x64xf32>
    %c1_10 = arith.constant 1 : index
    %c0_11 = arith.constant 0 : index
    %c0_12 = arith.constant 0 : index
    %9 = vector.load %arg3[%c1_10, %c0_11, %c0_12] : memref<3x64x3xf32, #tpu.memory_space<vmem>>, vector<1x64x3xf32>
    %10 = vector.shape_cast %9 : vector<1x64x3xf32> to vector<64x3xf32>
    %cst_13 = arith.constant dense<0.000000e+00> : vector<8x3xf32>
    %11 = tpu.matmul %8, %10, %cst_13 {dimension_numbers = #tpu.dot_dimension_numbers<[1], [0], [0], [1], [0, 0, 1, 1], [], []>} : vector<8x64xf32>, vector<64x3xf32>, vector<8x3xf32> -> vector<8x3xf32>
    %12 = arith.addf %6, %11 : vector<8x3xf32>
    %c0_14 = arith.constant 0 : index
    %c2 = arith.constant 2 : index
    %c0_15 = arith.constant 0 : index
    %c0_16 = arith.constant 0 : index
    %13 = vector.load %arg2[%c0_14, %c2, %c0_15, %c0_16] : memref<1x3x8x64xf32, #tpu.memory_space<vmem>>, vector<1x1x8x64xf32>
    %14 = vector.shape_cast %13 : vector<1x1x8x64xf32> to vector<8x64xf32>
    %c2_17 = arith.constant 2 : index
    %c0_18 = arith.constant 0 : index
    %c0_19 = arith.constant 0 : index
    %15 = vector.load %arg3[%c2_17, %c0_18, %c0_19] : memref<3x64x3xf32, #tpu.memory_space<vmem>>, vector<1x64x3xf32>
    %16 = vector.shape_cast %15 : vector<1x64x3xf32> to vector<64x3xf32>
    %cst_20 = arith.constant dense<0.000000e+00> : vector<8x3xf32>
    %17 = tpu.matmul %14, %16, %cst_20 {dimension_numbers = #tpu.dot_dimension_numbers<[1], [0], [0], [1], [0, 0, 1, 1], [], []>} : vector<8x64xf32>, vector<64x3xf32>, vector<8x3xf32> -> vector<8x3xf32>
    %18 = arith.addf %12, %17 : vector<8x3xf32>
    %c0_21 = arith.constant 0 : index
    %c0_22 = arith.constant 0 : index
    %c0_23 = arith.constant 0 : index
    %19 = vector.load %arg4[%c0_21, %c0_22, %c0_23] : memref<1x8x3xf32, #tpu.memory_space<vmem>>, vector<1x8x3xf32>
    %20 = vector.shape_cast %19 : vector<1x8x3xf32> to vector<8x3xf32>
    %21 = vector.shape_cast %18 : vector<8x3xf32> to vector<1x8x3xf32>
    tpu.vector_store %arg4[%c0_21, %c0_22, %c0_23], %21 {strides = array<i32>} : memref<1x8x3xf32, #tpu.memory_space<vmem>>, vector<1x8x3xf32>,
    return
  }
  func.func @transform_0(%arg0: i32, %arg1: i32) -> (i32, i32, i32, i32) {
    %c0_i32 = arith.constant 0 : i32
    %c0_i32_0 = arith.constant 0 : i32
    %c0_i32_1 = arith.constant 0 : i32
    return %arg0, %c0_i32, %arg1, %c0_i32_0 : i32, i32, i32, i32
  }
  func.func @transform_1(%arg0: i32, %arg1: i32) -> (i32, i32, i32) {
    %c0_i32 = arith.constant 0 : i32
    %c0_i32_0 = arith.constant 0 : i32
    %c0_i32_1 = arith.constant 0 : i32
    %c0_i32_2 = arith.constant 0 : i32
    return %c0_i32, %c0_i32_0, %c0_i32_1 : i32, i32, i32
  }
  func.func @transform_2(%arg0: i32, %arg1: i32) -> (i32, i32, i32) {
    %c0_i32 = arith.constant 0 : i32
    %c0_i32_0 = arith.constant 0 : i32
    return %arg0, %arg1, %c0_i32 : i32, i32, i32
  }
}

module attributes {stable_mosaic.version = 11 : i64} {
  func.func @wpool_kernel(%arg0: i32, %arg1: i32, %arg2: memref<1x3x8x256xf32, #tpu.memory_space<vmem>>, %arg3: memref<3x256x3xf32, #tpu.memory_space<vmem>>, %arg4: memref<1x8x3xf32, #tpu.memory_space<vmem>>) attributes {dimension_semantics = [#tpu.dimension_semantics<parallel>, #tpu.dimension_semantics<parallel>], iteration_bounds = array<i64: 2, 1>, scalar_prefetch = 0 : i64, scratch_operands = 0 : i64, tpu.core_type = #tpu.core_type<tc>, window_params = [{transform_indices = @transform_0, window_bounds = array<i64: 1, 3, 8, 256>}, {pipeline_mode = #tpu.pipeline_mode<synchronous>, transform_indices = @transform_1, window_bounds = array<i64: 3, 256, 3>}, {transform_indices = @transform_2, window_bounds = array<i64: 1, 8, 3>}]} {
    %cst = arith.constant 0.000000e+00 : f32
    %0 = vector.broadcast %cst : f32 to vector<8x3xf32>
    %c0 = arith.constant 0 : index
    %c0_0 = arith.constant 0 : index
    %c0_1 = arith.constant 0 : index
    %c0_2 = arith.constant 0 : index
    %1 = vector.load %arg2[%c0, %c0_0, %c0_1, %c0_2] : memref<1x3x8x256xf32, #tpu.memory_space<vmem>>, vector<1x1x8x256xf32>
    %2 = vector.shape_cast %1 : vector<1x1x8x256xf32> to vector<8x256xf32>
    %c0_3 = arith.constant 0 : index
    %c0_4 = arith.constant 0 : index
    %c0_5 = arith.constant 0 : index
    %3 = vector.load %arg3[%c0_3, %c0_4, %c0_5] : memref<3x256x3xf32, #tpu.memory_space<vmem>>, vector<1x256x3xf32>
    %4 = vector.shape_cast %3 : vector<1x256x3xf32> to vector<256x3xf32>
    %cst_6 = arith.constant dense<0.000000e+00> : vector<8x3xf32>
    %5 = tpu.matmul %2, %4, %cst_6 {dimension_numbers = #tpu.dot_dimension_numbers<[1], [0], [0], [1], [0, 0, 1, 1], [], []>} : vector<8x256xf32>, vector<256x3xf32>, vector<8x3xf32> -> vector<8x3xf32>
    %6 = arith.addf %0, %5 : vector<8x3xf32>
    %c0_7 = arith.constant 0 : index
    %c1 = arith.constant 1 : index
    %c0_8 = arith.constant 0 : index
    %c0_9 = arith.constant 0 : index
    %7 = vector.load %arg2[%c0_7, %c1, %c0_8, %c0_9] : memref<1x3x8x256xf32, #tpu.memory_space<vmem>>, vector<1x1x8x256xf32>
    %8 = vector.shape_cast %7 : vector<1x1x8x256xf32> to vector<8x256xf32>
    %c1_10 = arith.constant 1 : index
    %c0_11 = arith.constant 0 : index
    %c0_12 = arith.constant 0 : index
    %9 = vector.load %arg3[%c1_10, %c0_11, %c0_12] : memref<3x256x3xf32, #tpu.memory_space<vmem>>, vector<1x256x3xf32>
    %10 = vector.shape_cast %9 : vector<1x256x3xf32> to vector<256x3xf32>
    %cst_13 = arith.constant dense<0.000000e+00> : vector<8x3xf32>
    %11 = tpu.matmul %8, %10, %cst_13 {dimension_numbers = #tpu.dot_dimension_numbers<[1], [0], [0], [1], [0, 0, 1, 1], [], []>} : vector<8x256xf32>, vector<256x3xf32>, vector<8x3xf32> -> vector<8x3xf32>
    %12 = arith.addf %6, %11 : vector<8x3xf32>
    %c0_14 = arith.constant 0 : index
    %c2 = arith.constant 2 : index
    %c0_15 = arith.constant 0 : index
    %c0_16 = arith.constant 0 : index
    %13 = vector.load %arg2[%c0_14, %c2, %c0_15, %c0_16] : memref<1x3x8x256xf32, #tpu.memory_space<vmem>>, vector<1x1x8x256xf32>
    %14 = vector.shape_cast %13 : vector<1x1x8x256xf32> to vector<8x256xf32>
    %c2_17 = arith.constant 2 : index
    %c0_18 = arith.constant 0 : index
    %c0_19 = arith.constant 0 : index
    %15 = vector.load %arg3[%c2_17, %c0_18, %c0_19] : memref<3x256x3xf32, #tpu.memory_space<vmem>>, vector<1x256x3xf32>
    %16 = vector.shape_cast %15 : vector<1x256x3xf32> to vector<256x3xf32>
    %cst_20 = arith.constant dense<0.000000e+00> : vector<8x3xf32>
    %17 = tpu.matmul %14, %16, %cst_20 {dimension_numbers = #tpu.dot_dimension_numbers<[1], [0], [0], [1], [0, 0, 1, 1], [], []>} : vector<8x256xf32>, vector<256x3xf32>, vector<8x3xf32> -> vector<8x3xf32>
    %18 = arith.addf %12, %17 : vector<8x3xf32>
    %c0_21 = arith.constant 0 : index
    %c0_22 = arith.constant 0 : index
    %c0_23 = arith.constant 0 : index
    %19 = vector.load %arg4[%c0_21, %c0_22, %c0_23] : memref<1x8x3xf32, #tpu.memory_space<vmem>>, vector<1x8x3xf32>
    %20 = vector.shape_cast %19 : vector<1x8x3xf32> to vector<8x3xf32>
    %21 = vector.shape_cast %18 : vector<8x3xf32> to vector<1x8x3xf32>
    tpu.vector_store %arg4[%c0_21, %c0_22, %c0_23], %21 {strides = array<i32>} : memref<1x8x3xf32, #tpu.memory_space<vmem>>, vector<1x8x3xf32>,
    return
  }
  func.func @transform_0(%arg0: i32, %arg1: i32) -> (i32, i32, i32, i32) {
    %c0_i32 = arith.constant 0 : i32
    %c0_i32_0 = arith.constant 0 : i32
    %c0_i32_1 = arith.constant 0 : i32
    return %arg0, %c0_i32, %arg1, %c0_i32_0 : i32, i32, i32, i32
  }
  func.func @transform_1(%arg0: i32, %arg1: i32) -> (i32, i32, i32) {
    %c0_i32 = arith.constant 0 : i32
    %c0_i32_0 = arith.constant 0 : i32
    %c0_i32_1 = arith.constant 0 : i32
    %c0_i32_2 = arith.constant 0 : i32
    return %c0_i32, %c0_i32_0, %c0_i32_1 : i32, i32, i32
  }
  func.func @transform_2(%arg0: i32, %arg1: i32) -> (i32, i32, i32) {
    %c0_i32 = arith.constant 0 : i32
    %c0_i32_0 = arith.constant 0 : i32
    return %arg0, %arg1, %c0_i32 : i32, i32, i32
  }
}

module attributes {stable_mosaic.version = 11 : i64} {
  func.func @head_kernel(%arg0: i32, %arg1: memref<8x6xf32, #tpu.memory_space<vmem>>, %arg2: memref<6x2048xf32, #tpu.memory_space<vmem>>, %arg3: memref<1x2048xf32, #tpu.memory_space<vmem>>, %arg4: memref<2048x256xbf16, #tpu.memory_space<vmem>>, %arg5: memref<1x256xf32, #tpu.memory_space<vmem>>, %arg6: memref<1x256xf32, #tpu.memory_space<vmem>>, %arg7: memref<256x128xbf16, #tpu.memory_space<vmem>>, %arg8: memref<1x128xf32, #tpu.memory_space<vmem>>, %arg9: memref<1x1x128xf32, #tpu.memory_space<vmem>>) attributes {dimension_semantics = [#tpu.dimension_semantics<parallel>], iteration_bounds = array<i64: 2>, scalar_prefetch = 0 : i64, scratch_operands = 0 : i64, tpu.core_type = #tpu.core_type<tc>, window_params = [{transform_indices = @transform_0, window_bounds = array<i64: 8, 6>}, {pipeline_mode = #tpu.pipeline_mode<synchronous>, transform_indices = @transform_1, window_bounds = array<i64: 6, 2048>}, {pipeline_mode = #tpu.pipeline_mode<synchronous>, transform_indices = @transform_2, window_bounds = array<i64: 1, 2048>}, {pipeline_mode = #tpu.pipeline_mode<synchronous>, transform_indices = @transform_3, window_bounds = array<i64: 2048, 256>}, {pipeline_mode = #tpu.pipeline_mode<synchronous>, transform_indices = @transform_4, window_bounds = array<i64: 1, 256>}, {pipeline_mode = #tpu.pipeline_mode<synchronous>, transform_indices = @transform_5, window_bounds = array<i64: 1, 256>}, {pipeline_mode = #tpu.pipeline_mode<synchronous>, transform_indices = @transform_6, window_bounds = array<i64: 256, 128>}, {pipeline_mode = #tpu.pipeline_mode<synchronous>, transform_indices = @transform_7, window_bounds = array<i64: 1, 128>}, {transform_indices = @transform_8, window_bounds = array<i64: 1, 1, 128>}]} {
    %c0 = arith.constant 0 : index
    %c0_0 = arith.constant 0 : index
    %0 = vector.load %arg1[%c0, %c0_0] : memref<8x6xf32, #tpu.memory_space<vmem>>, vector<8x6xf32>
    %1 = vector.extract_strided_slice %0 {offsets = [0, 0], sizes = [8, 1], strides = [1, 1]} : vector<8x6xf32> to vector<8x1xf32>
    %c0_1 = arith.constant 0 : index
    %c0_2 = arith.constant 0 : index
    %2 = vector.load %arg2[%c0_1, %c0_2] : memref<6x2048xf32, #tpu.memory_space<vmem>>, vector<1x2048xf32>
    %3 = vector.broadcast %1 : vector<8x1xf32> to vector<8x2048xf32>
    %4 = vector.broadcast %2 : vector<1x2048xf32> to vector<8x2048xf32>
    %5 = arith.mulf %3, %4 : vector<8x2048xf32>
    %6 = vector.extract_strided_slice %0 {offsets = [0, 1], sizes = [8, 1], strides = [1, 1]} : vector<8x6xf32> to vector<8x1xf32>
    %c1 = arith.constant 1 : index
    %c0_3 = arith.constant 0 : index
    %7 = vector.load %arg2[%c1, %c0_3] : memref<6x2048xf32, #tpu.memory_space<vmem>>, vector<1x2048xf32>
    %8 = vector.broadcast %6 : vector<8x1xf32> to vector<8x2048xf32>
    %9 = vector.broadcast %7 : vector<1x2048xf32> to vector<8x2048xf32>
    %10 = arith.mulf %8, %9 : vector<8x2048xf32>
    %11 = arith.addf %5, %10 : vector<8x2048xf32>
    %12 = vector.extract_strided_slice %0 {offsets = [0, 2], sizes = [8, 1], strides = [1, 1]} : vector<8x6xf32> to vector<8x1xf32>
    %c2 = arith.constant 2 : index
    %c0_4 = arith.constant 0 : index
    %13 = vector.load %arg2[%c2, %c0_4] : memref<6x2048xf32, #tpu.memory_space<vmem>>, vector<1x2048xf32>
    %14 = vector.broadcast %12 : vector<8x1xf32> to vector<8x2048xf32>
    %15 = vector.broadcast %13 : vector<1x2048xf32> to vector<8x2048xf32>
    %16 = arith.mulf %14, %15 : vector<8x2048xf32>
    %17 = arith.addf %11, %16 : vector<8x2048xf32>
    %18 = vector.extract_strided_slice %0 {offsets = [0, 3], sizes = [8, 1], strides = [1, 1]} : vector<8x6xf32> to vector<8x1xf32>
    %c3 = arith.constant 3 : index
    %c0_5 = arith.constant 0 : index
    %19 = vector.load %arg2[%c3, %c0_5] : memref<6x2048xf32, #tpu.memory_space<vmem>>, vector<1x2048xf32>
    %20 = vector.broadcast %18 : vector<8x1xf32> to vector<8x2048xf32>
    %21 = vector.broadcast %19 : vector<1x2048xf32> to vector<8x2048xf32>
    %22 = arith.mulf %20, %21 : vector<8x2048xf32>
    %23 = arith.addf %17, %22 : vector<8x2048xf32>
    %24 = vector.extract_strided_slice %0 {offsets = [0, 4], sizes = [8, 1], strides = [1, 1]} : vector<8x6xf32> to vector<8x1xf32>
    %c4 = arith.constant 4 : index
    %c0_6 = arith.constant 0 : index
    %25 = vector.load %arg2[%c4, %c0_6] : memref<6x2048xf32, #tpu.memory_space<vmem>>, vector<1x2048xf32>
    %26 = vector.broadcast %24 : vector<8x1xf32> to vector<8x2048xf32>
    %27 = vector.broadcast %25 : vector<1x2048xf32> to vector<8x2048xf32>
    %28 = arith.mulf %26, %27 : vector<8x2048xf32>
    %29 = arith.addf %23, %28 : vector<8x2048xf32>
    %30 = vector.extract_strided_slice %0 {offsets = [0, 5], sizes = [8, 1], strides = [1, 1]} : vector<8x6xf32> to vector<8x1xf32>
    %c5 = arith.constant 5 : index
    %c0_7 = arith.constant 0 : index
    %31 = vector.load %arg2[%c5, %c0_7] : memref<6x2048xf32, #tpu.memory_space<vmem>>, vector<1x2048xf32>
    %32 = vector.broadcast %30 : vector<8x1xf32> to vector<8x2048xf32>
    %33 = vector.broadcast %31 : vector<1x2048xf32> to vector<8x2048xf32>
    %34 = arith.mulf %32, %33 : vector<8x2048xf32>
    %35 = arith.addf %29, %34 : vector<8x2048xf32>
    %c0_8 = arith.constant 0 : index
    %c0_9 = arith.constant 0 : index
    %36 = vector.load %arg3[%c0_8, %c0_9] : memref<1x2048xf32, #tpu.memory_space<vmem>>, vector<1x2048xf32>
    %37 = vector.broadcast %36 : vector<1x2048xf32> to vector<8x2048xf32>
    %38 = arith.addf %35, %37 : vector<8x2048xf32>
    %cst = arith.constant 0.000000e+00 : f32
    %39 = vector.broadcast %cst : f32 to vector<8x2048xf32>
    %40 = arith.maximumf %38, %39 : vector<8x2048xf32>
    %41 = arith.truncf %40 : vector<8x2048xf32> to vector<8x2048xbf16>
    %c0_10 = arith.constant 0 : index
    %c0_11 = arith.constant 0 : index
    %42 = vector.load %arg4[%c0_10, %c0_11] : memref<2048x256xbf16, #tpu.memory_space<vmem>>, vector<2048x256xbf16>
    %cst_12 = arith.constant dense<0.000000e+00> : vector<8x256xf32>
    %43 = tpu.matmul %41, %42, %cst_12 {dimension_numbers = #tpu.dot_dimension_numbers<[1], [0], [0], [1], [0, 0, 1, 1], [], []>} : vector<8x2048xbf16>, vector<2048x256xbf16>, vector<8x256xf32> -> vector<8x256xf32>
    %c0_13 = arith.constant 0 : index
    %c0_14 = arith.constant 0 : index
    %44 = vector.load %arg5[%c0_13, %c0_14] : memref<1x256xf32, #tpu.memory_space<vmem>>, vector<1x256xf32>
    %45 = vector.broadcast %44 : vector<1x256xf32> to vector<8x256xf32>
    %46 = arith.mulf %43, %45 : vector<8x256xf32>
    %c0_15 = arith.constant 0 : index
    %c0_16 = arith.constant 0 : index
    %47 = vector.load %arg6[%c0_15, %c0_16] : memref<1x256xf32, #tpu.memory_space<vmem>>, vector<1x256xf32>
    %48 = vector.broadcast %47 : vector<1x256xf32> to vector<8x256xf32>
    %49 = arith.addf %46, %48 : vector<8x256xf32>
    %cst_17 = arith.constant 0.000000e+00 : f32
    %50 = vector.broadcast %cst_17 : f32 to vector<8x256xf32>
    %51 = arith.maximumf %49, %50 : vector<8x256xf32>
    %52 = arith.truncf %51 : vector<8x256xf32> to vector<8x256xbf16>
    %c0_18 = arith.constant 0 : index
    %c0_19 = arith.constant 0 : index
    %53 = vector.load %arg7[%c0_18, %c0_19] : memref<256x128xbf16, #tpu.memory_space<vmem>>, vector<256x128xbf16>
    %cst_20 = arith.constant dense<0.000000e+00> : vector<8x128xf32>
    %54 = tpu.matmul %52, %53, %cst_20 {dimension_numbers = #tpu.dot_dimension_numbers<[1], [0], [0], [1], [0, 0, 1, 1], [], []>} : vector<8x256xbf16>, vector<256x128xbf16>, vector<8x128xf32> -> vector<8x128xf32>
    %c0_21 = arith.constant 0 : index
    %c0_22 = arith.constant 0 : index
    %55 = vector.load %arg8[%c0_21, %c0_22] : memref<1x128xf32, #tpu.memory_space<vmem>>, vector<1x128xf32>
    %56 = vector.broadcast %55 : vector<1x128xf32> to vector<8x128xf32>
    %57 = arith.addf %54, %56 : vector<8x128xf32>
    %58 = vector.shape_cast %57 : vector<8x128xf32> to vector<1x8x128xf32>
    %cst_23 = arith.constant dense<0xFF800000> : vector<1x128xf32>
    %59 = vector.multi_reduction <maximumf>, %58, %cst_23 [1] : vector<1x8x128xf32> to vector<1x128xf32>
    %60 = vector.shape_cast %59 : vector<1x128xf32> to vector<1x1x128xf32>
    %61 = arith.negf %60 : vector<1x1x128xf32>
    %62 = math.exp %61 : vector<1x1x128xf32>
    %cst_24 = arith.constant 1.000000e+00 : f32
    %63 = vector.broadcast %cst_24 : f32 to vector<1x1x128xf32>
    %64 = arith.addf %63, %62 : vector<1x1x128xf32>
    %65 = arith.divf %63, %64 : vector<1x1x128xf32>
    %c0_25 = arith.constant 0 : index
    %c0_26 = arith.constant 0 : index
    %c0_27 = arith.constant 0 : index
    %66 = vector.load %arg9[%c0_25, %c0_26, %c0_27] : memref<1x1x128xf32, #tpu.memory_space<vmem>>, vector<1x1x128xf32>
    tpu.vector_store %arg9[%c0_25, %c0_26, %c0_27], %65 {strides = array<i32>} : memref<1x1x128xf32, #tpu.memory_space<vmem>>, vector<1x1x128xf32>,
    return
  }
  func.func @transform_0(%arg0: i32) -> (i32, i32) {
    %c0_i32 = arith.constant 0 : i32
    %c0_i32_0 = arith.constant 0 : i32
    return %arg0, %c0_i32 : i32, i32
  }
  func.func @transform_1(%arg0: i32) -> (i32, i32) {
    %c0_i32 = arith.constant 0 : i32
    %c0_i32_0 = arith.constant 0 : i32
    %c0_i32_1 = arith.constant 0 : i32
    return %c0_i32, %c0_i32_0 : i32, i32
  }
  func.func @transform_2(%arg0: i32) -> (i32, i32) {
    %c0_i32 = arith.constant 0 : i32
    %c0_i32_0 = arith.constant 0 : i32
    %c0_i32_1 = arith.constant 0 : i32
    return %c0_i32, %c0_i32_0 : i32, i32
  }
  func.func @transform_3(%arg0: i32) -> (i32, i32) {
    %c0_i32 = arith.constant 0 : i32
    %c0_i32_0 = arith.constant 0 : i32
    %c0_i32_1 = arith.constant 0 : i32
    return %c0_i32, %c0_i32_0 : i32, i32
  }
  func.func @transform_4(%arg0: i32) -> (i32, i32) {
    %c0_i32 = arith.constant 0 : i32
    %c0_i32_0 = arith.constant 0 : i32
    %c0_i32_1 = arith.constant 0 : i32
    return %c0_i32, %c0_i32_0 : i32, i32
  }
  func.func @transform_5(%arg0: i32) -> (i32, i32) {
    %c0_i32 = arith.constant 0 : i32
    %c0_i32_0 = arith.constant 0 : i32
    %c0_i32_1 = arith.constant 0 : i32
    return %c0_i32, %c0_i32_0 : i32, i32
  }
  func.func @transform_6(%arg0: i32) -> (i32, i32) {
    %c0_i32 = arith.constant 0 : i32
    %c0_i32_0 = arith.constant 0 : i32
    %c0_i32_1 = arith.constant 0 : i32
    return %c0_i32, %c0_i32_0 : i32, i32
  }
  func.func @transform_7(%arg0: i32) -> (i32, i32) {
    %c0_i32 = arith.constant 0 : i32
    %c0_i32_0 = arith.constant 0 : i32
    %c0_i32_1 = arith.constant 0 : i32
    return %c0_i32, %c0_i32_0 : i32, i32
  }
  func.func @transform_8(%arg0: i32) -> (i32, i32, i32) {
    %c0_i32 = arith.constant 0 : i32
    %c0_i32_0 = arith.constant 0 : i32
    %c0_i32_1 = arith.constant 0 : i32
    return %arg0, %c0_i32, %c0_i32_0 : i32, i32, i32
  }
}

</mosaic_0001>

<bundles_post_ra>
// kernel: mul.30
= control target key start
LH: loop header
LB: loop body
LE: loop exit
PB: predicated region body
PF: predicated region fallthrough
CT: control target
= control target key end

     0   :  { %s706_s0 = inlined_call_operand.vmem [shape: f32[3,3], index: 0, kind: input, shape index: {}]   ;;  %s707_s1 = inlined_call_operand.vmem [shape: f32[3,256,3], index: 1, kind: output, shape index: {}]  }
   0x1   :  { %v310_v0 = vld [vmem:[%s706_s0] ss:$0 sm:$0xff]  ;;  %v315_v1 = vld [vmem:[%s706_s0 + $0x1] ss:$0 sm:$0xff]  ;;  %v320_v2 = vld [vmem:[%s706_s0 + $0x2] ss:$0 sm:$0xff] }
   0x2   :  { %5 = vst [vmem:[%s707_s1] sm:$0xff] %v310_v0  ;;  %201 = vst [vmem:[%s707_s1 + $0x100] sm:$0xff] %v315_v1 }
   0x3   :  { %203 = vst [vmem:[%s707_s1 + $0x200] sm:$0xff] %v320_v2  ;;  %204 = vst [vmem:[%s707_s1 + $0x8] sm:$0xff] %v310_v0 }
   0x4   :  { %205 = vst [vmem:[%s707_s1 + $0x108] sm:$0xff] %v315_v1  ;;  %206 = vst [vmem:[%s707_s1 + $0x208] sm:$0xff] %v320_v2 }
   0x5   :  { %207 = vst [vmem:[%s707_s1 + $0x10] sm:$0xff] %v310_v0  ;;  %208 = vst [vmem:[%s707_s1 + $0x110] sm:$0xff] %v315_v1 }
   0x6   :  { %209 = vst [vmem:[%s707_s1 + $0x210] sm:$0xff] %v320_v2  ;;  %210 = vst [vmem:[%s707_s1 + $0x18] sm:$0xff] %v310_v0 }
   0x7   :  { %211 = vst [vmem:[%s707_s1 + $0x118] sm:$0xff] %v315_v1  ;;  %212 = vst [vmem:[%s707_s1 + $0x218] sm:$0xff] %v320_v2 }
   0x8   :  { %213 = vst [vmem:[%s707_s1 + $0x20] sm:$0xff] %v310_v0  ;;  %214 = vst [vmem:[%s707_s1 + $0x120] sm:$0xff] %v315_v1 }
   0x9   :  { %215 = vst [vmem:[%s707_s1 + $0x220] sm:$0xff] %v320_v2  ;;  %216 = vst [vmem:[%s707_s1 + $0x28] sm:$0xff] %v310_v0 }
   0xa   :  { %217 = vst [vmem:[%s707_s1 + $0x128] sm:$0xff] %v315_v1  ;;  %218 = vst [vmem:[%s707_s1 + $0x228] sm:$0xff] %v320_v2 }
   0xb   :  { %219 = vst [vmem:[%s707_s1 + $0x30] sm:$0xff] %v310_v0  ;;  %220 = vst [vmem:[%s707_s1 + $0x130] sm:$0xff] %v315_v1 }
   0xc   :  { %221 = vst [vmem:[%s707_s1 + $0x230] sm:$0xff] %v320_v2  ;;  %222 = vst [vmem:[%s707_s1 + $0x38] sm:$0xff] %v310_v0 }
   0xd   :  { %223 = vst [vmem:[%s707_s1 + $0x138] sm:$0xff] %v315_v1  ;;  %224 = vst [vmem:[%s707_s1 + $0x238] sm:$0xff] %v320_v2 }
   0xe   :  { %225 = vst [vmem:[%s707_s1 + $0x40] sm:$0xff] %v310_v0  ;;  %226 = vst [vmem:[%s707_s1 + $0x140] sm:$0xff] %v315_v1 }
   0xf   :  { %227 = vst [vmem:[%s707_s1 + $0x240] sm:$0xff] %v320_v2  ;;  %228 = vst [vmem:[%s707_s1 + $0x48] sm:$0xff] %v310_v0 }
  0x10   :  { %229 = vst [vmem:[%s707_s1 + $0x148] sm:$0xff] %v315_v1  ;;  %230 = vst [vmem:[%s707_s1 + $0x248] sm:$0xff] %v320_v2 }
  0x11   :  { %231 = vst [vmem:[%s707_s1 + $0x50] sm:$0xff] %v310_v0  ;;  %232 = vst [vmem:[%s707_s1 + $0x150] sm:$0xff] %v315_v1 }
  0x12   :  { %233 = vst [vmem:[%s707_s1 + $0x250] sm:$0xff] %v320_v2  ;;  %234 = vst [vmem:[%s707_s1 + $0x58] sm:$0xff] %v310_v0 }
  0x13   :  { %235 = vst [vmem:[%s707_s1 + $0x158] sm:$0xff] %v315_v1  ;;  %236 = vst [vmem:[%s707_s1 + $0x258] sm:$0xff] %v320_v2 }
  0x14   :  { %237 = vst [vmem:[%s707_s1 + $0x60] sm:$0xff] %v310_v0  ;;  %238 = vst [vmem:[%s707_s1 + $0x160] sm:$0xff] %v315_v1 }
  0x15   :  { %239 = vst [vmem:[%s707_s1 + $0x260] sm:$0xff] %v320_v2  ;;  %240 = vst [vmem:[%s707_s1 + $0x68] sm:$0xff] %v310_v0 }
  0x16   :  { %241 = vst [vmem:[%s707_s1 + $0x168] sm:$0xff] %v315_v1  ;;  %242 = vst [vmem:[%s707_s1 + $0x268] sm:$0xff] %v320_v2 }
  0x17   :  { %243 = vst [vmem:[%s707_s1 + $0x70] sm:$0xff] %v310_v0  ;;  %244 = vst [vmem:[%s707_s1 + $0x170] sm:$0xff] %v315_v1 }
  0x18   :  { %245 = vst [vmem:[%s707_s1 + $0x270] sm:$0xff] %v320_v2  ;;  %246 = vst [vmem:[%s707_s1 + $0x78] sm:$0xff] %v310_v0 }
  0x19   :  { %247 = vst [vmem:[%s707_s1 + $0x178] sm:$0xff] %v315_v1  ;;  %248 = vst [vmem:[%s707_s1 + $0x278] sm:$0xff] %v320_v2 }
  0x1a   :  { %249 = vst [vmem:[%s707_s1 + $0x80] sm:$0xff] %v310_v0  ;;  %250 = vst [vmem:[%s707_s1 + $0x180] sm:$0xff] %v315_v1 }
  0x1b   :  { %251 = vst [vmem:[%s707_s1 + $0x280] sm:$0xff] %v320_v2  ;;  %252 = vst [vmem:[%s707_s1 + $0x88] sm:$0xff] %v310_v0 }
  0x1c   :  { %253 = vst [vmem:[%s707_s1 + $0x188] sm:$0xff] %v315_v1  ;;  %254 = vst [vmem:[%s707_s1 + $0x288] sm:$0xff] %v320_v2 }
  0x1d   :  { %255 = vst [vmem:[%s707_s1 + $0x90] sm:$0xff] %v310_v0  ;;  %256 = vst [vmem:[%s707_s1 + $0x190] sm:$0xff] %v315_v1 }
  0x1e   :  { %257 = vst [vmem:[%s707_s1 + $0x290] sm:$0xff] %v320_v2  ;;  %258 = vst [vmem:[%s707_s1 + $0x98] sm:$0xff] %v310_v0 }
  0x1f   :  { %259 = vst [vmem:[%s707_s1 + $0x198] sm:$0xff] %v315_v1  ;;  %260 = vst [vmem:[%s707_s1 + $0x298] sm:$0xff] %v320_v2 }
  0x20   :  { %261 = vst [vmem:[%s707_s1 + $0xa0] sm:$0xff] %v310_v0  ;;  %262 = vst [vmem:[%s707_s1 + $0x1a0] sm:$0xff] %v315_v1 }
  0x21   :  { %263 = vst [vmem:[%s707_s1 + $0x2a0] sm:$0xff] %v320_v2  ;;  %264 = vst [vmem:[%s707_s1 + $0xa8] sm:$0xff] %v310_v0 }
  0x22   :  { %265 = vst [vmem:[%s707_s1 + $0x1a8] sm:$0xff] %v315_v1  ;;  %266 = vst [vmem:[%s707_s1 + $0x2a8] sm:$0xff] %v320_v2 }
  0x23   :  { %267 = vst [vmem:[%s707_s1 + $0xb0] sm:$0xff] %v310_v0  ;;  %268 = vst [vmem:[%s707_s1 + $0x1b0] sm:$0xff] %v315_v1 }
  0x24   :  { %269 = vst [vmem:[%s707_s1 + $0x2b0] sm:$0xff] %v320_v2  ;;  %270 = vst [vmem:[%s707_s1 + $0xb8] sm:$0xff] %v310_v0 }
  0x25   :  { %271 = vst [vmem:[%s707_s1 + $0x1b8] sm:$0xff] %v315_v1  ;;  %272 = vst [vmem:[%s707_s1 + $0x2b8] sm:$0xff] %v320_v2 }
  0x26   :  { %273 = vst [vmem:[%s707_s1 + $0xc0] sm:$0xff] %v310_v0  ;;  %274 = vst [vmem:[%s707_s1 + $0x1c0] sm:$0xff] %v315_v1 }
  0x27   :  { %275 = vst [vmem:[%s707_s1 + $0x2c0] sm:$0xff] %v320_v2  ;;  %276 = vst [vmem:[%s707_s1 + $0xc8] sm:$0xff] %v310_v0 }
  0x28   :  { %277 = vst [vmem:[%s707_s1 + $0x1c8] sm:$0xff] %v315_v1  ;;  %278 = vst [vmem:[%s707_s1 + $0x2c8] sm:$0xff] %v320_v2 }
  0x29   :  { %279 = vst [vmem:[%s707_s1 + $0xd0] sm:$0xff] %v310_v0  ;;  %280 = vst [vmem:[%s707_s1 + $0x1d0] sm:$0xff] %v315_v1 }
  0x2a   :  { %281 = vst [vmem:[%s707_s1 + $0x2d0] sm:$0xff] %v320_v2  ;;  %282 = vst [vmem:[%s707_s1 + $0xd8] sm:$0xff] %v310_v0 }
  0x2b   :  { %283 = vst [vmem:[%s707_s1 + $0x1d8] sm:$0xff] %v315_v1  ;;  %284 = vst [vmem:[%s707_s1 + $0x2d8] sm:$0xff] %v320_v2 }
  0x2c   :  { %285 = vst [vmem:[%s707_s1 + $0xe0] sm:$0xff] %v310_v0  ;;  %286 = vst [vmem:[%s707_s1 + $0x1e0] sm:$0xff] %v315_v1 }
  0x2d   :  { %287 = vst [vmem:[%s707_s1 + $0x2e0] sm:$0xff] %v320_v2  ;;  %288 = vst [vmem:[%s707_s1 + $0xe8] sm:$0xff] %v310_v0 }
  0x2e   :  { %289 = vst [vmem:[%s707_s1 + $0x1e8] sm:$0xff] %v315_v1  ;;  %290 = vst [vmem:[%s707_s1 + $0x2e8] sm:$0xff] %v320_v2 }
  0x2f   :  { %291 = vst [vmem:[%s707_s1 + $0xf0] sm:$0xff] %v310_v0  ;;  %292 = vst [vmem:[%s707_s1 + $0x1f0] sm:$0xff] %v315_v1 }
  0x30   :  { %293 = vst [vmem:[%s707_s1 + $0x2f0] sm:$0xff] %v320_v2  ;;  %294 = vst [vmem:[%s707_s1 + $0xf8] sm:$0xff] %v310_v0 }
  0x31   :  { %295 = vst [vmem:[%s707_s1 + $0x1f8] sm:$0xff] %v315_v1  ;;  %296 = vst [vmem:[%s707_s1 + $0x2f8] sm:$0xff] %v320_v2 }

// kernel: tal_net_forward.4
= control target key start
LH: loop header
LB: loop body
LE: loop exit
PB: predicated region body
PF: predicated region fallthrough
CT: control target
= control target key end

     0   :  { %s686_s9 = smov 0   ;;  %s688_s10 = smov 0   ;;  %s830_s0 = inlined_call_operand.vmem [shape: f32[2,3,8,64], index: 0, kind: input, shape index: {}]   ;;  %s831_s1 = inlined_call_operand.vmem [shape: f32[3,64,3], index: 1, kind: input, shape index: {}]   ;;  %s832_s2 = inlined_call_operand.vmem [shape: f32[2,8,3], index: 2, kind: output, shape index: {}]  }
   0x1   :  { %s690_s11 = smov 0  }
   0x2 LB: > { %s24_s12 = sadd.s32 1, %s663_s10  ;;  %p508_p0 = scmp.ge.s32.totalorder %s667_s11, 1  ;;  %s667_s11 = sphi %s690_s11, %s12_s11   ;;  %s663_s10 = sphi %s688_s10, %s834_s10   ;;  %s659_s9 = sphi %s686_s9, %s833_s9  }
   0x3   : > { %p26_p1 = scmp.ge.s32.totalorder %s24_s12, 2  ;;  %p131_p2 = scmp.lt.s32.totalorder %s667_s11, 3 }
   0x5   : > { %s836_s12 = smov (%p26_p1, %s24_s12), 0  ;;  %p132_p3 = pnand %p508_p0, %p131_p2 }
   0x6   : > { %p158_p4 = scmp.lt.s32.totalorder (!%p132_p3), %s659_s9, 1 }
   0x7   : > { %135 = sbr.rel (%p132_p3) target bundleno = 242 (0xf2), region = 28 }
   0xc   : > { %v519_v0 = vld [vmem:[%s831_s1 + $0x78] sm:$0xff]  ;;  %v669_v2 = vmov 0.0   ;;  %v518_v3 = vld [vmem:[%s831_s1 + $0x70] sm:$0xff]  ;;  %v517_v5 = vld [vmem:[%s831_s1 + $0x68] sm:$0xff]  ;;  %s838_s9 = smov (!%p158_p4, %s659_s9), 1  ;;  %vm193_vm0 = vcmask 523264  }
   0xd   : > { %v181_v1 = vld [vmem:[%s831_s1 + $0x38] sm:$0xff]  ;;  %561 = vmatprep.subr.mxu0 %v669_v2  ;;  %580 = vmatprep.subr.mxu1 %v669_v2  ;;  %v180_v4 = vld [vmem:[%s831_s1 + $0x30] sm:$0xff]  ;;  %v179_v6 = vld [vmem:[%s831_s1 + $0x28] sm:$0xff]  ;;  %s618_s5 = smul.u32 24, %s838_s9  ;;  %vm670_vm1 = vmmov 0   ;;  %s510_s17 = sshll.u32 %s838_s9, 3 }
   0xe   : > { %562 = vmatpush3.msra.mxu0 %v519_v0  ;;  %581 = vmatpush3.msra.mxu1 %v181_v1  ;;  %v516_v7 = vld [vmem:[%s831_s1 + $0x60] sm:$0xff]  ;;  %v515_v9 = vld [vmem:[%s831_s1 + $0x58] sm:$0xff]  ;;  %v514_v11 = vld [vmem:[%s831_s1 + $0x50] sm:$0xff]  ;;  %s172_s21 = scalar_lea.vmem %s832_s2, %s510_s17  ;;  %vm425_vm2 = vcmask 23552  }
   0xf   : > { %563 = vmatprep.subr.mxu0 %v669_v2  ;;  %582 = vmatprep.subr.mxu1 %v669_v2  ;;  %v178_v8 = vld [vmem:[%s831_s1 + $0x20] sm:$0xff]  ;;  %v177_v10 = vld [vmem:[%s831_s1 + $0x18] sm:$0xff]  ;;  %v176_v12 = vld [vmem:[%s831_s1 + $0x10] sm:$0xff]  ;;  %s764_s20 = scalar_lea.vmem %s830_s0, %s618_s5 }
  0x10   : > { %564 = vmatpush3.msra.mxu0 %v518_v3  ;;  %583 = vmatpush3.msra.mxu1 %v180_v4  ;;  %v513_v13 = vld [vmem:[%s831_s1 + $0x48] sm:$0xff]  ;;  %v512_v15 = vld [vmem:[%s831_s1 + $0x40] sm:$0xff]  ;;  %v530_v19 = vld [vmem:[%s831_s1 + $0xb8] sm:$0xff] }
  0x11   : > { %565 = vmatprep.subr.mxu0 %v669_v2  ;;  %584 = vmatprep.subr.mxu1 %v669_v2  ;;  %v175_v14 = vld [vmem:[%s831_s1 + $0x8] sm:$0xff]  ;;  %v174_v17 = vld [vmem:[%s831_s1] sm:$0xff]  ;;  %v529_v20 = vld [vmem:[%s831_s1 + $0xb0] sm:$0xff] }
  0x12   : > { %566 = vmatpush3.msra.mxu0 %v517_v5  ;;  %585 = vmatpush3.msra.mxu1 %v179_v6  ;;  %v511_v16 = vld [vmem:[%s764_s20 + $0x8] sm:$0xff]  ;;  %v173_v18 = vld [vmem:[%s764_s20] sm:$0xff]  ;;  %v526_v23 = vld [vmem:[%s831_s1 + $0x98] sm:$0xff] }
  0x13   : > { %567 = vmatprep.subr.mxu0 %v669_v2  ;;  %586 = vmatprep.subr.mxu1 %v669_v2  ;;  %v528_v21 = vld [vmem:[%s831_s1 + $0xa8] sm:$0xff]  ;;  %v527_v22 = vld [vmem:[%s831_s1 + $0xa0] sm:$0xff]  ;;  %v525_v24 = vld [vmem:[%s831_s1 + $0x90] sm:$0xff] }
  0x14   : > { %568 = vmatpush3.msra.mxu0 %v516_v7  ;;  %587 = vmatpush3.msra.mxu1 %v178_v8  ;;  %v524_v25 = vld [vmem:[%s831_s1 + $0x88] sm:$0xff]  ;;  %v523_v26 = vld [vmem:[%s831_s1 + $0x80] sm:$0xff]  ;;  %v522_v27 = vld [vmem:[%s764_s20 + $0x10] sm:$0xff] }
  0x15   : > { %569 = vmatprep.subr.mxu0 %v669_v2  ;;  %588 = vmatprep.subr.mxu1 %v669_v2 }
  0x16   : > { %570 = vmatpush3.msra.mxu0 %v515_v9  ;;  %589 = vmatpush3.msra.mxu1 %v177_v10 }
  0x17   : > { %571 = vmatprep.subr.mxu0 %v669_v2  ;;  %590 = vmatprep.subr.mxu1 %v669_v2 }
  0x18   : > { %572 = vmatpush3.msra.mxu0 %v514_v11  ;;  %591 = vmatpush3.msra.mxu1 %v176_v12 }
  0x19   : > { %573 = vmatprep.subr.mxu0 %v669_v2  ;;  %592 = vmatprep.subr.mxu1 %v669_v2 }
  0x1a   : > { %574 = vmatpush3.msra.mxu0 %v513_v13  ;;  %593 = vmatpush3.msra.mxu1 %v175_v14 }
  0x1b   : > { %575 = vmatprep.subr.mxu0 %v669_v2  ;;  %577 = vmatprep.mubr.msk.f32.mxu0 %vm670_vm1, %v669_v2 }
  0x1c   : > { %576 = vmatpush3.msra.mxu0 %v512_v15  ;;  %594 = vmatprep.subr.mxu1 %v669_v2 }
  0x1d   : > { %578 = vmatmul.mubr.msk.f32.vlgmr.msra.gmra.mxu0 %vm193_vm0, %v511_v16  ;;  %595 = vmatpush3.msra.mxu1 %v174_v17 }
  0x1e   : > { %596 = vmatprep.mubr.msk.f32.mxu1 %vm670_vm1, %v669_v2  ;;  %599 = vmatprep.subr.mxu0 %v669_v2 }
  0x1f   : > { %597 = vmatmul.mubr.msk.f32.vlgmr.msra.gmra.mxu1 %vm193_vm0, %v173_v18  ;;  %600 = vmatpush3.msra.mxu0 %v530_v19 }
  0x20   : > { %601 = vmatprep.subr.mxu0 %v669_v2  ;;  %615 = vmatprep.mubr.msk.f32.mxu0 %vm670_vm1, %v669_v2 }
  0x21   : > { %602 = vmatpush3.msra.mxu0 %v529_v20 }
  0x22   : > { %603 = vmatprep.subr.mxu0 %v669_v2 }
  0x23   : > { %604 = vmatpush3.msra.mxu0 %v528_v21 }
  0x24   : > { %605 = vmatprep.subr.mxu0 %v669_v2 }
  0x25   : > { %606 = vmatpush3.msra.mxu0 %v527_v22 }
  0x26   : > { %607 = vmatprep.subr.mxu0 %v669_v2 }
  0x27   : > { %608 = vmatpush3.msra.mxu0 %v526_v23 }
  0x28   : > { %609 = vmatprep.subr.mxu0 %v669_v2 }
  0x29   : > { %610 = vmatpush3.msra.mxu0 %v525_v24 }
  0x2a   : > { %611 = vmatprep.subr.mxu0 %v669_v2 }
  0x2b   : > { %612 = vmatpush3.msra.mxu0 %v524_v25 }
  0x2c   : > { %613 = vmatprep.subr.mxu0 %v669_v2 }
  0x2d   : > { %614 = vmatpush3.msra.mxu0 %v523_v26 }
  0x2e   : > { %616 = vmatmul.mubr.msk.f32.vlgmr.msra.gmra.mxu0 %vm193_vm0, %v522_v27 }
  0xdd   : > { %v263_v28 = vpop.f32.mrf.mxu0 }
  0xdf   : > { %v336_v29 = vpop.f32.mrf.mxu1  ;;  %v579_v30 = vpop.f32.mrf.mxu0 }
  0xe0   : > { %v337_v32 = vadd.f32 %v336_v29, %v263_v28 }
  0xe1   : > { %v598_v31 = vpop.f32.mrf.mxu1 }
  0xee   : > { %v420_v33 = vpop.f32.mrf.mxu0 }
  0xef   : > { %v424_v34 = vadd.f32 %v420_v33, %v337_v32 }
  0xf0   : > { %v617_v35 = vpop.f32.mrf.mxu0 }
  0xf1   : > { %426 = vst.msk [vmem:[%s172_s21] sm:$0xff] %vm425_vm2, %v424_v34 }
  0xf2 PF: > { %s12_s11 = sadd.s32 1, %s667_s11   ;;  %s833_s9 = smov %s663_s10 }
  0xf3   : > { %p9_p5 = scmp.ge.s32.totalorder %s12_s11, 4   ;;  %s834_s10 = smov %s836_s12 }
  0xf5   :  { %11 = sbr.rel (!%p9_p5) target bundleno = 2 (0x2), region = 62 }

// kernel: tal_net_forward.3
= control target key start
LH: loop header
LB: loop body
LE: loop exit
PB: predicated region body
PF: predicated region fallthrough
CT: control target
= control target key end

     0   :  { %s821_s9 = smov 0   ;;  %s823_s10 = smov 0   ;;  %s1160_s0 = inlined_call_operand.vmem [shape: f32[2,3,8,256], index: 0, kind: input, shape index: {}]   ;;  %s1161_s1 = inlined_call_operand.vmem [shape: f32[3,256,3], index: 1, kind: input, shape index: {}]   ;;  %s1162_s2 = inlined_call_operand.vmem [shape: f32[2,8,3], index: 2, kind: output, shape index: {}]  }
   0x1   :  { %s825_s11 = smov 0  }
   0x2 LB: > { %s24_s12 = sadd.s32 1, %s800_s10  ;;  %p579_p0 = scmp.ge.s32.totalorder %s804_s11, 1  ;;  %s804_s11 = sphi %s825_s11, %s12_s11   ;;  %s800_s10 = sphi %s823_s10, %s1164_s10   ;;  %s796_s9 = sphi %s821_s9, %s1163_s9  }
   0x3   : > { %p26_p1 = scmp.ge.s32.totalorder %s24_s12, 2  ;;  %p132_p2 = scmp.lt.s32.totalorder %s804_s11, 3 }
   0x5   : > { %s1166_s12 = smov (%p26_p1, %s24_s12), 0  ;;  %p133_p3 = pnand %p579_p0, %p132_p2 }
   0x6   : > { %p160_p4 = scmp.lt.s32.totalorder (!%p133_p3), %s796_s9, 1 }
   0x7   : > { %136 = sbr.rel (%p133_p3) target bundleno = 280 (0x118), region = 28 }
   0xc   : > { %v615_v0 = vld [vmem:[%s1161_s1 + $0x1f8] sm:$0xff]  ;;  %v614_v4 = vld [vmem:[%s1161_s1 + $0x1f0] sm:$0xff]  ;;  %v613_v8 = vld [vmem:[%s1161_s1 + $0x1e8] sm:$0xff]  ;;  %s1168_s9 = smov (!%p160_p4, %s796_s9), 1  ;;  %vm493_vm0 = vcmask 23552  }
   0xd   : > { %v209_v1 = vld [vmem:[%s1161_s1 + $0xf8] sm:$0xff]  ;;  %652 = vmatprep.subr.mxu0 %v615_v0  ;;  %v208_v5 = vld [vmem:[%s1161_s1 + $0xf0] sm:$0xff]  ;;  %v207_v9 = vld [vmem:[%s1161_s1 + $0xe8] sm:$0xff]  ;;  %s757_s17 = smul.u32 48, %s1168_s9  ;;  %s581_s20 = sshll.u32 %s1168_s9, 3 }
   0xe   : > { %v599_v2 = vld [vmem:[%s1161_s1 + $0x178] sm:$0xff]  ;;  %687 = vmatprep.subr.mxu1 %v209_v1  ;;  %v598_v6 = vld [vmem:[%s1161_s1 + $0x170] sm:$0xff]  ;;  %v597_v10 = vld [vmem:[%s1161_s1 + $0x168] sm:$0xff]  ;;  %s175_s23 = scalar_lea.vmem %s1162_s2, %s581_s20 }
   0xf   : > { %v193_v3 = vld [vmem:[%s1161_s1 + $0x78] sm:$0xff]  ;;  %653 = vmatpush3.msra.mxu0 %v599_v2  ;;  %v192_v7 = vld [vmem:[%s1161_s1 + $0x70] sm:$0xff]  ;;  %v191_v11 = vld [vmem:[%s1161_s1 + $0x68] sm:$0xff]  ;;  %s1025_s8 = scalar_lea.vmem %s1160_s0, %s757_s17 }
  0x10   : > { %688 = vmatpush3.msra.mxu1 %v193_v3  ;;  %654 = vmatprep.subr.mxu0 %v614_v4  ;;  %v612_v12 = vld [vmem:[%s1161_s1 + $0x1e0] sm:$0xff]  ;;  %v611_v16 = vld [vmem:[%s1161_s1 + $0x1d8] sm:$0xff]  ;;  %v610_v20 = vld [vmem:[%s1161_s1 + $0x1d0] sm:$0xff] }
  0x11   : > { %689 = vmatprep.subr.mxu1 %v208_v5  ;;  %655 = vmatpush3.msra.mxu0 %v598_v6  ;;  %v206_v13 = vld [vmem:[%s1161_s1 + $0xe0] sm:$0xff]  ;;  %v205_v17 = vld [vmem:[%s1161_s1 + $0xd8] sm:$0xff]  ;;  %v204_v21 = vld [vmem:[%s1161_s1 + $0xd0] sm:$0xff] }
  0x12   : > { %690 = vmatpush3.msra.mxu1 %v192_v7  ;;  %656 = vmatprep.subr.mxu0 %v613_v8  ;;  %v596_v14 = vld [vmem:[%s1161_s1 + $0x160] sm:$0xff]  ;;  %v595_v18 = vld [vmem:[%s1161_s1 + $0x158] sm:$0xff]  ;;  %v594_v22 = vld [vmem:[%s1161_s1 + $0x150] sm:$0xff] }
  0x13   : > { %691 = vmatprep.subr.mxu1 %v207_v9  ;;  %v190_v15 = vld [vmem:[%s1161_s1 + $0x60] sm:$0xff]  ;;  %657 = vmatpush3.msra.mxu0 %v597_v10  ;;  %v189_v19 = vld [vmem:[%s1161_s1 + $0x58] sm:$0xff]  ;;  %v188_v23 = vld [vmem:[%s1161_s1 + $0x50] sm:$0xff] }
  0x14   : > { %692 = vmatpush3.msra.mxu1 %v191_v11  ;;  %658 = vmatprep.subr.mxu0 %v612_v12  ;;  %v609_v24 = vld [vmem:[%s1161_s1 + $0x1c8] sm:$0xff]  ;;  %v608_v28 = vld [vmem:[%s1161_s1 + $0x1c0] sm:$0xff]  ;;  %v607_v32 = vld [vmem:[%s1161_s1 + $0x1b8] sm:$0xff] }
  0x15   : > { %693 = vmatprep.subr.mxu1 %v206_v13  ;;  %659 = vmatpush3.msra.mxu0 %v596_v14  ;;  %v203_v25 = vld [vmem:[%s1161_s1 + $0xc8] sm:$0xff]  ;;  %v202_v29 = vld [vmem:[%s1161_s1 + $0xc0] sm:$0xff]  ;;  %v201_v33 = vld [vmem:[%s1161_s1 + $0xb8] sm:$0xff] }
  0x16   : > { %694 = vmatpush3.msra.mxu1 %v190_v15  ;;  %660 = vmatprep.subr.mxu0 %v611_v16  ;;  %v593_v26 = vld [vmem:[%s1161_s1 + $0x148] sm:$0xff]  ;;  %v592_v30 = vld [vmem:[%s1161_s1 + $0x140] sm:$0xff]  ;;  %v591_v34 = vld [vmem:[%s1161_s1 + $0x138] sm:$0xff] }
  0x17   : > { %695 = vmatprep.subr.mxu1 %v205_v17  ;;  %661 = vmatpush3.msra.mxu0 %v595_v18  ;;  %v187_v27 = vld [vmem:[%s1161_s1 + $0x48] sm:$0xff]  ;;  %v186_v31 = vld [vmem:[%s1161_s1 + $0x40] sm:$0xff]  ;;  %v185_v35 = vld [vmem:[%s1161_s1 + $0x38] sm:$0xff] }
  0x18   : > { %696 = vmatpush3.msra.mxu1 %v189_v19  ;;  %662 = vmatprep.subr.mxu0 %v610_v20  ;;  %v606_v36 = vld [vmem:[%s1161_s1 + $0x1b0] sm:$0xff]  ;;  %v605_v40 = vld [vmem:[%s1161_s1 + $0x1a8] sm:$0xff]  ;;  %v604_v44 = vld [vmem:[%s1161_s1 + $0x1a0] sm:$0xff] }
  0x19   : > { %697 = vmatprep.subr.mxu1 %v204_v21  ;;  %663 = vmatpush3.msra.mxu0 %v594_v22  ;;  %v200_v37 = vld [vmem:[%s1161_s1 + $0xb0] sm:$0xff]  ;;  %v199_v41 = vld [vmem:[%s1161_s1 + $0xa8] sm:$0xff]  ;;  %v198_v45 = vld [vmem:[%s1161_s1 + $0xa0] sm:$0xff] }
  0x1a   : > { %698 = vmatpush3.msra.mxu1 %v188_v23  ;;  %664 = vmatprep.subr.mxu0 %v609_v24  ;;  %v590_v38 = vld [vmem:[%s1161_s1 + $0x130] sm:$0xff]  ;;  %v589_v42 = vld [vmem:[%s1161_s1 + $0x128] sm:$0xff]  ;;  %v588_v46 = vld [vmem:[%s1161_s1 + $0x120] sm:$0xff] }
  0x1b   : > { %699 = vmatprep.subr.mxu1 %v203_v25  ;;  %665 = vmatpush3.msra.mxu0 %v593_v26  ;;  %v184_v39 = vld [vmem:[%s1161_s1 + $0x30] sm:$0xff]  ;;  %v183_v43 = vld [vmem:[%s1161_s1 + $0x28] sm:$0xff]  ;;  %v182_v47 = vld [vmem:[%s1161_s1 + $0x20] sm:$0xff] }
  0x1c   : > { %700 = vmatpush3.msra.mxu1 %v187_v27  ;;  %666 = vmatprep.subr.mxu0 %v608_v28  ;;  %v603_v48 = vld [vmem:[%s1161_s1 + $0x198] sm:$0xff]  ;;  %v602_v52 = vld [vmem:[%s1161_s1 + $0x190] sm:$0xff]  ;;  %v601_v56 = vld [vmem:[%s1161_s1 + $0x188] sm:$0xff] }
  0x1d   : > { %701 = vmatprep.subr.mxu1 %v202_v29  ;;  %667 = vmatpush3.msra.mxu0 %v592_v30  ;;  %v197_v49 = vld [vmem:[%s1161_s1 + $0x98] sm:$0xff]  ;;  %v196_v53 = vld [vmem:[%s1161_s1 + $0x90] sm:$0xff]  ;;  %v195_v57 = vld [vmem:[%s1161_s1 + $0x88] sm:$0xff] }
  0x1e   : > { %702 = vmatpush3.msra.mxu1 %v186_v31  ;;  %668 = vmatprep.subr.mxu0 %v607_v32  ;;  %v587_v50 = vld [vmem:[%s1161_s1 + $0x118] sm:$0xff]  ;;  %v586_v54 = vld [vmem:[%s1161_s1 + $0x110] sm:$0xff]  ;;  %v585_v58 = vld [vmem:[%s1161_s1 + $0x108] sm:$0xff] }
  0x1f   : > { %703 = vmatprep.subr.mxu1 %v201_v33  ;;  %669 = vmatpush3.msra.mxu0 %v591_v34  ;;  %v181_v51 = vld [vmem:[%s1161_s1 + $0x18] sm:$0xff]  ;;  %v180_v55 = vld [vmem:[%s1161_s1 + $0x10] sm:$0xff]  ;;  %v179_v59 = vld [vmem:[%s1161_s1 + $0x8] sm:$0xff] }
  0x20   : > { %704 = vmatpush3.msra.mxu1 %v185_v35  ;;  %670 = vmatprep.subr.mxu0 %v606_v36  ;;  %v600_v60 = vld [vmem:[%s1161_s1 + $0x180] sm:$0xff]  ;;  %v583_v63 = vld [vmem:[%s1025_s8 + $0x18] sm:$0xff]  ;;  %v177_v1 = vld [vmem:[%s1025_s8 + $0x8] sm:$0xff] }
  0x21   : > { %705 = vmatprep.subr.mxu1 %v200_v37  ;;  %671 = vmatpush3.msra.mxu0 %v590_v38  ;;  %v194_v61 = vld [vmem:[%s1161_s1 + $0x80] sm:$0xff]  ;;  %v582_v2 = vld [vmem:[%s1025_s8 + $0x10] sm:$0xff]  ;;  %v649_v4 = vld [vmem:[%s1161_s1 + $0x2f8] sm:$0xff] }
  0x22   : > { %706 = vmatpush3.msra.mxu1 %v184_v39  ;;  %672 = vmatprep.subr.mxu0 %v605_v40  ;;  %v584_v62 = vld [vmem:[%s1161_s1 + $0x100] sm:$0xff]  ;;  %v633_v5 = vld [vmem:[%s1161_s1 + $0x278] sm:$0xff]  ;;  %v617_v6 = vld [vmem:[%s1025_s8 + $0x28] sm:$0xff] }
  0x23   : > { %707 = vmatprep.subr.mxu1 %v199_v41  ;;  %673 = vmatpush3.msra.mxu0 %v589_v42  ;;  %v178_v0 = vld [vmem:[%s1161_s1] sm:$0xff]  ;;  %v648_v7 = vld [vmem:[%s1161_s1 + $0x2f0] sm:$0xff]  ;;  %v647_v9 = vld [vmem:[%s1161_s1 + $0x2e8] sm:$0xff] }
  0x24   : > { %708 = vmatpush3.msra.mxu1 %v183_v43  ;;  %674 = vmatprep.subr.mxu0 %v604_v44  ;;  %v176_v3 = vld [vmem:[%s1025_s8] sm:$0xff]  ;;  %v632_v8 = vld [vmem:[%s1161_s1 + $0x270] sm:$0xff]  ;;  %v631_v10 = vld [vmem:[%s1161_s1 + $0x268] sm:$0xff] }
  0x25   : > { %709 = vmatprep.subr.mxu1 %v198_v45  ;;  %675 = vmatpush3.msra.mxu0 %v588_v46  ;;  %v646_v11 = vld [vmem:[%s1161_s1 + $0x2e0] sm:$0xff]  ;;  %v645_v13 = vld [vmem:[%s1161_s1 + $0x2d8] sm:$0xff]  ;;  %v644_v15 = vld [vmem:[%s1161_s1 + $0x2d0] sm:$0xff] }
  0x26   : > { %710 = vmatpush3.msra.mxu1 %v182_v47  ;;  %676 = vmatprep.subr.mxu0 %v603_v48  ;;  %v630_v12 = vld [vmem:[%s1161_s1 + $0x260] sm:$0xff]  ;;  %v629_v14 = vld [vmem:[%s1161_s1 + $0x258] sm:$0xff]  ;;  %v628_v16 = vld [vmem:[%s1161_s1 + $0x250] sm:$0xff] }
  0x27   : > { %711 = vmatprep.subr.mxu1 %v197_v49  ;;  %677 = vmatpush3.msra.mxu0 %v587_v50  ;;  %v643_v17 = vld [vmem:[%s1161_s1 + $0x2c8] sm:$0xff]  ;;  %v642_v19 = vld [vmem:[%s1161_s1 + $0x2c0] sm:$0xff]  ;;  %v641_v21 = vld [vmem:[%s1161_s1 + $0x2b8] sm:$0xff] }
  0x28   : > { %712 = vmatpush3.msra.mxu1 %v181_v51  ;;  %678 = vmatprep.subr.mxu0 %v602_v52  ;;  %v627_v18 = vld [vmem:[%s1161_s1 + $0x248] sm:$0xff]  ;;  %v626_v20 = vld [vmem:[%s1161_s1 + $0x240] sm:$0xff]  ;;  %v625_v22 = vld [vmem:[%s1161_s1 + $0x238] sm:$0xff] }
  0x29   : > { %713 = vmatprep.subr.mxu1 %v196_v53  ;;  %679 = vmatpush3.msra.mxu0 %v586_v54  ;;  %v640_v23 = vld [vmem:[%s1161_s1 + $0x2b0] sm:$0xff]  ;;  %v639_v25 = vld [vmem:[%s1161_s1 + $0x2a8] sm:$0xff]  ;;  %v638_v27 = vld [vmem:[%s1161_s1 + $0x2a0] sm:$0xff] }
  0x2a   : > { %714 = vmatpush3.msra.mxu1 %v180_v55  ;;  %680 = vmatprep.subr.mxu0 %v601_v56  ;;  %v624_v24 = vld [vmem:[%s1161_s1 + $0x230] sm:$0xff]  ;;  %v623_v26 = vld [vmem:[%s1161_s1 + $0x228] sm:$0xff]  ;;  %v622_v28 = vld [vmem:[%s1161_s1 + $0x220] sm:$0xff] }
  0x2b   : > { %715 = vmatprep.subr.mxu1 %v195_v57  ;;  %681 = vmatpush3.msra.mxu0 %v585_v58  ;;  %v637_v29 = vld [vmem:[%s1161_s1 + $0x298] sm:$0xff]  ;;  %v636_v31 = vld [vmem:[%s1161_s1 + $0x290] sm:$0xff]  ;;  %v635_v33 = vld [vmem:[%s1161_s1 + $0x288] sm:$0xff] }
  0x2c   : > { %716 = vmatpush3.msra.mxu1 %v179_v59  ;;  %682 = vmatprep.subr.mxu0 %v600_v60  ;;  %v621_v30 = vld [vmem:[%s1161_s1 + $0x218] sm:$0xff]  ;;  %v620_v32 = vld [vmem:[%s1161_s1 + $0x210] sm:$0xff]  ;;  %v619_v34 = vld [vmem:[%s1161_s1 + $0x208] sm:$0xff] }
  0x2d   : > { %717 = vmatprep.subr.mxu1 %v194_v61  ;;  %683 = vmatpush3.msra.mxu0 %v584_v62  ;;  %v634_v35 = vld [vmem:[%s1161_s1 + $0x280] sm:$0xff] }
  0x2e   : > { %310 = vmatprep.mubr.f32.mxu0 %v583_v63  ;;  %718 = vmatpush3.msra.mxu1 %v178_v0  ;;  %v618_v36 = vld [vmem:[%s1161_s1 + $0x200] sm:$0xff] }
  0x2f   : > { %380 = vmatprep.mubr.f32.mxu1 %v177_v1  ;;  %311 = vmatmul.mubr.f32.vlgmr.msra.gmra.mxu0 %v582_v2  ;;  %v616_v37 = vld [vmem:[%s1025_s8 + $0x20] sm:$0xff] }
  0x30   : > { %381 = vmatmul.mubr.f32.vlgmr.msra.gmra.mxu1 %v176_v3  ;;  %722 = vmatprep.subr.mxu0 %v649_v4 }
  0x31   : > { %486 = vmatprep.mubr.f32.mxu0 %v617_v6  ;;  %723 = vmatpush3.msra.mxu0 %v633_v5 }
  0x32   : > { %724 = vmatprep.subr.mxu0 %v648_v7 }
  0x33   : > { %725 = vmatpush3.msra.mxu0 %v632_v8 }
  0x34   : > { %726 = vmatprep.subr.mxu0 %v647_v9 }
  0x35   : > { %727 = vmatpush3.msra.mxu0 %v631_v10 }
  0x36   : > { %728 = vmatprep.subr.mxu0 %v646_v11 }
  0x37   : > { %729 = vmatpush3.msra.mxu0 %v630_v12 }
  0x38   : > { %730 = vmatprep.subr.mxu0 %v645_v13 }
  0x39   : > { %731 = vmatpush3.msra.mxu0 %v629_v14 }
  0x3a   : > { %732 = vmatprep.subr.mxu0 %v644_v15 }
  0x3b   : > { %733 = vmatpush3.msra.mxu0 %v628_v16 }
  0x3c   : > { %734 = vmatprep.subr.mxu0 %v643_v17 }
  0x3d   : > { %735 = vmatpush3.msra.mxu0 %v627_v18 }
  0x3e   : > { %736 = vmatprep.subr.mxu0 %v642_v19 }
  0x3f   : > { %737 = vmatpush3.msra.mxu0 %v626_v20 }
  0x40   : > { %738 = vmatprep.subr.mxu0 %v641_v21 }
  0x41   : > { %739 = vmatpush3.msra.mxu0 %v625_v22 }
  0x42   : > { %740 = vmatprep.subr.mxu0 %v640_v23 }
  0x43   : > { %741 = vmatpush3.msra.mxu0 %v624_v24 }
  0x44   : > { %742 = vmatprep.subr.mxu0 %v639_v25 }
  0x45   : > { %743 = vmatpush3.msra.mxu0 %v623_v26 }
  0x46   : > { %744 = vmatprep.subr.mxu0 %v638_v27 }
  0x47   : > { %745 = vmatpush3.msra.mxu0 %v622_v28 }
  0x48   : > { %746 = vmatprep.subr.mxu0 %v637_v29 }
  0x49   : > { %747 = vmatpush3.msra.mxu0 %v621_v30 }
  0x4a   : > { %748 = vmatprep.subr.mxu0 %v636_v31 }
  0x4b   : > { %749 = vmatpush3.msra.mxu0 %v620_v32 }
  0x4c   : > { %750 = vmatprep.subr.mxu0 %v635_v33 }
  0x4d   : > { %751 = vmatpush3.msra.mxu0 %v619_v34 }
  0x4e   : > { %752 = vmatprep.subr.mxu0 %v634_v35 }
  0x4f   : > { %753 = vmatpush3.msra.mxu0 %v618_v36 }
  0x50   : > { %487 = vmatmul.mubr.f32.vlgmr.msra.gmra.mxu0 %v616_v37 }
  0xef   : > { %v684_v38 = vpop.f32.mrf.mxu0 }
  0xf0   : > { %v719_v39 = vpop.f32.mrf.mxu1 }
  0xf1   : > { %v685_v40 = vpop.f32.mrf.mxu0 }
  0xf2   : > { %v720_v41 = vpop.f32.mrf.mxu1  ;;  %v686_v42 = vadd.f32 %v685_v40, %v684_v38 }
  0xf3   : > { %v721_v43 = vadd.f32 %v720_v41, %v719_v39 }
  0xf5   : > { %v383_v46 = vadd.f32 %v721_v43, %v686_v42 }
 0x110   : > { %v754_v44 = vpop.f32.mrf.mxu0 }
 0x112   : > { %v755_v45 = vpop.f32.mrf.mxu0 }
 0x113   : > { %v756_v47 = vadd.f32 %v755_v45, %v754_v44 }
 0x115   : > { %v492_v48 = vadd.f32 %v756_v47, %v383_v46 }
 0x117   : > { %494 = vst.msk [vmem:[%s175_s23] sm:$0xff] %vm493_vm0, %v492_v48 }
 0x118 PF: > { %s12_s11 = sadd.s32 1, %s804_s11   ;;  %s1163_s9 = smov %s800_s10 }
 0x119   : > { %p9_p5 = scmp.ge.s32.totalorder %s12_s11, 4   ;;  %s1164_s10 = smov %s1166_s12 }
 0x11b   :  { %11 = sbr.rel (!%p9_p5) target bundleno = 2 (0x2), region = 62 }

// kernel: tal_net_forward.5
= control target key start
LH: loop header
LB: loop body
LE: loop exit
PB: predicated region body
PF: predicated region fallthrough
CT: control target
= control target key end

     0   :  { %s4114_s27 = smov 0   ;;  %s5735_s0 = inlined_call_operand.vmem [shape: f32[16,6], index: 0, kind: input, shape index: {}]   ;;  %s5736_s1 = inlined_call_operand.vmem [shape: f32[6,2048], index: 1, kind: input, shape index: {}]   ;;  %s5737_s2 = inlined_call_operand.vmem [shape: f32[1,2048], index: 2, kind: input, shape index: {}]   ;;  %s5738_s3 = inlined_call_operand.vmem [shape: bf16[2048,256], index: 3, kind: input, shape index: {}]   ;;  %s5739_s4 = inlined_call_operand.vmem [shape: f32[1,256], index: 4, kind: input, shape index: {}]   ;;  %s5740_s5 = inlined_call_operand.vmem [shape: f32[1,256], index: 5, kind: input, shape index: {}]   ;;  %s5741_s6 = inlined_call_operand.vmem [shape: bf16[256,128], index: 6, kind: input, shape index: {}]   ;;  %s5742_s7 = inlined_call_operand.vmem [shape: f32[1,128], index: 7, kind: input, shape index: {}]   ;;  %s5743_s8 = inlined_call_operand.vmem [shape: f32[2,1,128], index: 8, kind: output, shape index: {}]  }
   0x1 LB: > { %s3304_s28 = sadd.s32 4294967295, %s4061_s27   ;;  %p3308_p0 = scmp.ge.s32.totalorder %s4061_s27, 1  ;;  %s4061_s27 = sphi %s4114_s27, %s18_s27  }
   0x2   : > { %p261_p1 = scmp.lt.s32.totalorder %s4061_s27, 3 }
   0x4   : > { %p262_p2 = pnand %p3308_p0, %p261_p1 }
   0x6   : > { %265 = sbr.rel (%p262_p2) target bundleno = 819 (0x333), region = 52 }
   0xb   : > { %p292_p3 = scmp.lt.s32.totalorder %s3304_s28, 1  ;;  %v4063_v0 = vmov 0   ;;  %v4064_v1 = vmov 2   ;;  %v3650_v2 = vld [vmem:[%s5738_s3 + $0x74] ss:$8 sps:$4 sm:$0xff]   ;;  %v4065_v17 = vmov 1  }
   0xc   : > { %3644 = vset.pattern.permute.xlu0 %v4063_v0  ;;  %3646 = vset.pattern.permute.xlu1 %v4064_v1  ;;  %v3652_v3 = vld [vmem:[%s5738_s3 + $0x174] ss:$8 sps:$4 sm:$0xff]   ;;  %v3654_v4 = vld [vmem:[%s5738_s3 + $0x70] ss:$8 sps:$4 sm:$0xff]   ;;  %v3656_v6 = vld [vmem:[%s5738_s3 + $0x64] ss:$8 sps:$4 sm:$0xff]  }
   0xd   : > { %s5832_s28 = smov (!%p292_p3, %s3304_s28), 1  ;;  %2709 = vmatprep.subr.bf16.mxu0 %v3650_v2  ;;  %v3655_v5 = vld [vmem:[%s5738_s3 + $0x170] ss:$8 sps:$4 sm:$0xff]   ;;  %2750 = vmatprep.subr.bf16.mxu1 %v3652_v3  ;;  %v3658_v7 = vld [vmem:[%s5738_s3 + $0x164] ss:$8 sps:$4 sm:$0xff]   ;;  %v4066_v18 = vmov 3  }
   0xe   : > { %s3309_s15 = sshll.u32 %s5832_s28, 3  ;;  %2710 = vmatpush1.bf16.msra.mxu0 %v3654_v4  ;;  %2751 = vmatpush1.bf16.msra.mxu1 %v3655_v5  ;;  %v3660_v8 = vld [vmem:[%s5738_s3 + $0x60] ss:$8 sps:$4 sm:$0xff]   ;;  %v3662_v11 = vld [vmem:[%s5738_s3 + $0x54] ss:$8 sps:$4 sm:$0xff]   ;;  %v4067_v23 = vmov 4   ;;  %s298_s17 = scalar_lea.vmem %s5743_s8, %s5832_s28 }
   0xf   : > { %s295_s20 = scalar_lea.vmem %s5735_s0, %s3309_s15  ;;  %v3661_v9 = vld [vmem:[%s5738_s3 + $0x160] ss:$8 sps:$4 sm:$0xff]   ;;  %2711 = vmatprep.subr.bf16.mxu0 %v3656_v6  ;;  %2752 = vmatprep.subr.bf16.mxu1 %v3658_v7  ;;  %v3664_v12 = vld [vmem:[%s5738_s3 + $0x154] ss:$8 sps:$4 sm:$0xff]   ;;  %v3666_v13 = vld [vmem:[%s5738_s3 + $0x50] ss:$8 sps:$4 sm:$0xff]  }
  0x10   : > { %v300_v10 = vld [vmem:[%s295_s20] sm:$0xff]  ;;  %v3667_v14 = vld [vmem:[%s5738_s3 + $0x150] ss:$8 sps:$4 sm:$0xff]   ;;  %v3674_v21 = vld [vmem:[%s5738_s3 + $0x34] ss:$8 sps:$4 sm:$0xff]   ;;  %v4068_v24 = vmov 5  }
  0x11   : > { %310 = vperm.xlu0 %3644, %v300_v10   ;;  %546 = vperm.xlu1 %3646, %v300_v10   ;;  %v3668_v15 = vld [vmem:[%s5738_s3 + $0x44] ss:$8 sps:$4 sm:$0xff]   ;;  %v3672_v19 = vld [vmem:[%s5738_s3 + $0x40] ss:$8 sps:$4 sm:$0xff]   ;;  %v3676_v22 = vld [vmem:[%s5738_s3 + $0x134] ss:$8 sps:$4 sm:$0xff]  }
  0x12   : > { %2712 = vmatpush1.bf16.msra.mxu0 %v3660_v8  ;;  %2753 = vmatpush1.bf16.msra.mxu1 %v3661_v9  ;;  %v3670_v16 = vld [vmem:[%s5738_s3 + $0x144] ss:$8 sps:$4 sm:$0xff]   ;;  %v3673_v20 = vld [vmem:[%s5738_s3 + $0x140] ss:$8 sps:$4 sm:$0xff]   ;;  %v3678_v25 = vld [vmem:[%s5738_s3 + $0x30] ss:$8 sps:$4 sm:$0xff]   ;;  %v315_v9 = vlaneseq }
  0x13   : > { %2713 = vmatprep.subr.bf16.mxu0 %v3662_v11  ;;  %2754 = vmatprep.subr.bf16.mxu1 %v3664_v12  ;;  %v3679_v26 = vld [vmem:[%s5738_s3 + $0x130] ss:$8 sps:$4 sm:$0xff]   ;;  %v3680_v27 = vld [vmem:[%s5738_s3 + $0x24] ss:$8 sps:$4 sm:$0xff]   ;;  %v3684_v29 = vld [vmem:[%s5738_s3 + $0x20] ss:$8 sps:$4 sm:$0xff]  }
  0x14   : > { %v3682_v28 = vld [vmem:[%s5738_s3 + $0x124] ss:$8 sps:$4 sm:$0xff]   ;;  %v3685_v30 = vld [vmem:[%s5738_s3 + $0x120] ss:$8 sps:$4 sm:$0xff]   ;;  %v3686_v31 = vld [vmem:[%s5738_s3 + $0x14] ss:$8 sps:$4 sm:$0xff]  }
  0x15   : > { %3645 = vset.pattern.permute.xlu0 %v4065_v17  ;;  %3647 = vset.pattern.permute.xlu1 %v4066_v18  ;;  %v3688_v32 = vld [vmem:[%s5738_s3 + $0x114] ss:$8 sps:$4 sm:$0xff]   ;;  %v3690_v33 = vld [vmem:[%s5738_s3 + $0x10] ss:$8 sps:$4 sm:$0xff]   ;;  %v3692_v35 = vld [vmem:[%s5738_s3 + $0x4] ss:$8 sps:$4 sm:$0xff]  }
  0x16   : > { %420 = vperm.xlu0 %3645, %v300_v10   ;;  %672 = vperm.xlu1 %3647, %v300_v10   ;;  %v3691_v34 = vld [vmem:[%s5738_s3 + $0x110] ss:$8 sps:$4 sm:$0xff]   ;;  %v3694_v36 = vld [vmem:[%s5738_s3 + $0x104] ss:$8 sps:$4 sm:$0xff]   ;;  %v3696_v37 = vld [vmem:[%s5738_s3] ss:$8 sps:$4 sm:$0xff]  }
  0x17   : > { %2714 = vmatpush1.bf16.msra.mxu0 %v3666_v13  ;;  %2755 = vmatpush1.bf16.msra.mxu1 %v3667_v14  ;;  %v3697_v38 = vld [vmem:[%s5738_s3 + $0x100] ss:$8 sps:$4 sm:$0xff]   ;;  %v3698_v39 = vld [vmem:[%s5738_s3 + $0xf4] ss:$8 sps:$4 sm:$0xff]   ;;  %v3702_v41 = vld [vmem:[%s5738_s3 + $0xf0] ss:$8 sps:$4 sm:$0xff]  }
  0x18   : > { %2715 = vmatprep.subr.bf16.mxu0 %v3668_v15  ;;  %2756 = vmatprep.subr.bf16.mxu1 %v3670_v16  ;;  %v3700_v40 = vld [vmem:[%s5738_s3 + $0x1f4] ss:$8 sps:$4 sm:$0xff]   ;;  %v3703_v42 = vld [vmem:[%s5738_s3 + $0x1f0] ss:$8 sps:$4 sm:$0xff]   ;;  %v3704_v43 = vld [vmem:[%s5738_s3 + $0xe4] ss:$8 sps:$4 sm:$0xff]  }
  0x19   : > { %v3706_v44 = vld [vmem:[%s5738_s3 + $0x1e4] ss:$8 sps:$4 sm:$0xff]   ;;  %v3708_v45 = vld [vmem:[%s5738_s3 + $0xe0] ss:$8 sps:$4 sm:$0xff]   ;;  %v3710_v47 = vld [vmem:[%s5738_s3 + $0xd4] ss:$8 sps:$4 sm:$0xff]  }
  0x1a   : > { %3648 = vset.pattern.permute.xlu1 %v4067_v23  ;;  %3649 = vset.pattern.permute.xlu0 %v4068_v24  ;;  %v3709_v46 = vld [vmem:[%s5738_s3 + $0x1e0] ss:$8 sps:$4 sm:$0xff]   ;;  %v3712_v48 = vld [vmem:[%s5738_s3 + $0x1d4] ss:$8 sps:$4 sm:$0xff]   ;;  %v3714_v49 = vld [vmem:[%s5738_s3 + $0xd0] ss:$8 sps:$4 sm:$0xff]  }
  0x1b   : > { %798 = vperm.xlu1 %3648, %v300_v10   ;;  %924 = vperm.xlu0 %3649, %v300_v10   ;;  %v3715_v50 = vld [vmem:[%s5738_s3 + $0x1d0] ss:$8 sps:$4 sm:$0xff]   ;;  %v3716_v51 = vld [vmem:[%s5738_s3 + $0xc4] ss:$8 sps:$4 sm:$0xff]   ;;  %v3720_v53 = vld [vmem:[%s5738_s3 + $0xc0] ss:$8 sps:$4 sm:$0xff]  }
  0x1c   : > { %2716 = vmatpush1.bf16.msra.mxu0 %v3672_v19  ;;  %2757 = vmatpush1.bf16.msra.mxu1 %v3673_v20  ;;  %v3718_v52 = vld [vmem:[%s5738_s3 + $0x1c4] ss:$8 sps:$4 sm:$0xff]   ;;  %v3721_v54 = vld [vmem:[%s5738_s3 + $0x1c0] ss:$8 sps:$4 sm:$0xff]   ;;  %v3722_v55 = vld [vmem:[%s5738_s3 + $0xb4] ss:$8 sps:$4 sm:$0xff]  }
  0x1d   : > { %2717 = vmatprep.subr.bf16.mxu0 %v3674_v21  ;;  %2758 = vmatprep.subr.bf16.mxu1 %v3676_v22  ;;  %v3724_v56 = vld [vmem:[%s5738_s3 + $0x1b4] ss:$8 sps:$4 sm:$0xff]   ;;  %v3726_v57 = vld [vmem:[%s5738_s3 + $0xb0] ss:$8 sps:$4 sm:$0xff]   ;;  %v3728_v59 = vld [vmem:[%s5738_s3 + $0xa4] ss:$8 sps:$4 sm:$0xff]  }
  0x1e   : > { %v3727_v58 = vld [vmem:[%s5738_s3 + $0x1b0] ss:$8 sps:$4 sm:$0xff]   ;;  %v3730_v60 = vld [vmem:[%s5738_s3 + $0x1a4] ss:$8 sps:$4 sm:$0xff]   ;;  %v3732_v61 = vld [vmem:[%s5738_s3 + $0xa0] ss:$8 sps:$4 sm:$0xff]  }
  0x1f   : > { %v3733_v62 = vld [vmem:[%s5738_s3 + $0x1a0] ss:$8 sps:$4 sm:$0xff]   ;;  %v3734_v63 = vld [vmem:[%s5738_s3 + $0x94] ss:$8 sps:$4 sm:$0xff]   ;;  %v3738_v1 = vld [vmem:[%s5738_s3 + $0x90] ss:$8 sps:$4 sm:$0xff]  }
  0x20   : > { %2718 = vmatpush1.bf16.msra.mxu0 %v3678_v25  ;;  %2759 = vmatpush1.bf16.msra.mxu1 %v3679_v26  ;;  %v3736_v0 = vld [vmem:[%s5738_s3 + $0x194] ss:$8 sps:$4 sm:$0xff]   ;;  %v3739_v2 = vld [vmem:[%s5738_s3 + $0x190] ss:$8 sps:$4 sm:$0xff]   ;;  %v3740_v3 = vld [vmem:[%s5738_s3 + $0x84] ss:$8 sps:$4 sm:$0xff]  }
  0x21   : > { %2719 = vmatprep.subr.bf16.mxu0 %v3680_v27  ;;  %2760 = vmatprep.subr.bf16.mxu1 %v3682_v28  ;;  %v3742_v4 = vld [vmem:[%s5738_s3 + $0x184] ss:$8 sps:$4 sm:$0xff]   ;;  %v3744_v5 = vld [vmem:[%s5738_s3 + $0x80] ss:$8 sps:$4 sm:$0xff]   ;;  %v3748_v7 = vld [vmem:[%s5738_s3 + $0x274] ss:$8 sps:$4 sm:$0xff]  }
  0x22   : > { %v3745_v6 = vld [vmem:[%s5738_s3 + $0x180] ss:$8 sps:$4 sm:$0xff]   ;;  %v3751_v8 = vld [vmem:[%s5738_s3 + $0x374] ss:$8 sps:$4 sm:$0xff]   ;;  %v316_v10 = vshrl.u32 %v315_v9, 7 }
  0x23   : > { %v3310_v14 = vld [vmem:[%s5736_s1 + $0x40] ss:$8 sm:$0xf]  ;;  %v3314_v17 = vld [vmem:[%s5736_s1 + $0x41] ss:$8 sm:$0xf] }
  0x24   : > { %2720 = vmatpush1.bf16.msra.mxu0 %v3684_v29  ;;  %2761 = vmatpush1.bf16.msra.mxu1 %v3685_v30  ;;  %v4326_v11 = vsub.s32 2, %v316_v10  ;;  %v4328_v12 = vsub.s32 5, %v316_v10  ;;  %v4330_v13 = vsub.s32 7, %v316_v10  ;;  %v4338_v15 = vld [vmem:[%s5737_s2 + $0x8] sm:$0xff]  ;;  %v4480_v9 = vsub.s32 6, %v316_v10 }
  0x25   : > { %2721 = vmatprep.subr.bf16.mxu0 %v3686_v31  ;;  %2762 = vmatprep.subr.bf16.mxu1 %v3688_v32  ;;  %5754 = vst [vmem:[#allocation2_spill] sm:$0xff] %v4338_v15  ;;  %v3311_v16 = vld [vmem:[%s5736_s1 + $0x40] ss:$8 sm:$0xf0] }
  0x26   : > { %v3315_v18 = vld [vmem:[%s5736_s1 + $0x41] ss:$8 sm:$0xf0]  ;;  %v3318_v19 = vld [vmem:[%s5736_s1 + $0x42] ss:$8 sm:$0xf]  ;;  %v4362_v24 = vor.u32 %v3311_v16, %v3310_v14 }
  0x27   : > { %v3319_v22 = vld [vmem:[%s5736_s1 + $0x42] ss:$8 sm:$0xf0]  ;;  %v3322_v23 = vld [vmem:[%s5736_s1 + $0x43] ss:$8 sm:$0xf]  ;;  %v4370_v27 = vor.u32 %v3315_v18, %v3314_v17 }
  0x28   : > { %2722 = vmatpush1.bf16.msra.mxu0 %v3690_v33  ;;  %2763 = vmatpush1.bf16.msra.mxu1 %v3691_v34  ;;  %5755 = vst [vmem:[#allocation3_spill] sm:$0xff] %v4362_v24  ;;  %v3323_v25 = vld [vmem:[%s5736_s1 + $0x43] ss:$8 sm:$0xf0]  ;;  %v4378_v30 = vor.u32 %v3319_v22, %v3318_v19 }
  0x29   : > { %2723 = vmatprep.subr.bf16.mxu0 %v3692_v35  ;;  %2764 = vmatprep.subr.bf16.mxu1 %v3694_v36  ;;  %v3326_v26 = vld [vmem:[%s5736_s1 + $0x44] ss:$8 sm:$0xf]  ;;  %v3330_v29 = vld [vmem:[%s5736_s1 + $0x45] ss:$8 sm:$0xf]  ;;  %v4380_v31 = vor.u32 %v3323_v25, %v3322_v23 }
  0x2a   : > { %v3327_v28 = vld [vmem:[%s5736_s1 + $0x44] ss:$8 sm:$0xf0]  ;;  %5756 = vst [vmem:[#allocation4_spill] sm:$0xff] %v4378_v30  ;;  %v4389_v35 = vsub.s32 1, %v316_v10 }
  0x2b   : > { %v4382_v32 = vor.u32 %v3327_v28, %v3326_v26  ;;  %v3331_v33 = vld [vmem:[%s5736_s1 + $0x45] ss:$8 sm:$0xf0] }
  0x2c   : > { %2724 = vmatpush1.bf16.msra.mxu0 %v3696_v37  ;;  %2765 = vmatpush1.bf16.msra.mxu1 %v3697_v38  ;;  %v4387_v34 = vor.u32 %v3331_v33, %v3330_v29  ;;  %v301_v37 = vld [vmem:[%s5736_s1] ss:$8 sm:$0xf]  ;;  %v590_v17 = vrot.slane %v4378_v30, %v4389_v35 }
  0x2d   : > { %2725 = vmatprep.subr.bf16.mxu0 %v3698_v39  ;;  %2766 = vmatprep.subr.bf16.mxu1 %v3700_v40  ;;  %v302_v38 = vld [vmem:[%s5736_s1] ss:$8 sm:$0xf0]  ;;  %v4399_v39 = vsub.s32 3, %v316_v10 }
  0x2f   : > { %v362_v36 = vrot.slane %v4362_v24, %v4399_v39 }
  0x30   : > { %2726 = vmatpush2.bf16.msra.mxu0 %v3702_v41  ;;  %2767 = vmatpush2.bf16.msra.mxu1 %v3703_v42  ;;  %v3312_v41 = vld [vmem:[%s5736_s1 + $0x1] ss:$8 sm:$0xf] }
  0x31   : > { %2727 = vmatprep.subr.bf16.mxu0 %v3704_v43  ;;  %2768 = vmatprep.subr.bf16.mxu1 %v3706_v44  ;;  %v3313_v42 = vld [vmem:[%s5736_s1 + $0x1] ss:$8 sm:$0xf0] }
  0x34   : > { %2728 = vmatpush2.bf16.msra.mxu0 %v3708_v45  ;;  %2769 = vmatpush2.bf16.msra.mxu1 %v3709_v46 }
  0x35   : > { %2729 = vmatprep.subr.bf16.mxu0 %v3710_v47  ;;  %2770 = vmatprep.subr.bf16.mxu1 %v3712_v48  ;;  %v3316_v47 = vld [vmem:[%s5736_s1 + $0x2] ss:$8 sm:$0xf] }
  0x36   : > { %v3317_v48 = vld [vmem:[%s5736_s1 + $0x2] ss:$8 sm:$0xf0] }
  0x37   : > { %v4482_v14 = vor.u32 %v3317_v48, %v3316_v47 }
  0x38   : > { %2730 = vmatpush2.bf16.msra.mxu0 %v3714_v49  ;;  %2771 = vmatpush2.bf16.msra.mxu1 %v3715_v50  ;;  %v3320_v49 = vld [vmem:[%s5736_s1 + $0x3] ss:$8 sm:$0xf] }
  0x39   : > { %2731 = vmatprep.subr.bf16.mxu0 %v3716_v51  ;;  %2772 = vmatprep.subr.bf16.mxu1 %v3718_v52  ;;  %v3321_v50 = vld [vmem:[%s5736_s1 + $0x3] ss:$8 sm:$0xf0]  ;;  %v566_v48 = vrot.slane %v4482_v14, %v4399_v39  ;;  %v574_v52 = vrot.slane %v4482_v14, %v4328_v12  ;;  %v582_v29 = vrot.slane %v4482_v14, %v4330_v13 }
  0x3a   : > { %v4484_v16 = vor.u32 %v3321_v50, %v3320_v49  ;;  %v578_v45 = vrot.slane %v4482_v14, %v4480_v9 }
  0x3c   : > { %2732 = vmatpush2.bf16.msra.mxu0 %v3720_v53  ;;  %2773 = vmatpush2.bf16.msra.mxu1 %v3721_v54  ;;  %v684_v47 = vrot.slane %v4484_v16, %v4389_v35  ;;  %v700_v51 = vrot.slane %v4484_v16, %v4328_v12  ;;  %v708_v40 = vrot.slane %v4484_v16, %v4330_v13 }
  0x3d   : > { %2733 = vmatprep.subr.bf16.mxu0 %v3722_v55  ;;  %2774 = vmatprep.subr.bf16.mxu1 %v3724_v56  ;;  %v3324_v55 = vld [vmem:[%s5736_s1 + $0x4] ss:$8 sm:$0xf] }
  0x3e   : > { %v4443_v56 = vld [vmem:[%s5737_s2] sm:$0xff] }
  0x40   : > { %2734 = vmatpush2.bf16.msra.mxu0 %v3726_v57  ;;  %2775 = vmatpush2.bf16.msra.mxu1 %v3727_v58  ;;  %v354_v57 = vrot.slane %v4362_v24, %v4389_v35  ;;  %v598_v58 = vrot.slane %v4378_v30, %v4399_v39 }
  0x41   : > { %2735 = vmatprep.subr.bf16.mxu0 %v3728_v59  ;;  %2776 = vmatprep.subr.bf16.mxu1 %v3730_v60  ;;  %v562_v60 = vrot.slane %v4482_v14, %v4326_v11  ;;  %v688_v59 = vrot.slane %v4484_v16, %v4326_v11 }
  0x44   : > { %2736 = vmatpush2.bf16.msra.mxu0 %v3732_v61  ;;  %2777 = vmatpush2.bf16.msra.mxu1 %v3733_v62  ;;  %v3325_v61 = vld [vmem:[%s5736_s1 + $0x4] ss:$8 sm:$0xf0] }
  0x45   : > { %2737 = vmatprep.subr.bf16.mxu0 %v3734_v63  ;;  %2778 = vmatprep.subr.bf16.mxu1 %v3736_v0  ;;  %v4490_v19 = vor.u32 %v3325_v61, %v3324_v55  ;;  %v692_v55 = vrot.slane %v4484_v16, %v4399_v39 }
  0x48   : > { %2738 = vmatpush2.bf16.msra.mxu0 %v3738_v1  ;;  %2779 = vmatpush2.bf16.msra.mxu1 %v3739_v2  ;;  %v4464_v2 = vor.u32 %v302_v38, %v301_v37 }
  0x49   : > { %2739 = vmatprep.subr.bf16.mxu0 %v3740_v3  ;;  %2780 = vmatprep.subr.bf16.mxu1 %v3742_v4  ;;  %v3328_v3 = vld [vmem:[%s5736_s1 + $0x5] ss:$8 sm:$0xf]  ;;  %v4469_v4 = vsub.s32 0, %v316_v10 }
  0x4a   : > { %v322_v25 = vrot.slane %v4464_v2, %v4389_v35  ;;  %v330_v37 = vrot.slane %v4464_v2, %v4399_v39  ;;  %v326_v63 = vrot.slane %v4464_v2, %v4326_v11  ;;  %v338_v54 = vrot.slane %v4464_v2, %v4328_v12 }
  0x4b   : > { %v680_v20 = vrot.slane %v4484_v16, %v4469_v4  ;;  %v346_v44 = vrot.slane %v4464_v2, %v4330_v13  ;;  %v342_v28 = vrot.slane %v4464_v2, %v4480_v9 }
  0x4c   : > { %2740 = vmatpush2.bf16.msra.mxu0 %v3744_v5  ;;  %2781 = vmatpush2.bf16.msra.mxu1 %v3745_v6  ;;  %v4471_v5 = vor.u32 %v3313_v42, %v3312_v41  ;;  %v3329_v6 = vld [vmem:[%s5736_s1 + $0x5] ss:$8 sm:$0xf0]  ;;  %v318_v41 = vrot.slane %v4464_v2, %v4469_v4  ;;  %v558_v42 = vrot.slane %v4482_v14, %v4389_v35 }
  0x4d   : > { %2791 = vmatprep.subr.bf16.mxu0 %v3748_v7  ;;  %2832 = vmatprep.subr.bf16.mxu1 %v3751_v8  ;;  %v4478_v8 = vsub.s32 4, %v316_v10  ;;  %v4500_v26 = vor.u32 %v3329_v6, %v3328_v3  ;;  %v554_v3 = vrot.slane %v4482_v14, %v4469_v4 }
  0x4e   : > { %v432_v33 = vrot.slane %v4471_v5, %v4389_v35  ;;  %v440_v38 = vrot.slane %v4471_v5, %v4399_v39  ;;  %v428_v49 = vrot.slane %v4471_v5, %v4469_v4  ;;  %v436_v62 = vrot.slane %v4471_v5, %v4326_v11 }
  0x4f   : > { %v448_v53 = vrot.slane %v4471_v5, %v4328_v12  ;;  %v456_v43 = vrot.slane %v4471_v5, %v4330_v13  ;;  %v334_v10 = vrot.slane %v4464_v2, %v4478_v8  ;;  %v570_v22 = vrot.slane %v4482_v14, %v4478_v8 }
  0x8c   : > { %v4634_v61 = vpop.permute.xlu0 %310  ;;  %v4636_v6 = vpop.permute.xlu1 %546 }
  0x8d   : > { %5757 = vst [vmem:[#allocation5_spill] sm:$0xff] %v4634_v61  ;;  %5758 = vst [vmem:[#allocation6_spill] sm:$0xff] %v4636_v6  ;;  %v396_v1 = vmul.f32 %v322_v25, %v4634_v61  ;;  %v632_v0 = vmul.f32 %v558_v42, %v4636_v6  ;;  %v398_v18 = vmul.f32 %v330_v37, %v4634_v61 }
  0x8e   : > { %v634_v7 = vmul.f32 %v566_v48, %v4636_v6  ;;  %v395_v25 = vmul.f32 %v318_v41, %v4634_v61  ;;  %v631_v42 = vmul.f32 %v554_v3, %v4636_v6  ;;  %v397_v21 = vmul.f32 %v326_v63, %v4634_v61 }
  0x8f   : > { %v633_v46 = vmul.f32 %v562_v60, %v4636_v6  ;;  %v400_v37 = vmul.f32 %v338_v54, %v4634_v61  ;;  %v636_v50 = vmul.f32 %v574_v52, %v4636_v6  ;;  %v402_v48 = vmul.f32 %v346_v44, %v4634_v61 }
  0x90   : > { %v638_v23 = vmul.f32 %v582_v29, %v4636_v6  ;;  %v4677_v2 = vmul.f32 %v334_v10, %v4634_v61  ;;  %v4680_v41 = vmul.f32 %v570_v22, %v4636_v6  ;;  %v4683_v14 = vmul.f32 %v342_v28, %v4634_v61 }
  0x91   : > { %v4686_v63 = vmul.f32 %v578_v45, %v4636_v6  ;;  %v4688_v60 = vpop.permute.xlu0 %420  ;;  %v4690_v54 = vpop.permute.xlu1 %672  ;;  %v4693_v44 = vmul.f32 %v354_v57, %v4634_v61  ;;  %v4696_v52 = vmul.f32 %v590_v17, %v4636_v6  ;;  %v4699_v10 = vmul.f32 %v362_v36, %v4634_v61 }
  0x92   : > { %v4702_v22 = vmul.f32 %v598_v58, %v4636_v6  ;;  %v506_v45 = vmul.f32 %v432_v33, %v4688_v60  ;;  %v758_v57 = vmul.f32 %v684_v47, %v4690_v54  ;;  %v508_v17 = vmul.f32 %v440_v38, %v4688_v60 }
  0x93   : > { %v760_v36 = vmul.f32 %v692_v55, %v4690_v54  ;;  %v505_v58 = vmul.f32 %v428_v49, %v4688_v60  ;;  %v757_v28 = vmul.f32 %v680_v20, %v4690_v54  ;;  %v507_v29 = vmul.f32 %v436_v62, %v4688_v60 }
  0x94   : > { %5759 = vst [vmem:[#allocation7_spill] sm:$0xff] %v4702_v22  ;;  %v759_v33 = vmul.f32 %v688_v59, %v4690_v54  ;;  %v522_v38 = vadd.f32 %v506_v45, %v396_v1  ;;  %v524_v47 = vadd.f32 %v508_v17, %v398_v18  ;;  %v510_v49 = vmul.f32 %v448_v53, %v4688_v60 }
  0x95   : > { %v762_v20 = vmul.f32 %v700_v51, %v4690_v54  ;;  %v521_v55 = vadd.f32 %v505_v58, %v395_v25  ;;  %v523_v3 = vadd.f32 %v507_v29, %v397_v21  ;;  %v512_v62 = vmul.f32 %v456_v43, %v4688_v60 }
  0x96   : > { %v764_v59 = vmul.f32 %v708_v40, %v4690_v54  ;;  %v4752_v1 = vpop.permute.xlu1 %798  ;;  %v4754_v53 = vpop.permute.xlu0 %924  ;;  %v648_v18 = vadd.f32 %v632_v0, %v522_v38  ;;  %v650_v45 = vadd.f32 %v634_v7, %v524_v47  ;;  %v526_v17 = vadd.f32 %v510_v49, %v400_v37 }
  0x97   : > { %v5760_v21 = vrot.slane %v4471_v5, %v4478_v8  ;;  %v5761_v43 = vrot.slane %v4490_v19, %v4389_v35  ;;  %v5762_v40 = vrot.slane %v4500_v26, %v4389_v35  ;;  %v5763_v0 = vrot.slane %v4490_v19, %v4399_v39 }
  0x98   : > { %v5764_v37 = vrot.slane %v4500_v26, %v4399_v39  ;;  %v774_v38 = vadd.f32 %v758_v57, %v648_v18  ;;  %v776_v47 = vadd.f32 %v760_v36, %v650_v45  ;;  %v647_v49 = vadd.f32 %v631_v42, %v521_v55 }
  0x99   : > { %v509_v51 = vmul.f32 %v5760_v21, %v4688_v60  ;;  %v884_v25 = vmul.f32 %v5761_v43, %v4752_v1  ;;  %v1010_v58 = vmul.f32 %v5762_v40, %v4754_v53  ;;  %v886_v7 = vmul.f32 %v5763_v0, %v4752_v1 }
  0x9a   : > { %v1012_v29 = vmul.f32 %v5764_v37, %v4754_v53  ;;  %v5765_v21 = vrot.slane %v4490_v19, %v4469_v4  ;;  %v5766_v40 = vrot.slane %v4500_v26, %v4469_v4  ;;  %v649_v30 = vadd.f32 %v633_v46, %v523_v3 }
  0x9b   : > { %v5767_v0 = vrot.slane %v4490_v19, %v4326_v11  ;;  %v5768_v42 = vrot.slane %v4500_v26, %v4326_v11  ;;  %v900_v36 = vadd.f32 %v884_v25, %v774_v38  ;;  %v902_v55 = vadd.f32 %v886_v7, %v776_v47 }
  0x9c   : > { %v883_v43 = vmul.f32 %v5765_v21, %v4752_v1  ;;  %v1009_v15 = vmul.f32 %v5766_v40, %v4754_v53  ;;  %v773_v18 = vadd.f32 %v757_v28, %v647_v49  ;;  %v652_v45 = vadd.f32 %v636_v50, %v526_v17 }
  0x9d   : > { %v885_v6 = vmul.f32 %v5767_v0, %v4752_v1  ;;  %v1011_v57 = vmul.f32 %v5768_v42, %v4754_v53  ;;  %v775_v37 = vadd.f32 %v759_v33, %v649_v30  ;;  %v5769_v21 = vrot.slane %v4490_v19, %v4328_v12 }
  0x9e   : > { %v5770_v3 = vrot.slane %v4500_v26, %v4328_v12  ;;  %v528_v0 = vadd.f32 %v512_v62, %v402_v48  ;;  %v1026_v22 = vadd.f32 %v1010_v58, %v900_v36  ;;  %v1028_v24 = vadd.f32 %v1012_v29, %v902_v55 }
  0x9f   : > { %v888_v46 = vmul.f32 %v5769_v21, %v4752_v1  ;;  %v899_v61 = vadd.f32 %v883_v43, %v773_v18  ;;  %v778_v42 = vadd.f32 %v762_v20, %v652_v45  ;;  %v901_v25 = vadd.f32 %v885_v6, %v775_v37  ;;  %v3749_v21 = vld [vmem:[%s5738_s3 + $0x370] ss:$8 sps:$4 sm:$0xff]  }
  0xa0   : > { %v1014_v40 = vmul.f32 %v5770_v3, %v4754_v53  ;;  %v654_v7 = vadd.f32 %v638_v23, %v528_v0  ;;  %v5771_v30 = vrot.slane %v4490_v19, %v4330_v13  ;;  %v5772_v28 = vrot.slane %v4500_v26, %v4330_v13 }
  0xa1   : > { %v5773_v17 = vrot.slane %v4443_v56, %v4389_v35  ;;  %v5774_v62 = vrot.slane %v4443_v56, %v4399_v39  ;;  %v1025_v6 = vadd.f32 %v1009_v15, %v899_v61  ;;  %v904_v23 = vadd.f32 %v888_v46, %v778_v42  ;;  %v3746_v15 = vld [vmem:[%s5738_s3 + $0x270] ss:$8 sps:$4 sm:$0xff]  }
  0xa2   : > { %v890_v50 = vmul.f32 %v5771_v30, %v4752_v1  ;;  %v1016_v33 = vmul.f32 %v5772_v28, %v4754_v53  ;;  %v1027_v58 = vadd.f32 %v1011_v57, %v901_v25  ;;  %v780_v29 = vadd.f32 %v764_v59, %v654_v7  ;;  %v3757_v25 = vld [vmem:[%s5738_s3 + $0x364] ss:$8 sps:$4 sm:$0xff]  }
  0xa3   : > { %v1126_v48 = vadd.f32 %v5773_v17, %v1026_v22  ;;  %v1128_v20 = vadd.f32 %v5774_v62, %v1028_v24  ;;  %v525_v38 = vadd.f32 %v509_v51, %v4677_v2  ;;  %v5775_v47 = vrot.slane %v4484_v16, %v4478_v8 }
  0xa4   : > { %v5776_v22 = vrot.slane %v4443_v56, %v4469_v4  ;;  %v1030_v18 = vadd.f32 %v1014_v40, %v904_v23  ;;  %v5777_v24 = vrot.slane %v4443_v56, %v4326_v11  ;;  %v906_v2 = vadd.f32 %v890_v50, %v780_v29 }
  0xa5   : > { %v761_v49 = vmul.f32 %v5775_v47, %v4690_v54  ;;  %v1142_v43 = vmax.f32 %v1126_v48, 0.0  ;;  %v1144_v36 = vmax.f32 %v1128_v20, 0.0  ;;  %v651_v59 = vadd.f32 %v4680_v41, %v525_v38  ;;  %v3754_v41 = vld [vmem:[%s5738_s3 + $0x264] ss:$8 sps:$4 sm:$0xff]  }
  0xa6   : > { %v1125_v55 = vadd.f32 %v5776_v22, %v1025_v6  ;;  %v1127_v61 = vadd.f32 %v5777_v24, %v1027_v58  ;;  %v5778_v51 = vrot.slane %v4490_v19, %v4478_v8  ;;  %v5779_v3 = vrot.slane %v4443_v56, %v4328_v12 }
  0xa7   : > { %v1158_v45 = vpack.c.bf16 %v1142_v43, %v1142_v43  ;;  %v1160_v37 = vpack.c.bf16 %v1144_v36, %v1144_v36  ;;  %v1032_v42 = vadd.f32 %v1016_v33, %v906_v2  ;;  %v777_v7 = vadd.f32 %v761_v49, %v651_v59  ;;  %v3760_v2 = vld [vmem:[%s5738_s3 + $0x254] ss:$8 sps:$4 sm:$0xff]  }
  0xa8   : > { %v887_v57 = vmul.f32 %v5778_v51, %v4752_v1  ;;  %v1141_v46 = vmax.f32 %v1125_v55, 0.0  ;;  %v1130_v40 = vadd.f32 %v5779_v3, %v1030_v18  ;;  %v1143_v0 = vmax.f32 %v1127_v61, 0.0 }
  0xa9   : > { %v5780_v30 = vrot.slane %v4500_v26, %v4478_v8  ;;  %2741 = vmatprep.mubr.bf16.mxu0 %v1158_v45  ;;  %2782 = vmatprep.mubr.bf16.mxu1 %v1160_v37  ;;  %v5781_v33 = vrot.slane %v4471_v5, %v4480_v9  ;;  %v5782_v62 = vrot.slane %v4484_v16, %v4480_v9 }
  0xaa   : > { %v1157_v28 = vpack.c.bf16 %v1141_v46, %v1141_v46  ;;  %v1146_v17 = vmax.f32 %v1130_v40, 0.0  ;;  %v1159_v6 = vpack.c.bf16 %v1143_v0, %v1143_v0  ;;  %v5783_v23 = vrot.slane %v4443_v56, %v4330_v13  ;;  %v3758_v40 = vld [vmem:[%s5738_s3 + $0x250] ss:$8 sps:$4 sm:$0xff]  }
  0xab   : > { %v1013_v50 = vmul.f32 %v5780_v30, %v4754_v53  ;;  %v511_v48 = vmul.f32 %v5781_v33, %v4688_v60  ;;  %v763_v20 = vmul.f32 %v5782_v62, %v4690_v54  ;;  %v903_v29 = vadd.f32 %v887_v57, %v777_v7  ;;  %v5796_v33 = vld [vmem:[#allocation3_spill] sm:$0xff] }
  0xac   : > { %v1132_v58 = vadd.f32 %v5783_v23, %v1032_v42  ;;  %v5784_v38 = vrot.slane %v4490_v19, %v4480_v9  ;;  %2742 = vmatmul.mubr.bf16.vlgmr.msra.gmra.mxu0 %v1157_v28  ;;  %v1162_v49 = vpack.c.bf16 %v1146_v17, %v1146_v17  ;;  %v5785_v16 = vrot.slane %v4500_v26, %v4480_v9  ;;  %v3752_v19 = vld [vmem:[%s5738_s3 + $0x260] ss:$8 sps:$4 sm:$0xff]  }
  0xad   : > { %v527_v5 = vadd.f32 %v511_v48, %v4683_v14  ;;  %v5786_v36 = vrot.slane %v4370_v27, %v4389_v35  ;;  %2783 = vmatmul.mubr.bf16.vlgmr.msra.gmra.mxu1 %v1159_v6  ;;  %2792 = vmatpush1.bf16.msra.mxu0 %v3746_v15  ;;  %v1029_v18 = vadd.f32 %v1013_v50, %v903_v29  ;;  %v3755_v15 = vld [vmem:[%s5738_s3 + $0x360] ss:$8 sps:$4 sm:$0xff]  }
  0xae   : > { %v889_v47 = vmul.f32 %v5784_v38, %v4752_v1  ;;  %v1015_v43 = vmul.f32 %v5785_v16, %v4754_v53  ;;  %v1148_v55 = vmax.f32 %v1132_v58, 0.0  ;;  %v5787_v14 = vrot.slane %v4380_v31, %v4389_v35  ;;  %2833 = vmatpush1.bf16.msra.mxu1 %v3749_v21  ;;  %2823 = vmatprep.mubr.bf16.mxu0 %v1162_v49  ;;  %v3763_v21 = vld [vmem:[%s5738_s3 + $0x354] ss:$8 sps:$4 sm:$0xff]   ;;  %v3764_v38 = vld [vmem:[%s5738_s3 + $0x240] ss:$8 sps:$4 sm:$0xff]  }
  0xaf   : > { %v514_v22 = vmul.f32 %v5786_v36, %v4688_v60  ;;  %v5788_v26 = vrot.slane %v4382_v32, %v4389_v35  ;;  %v653_v59 = vadd.f32 %v4686_v63, %v527_v5  ;;  %v5789_v57 = vrot.slane %v4387_v34, %v4389_v35  ;;  %2793 = vmatprep.subr.bf16.mxu0 %v3754_v41  ;;  %v3769_v49 = vld [vmem:[%s5738_s3 + $0x344] ss:$8 sps:$4 sm:$0xff]  }
  0xb0   : > { %v766_v24 = vmul.f32 %v5787_v14, %v4690_v54  ;;  %v1164_v37 = vpack.c.bf16 %v1148_v55, %v1148_v55  ;;  %2834 = vmatprep.subr.bf16.mxu1 %v3757_v25  ;;  %v5790_v46 = vrot.slane %v4443_v56, %v4478_v8  ;;  %v5791_v63 = vrot.slane %v4370_v27, %v4399_v39  ;;  %v5799_v5 = vld [vmem:[#allocation7_spill] sm:$0xff]  ;;  %v5800_v36 = vld [vmem:[#allocation6_spill] sm:$0xff] }
  0xb1   : > { %v892_v61 = vmul.f32 %v5788_v26, %v4752_v1  ;;  %v530_v51 = vadd.f32 %v514_v22, %v4693_v44  ;;  %v1018_v45 = vmul.f32 %v5789_v57, %v4754_v53  ;;  %v779_v0 = vadd.f32 %v763_v20, %v653_v59  ;;  %2794 = vmatpush1.bf16.msra.mxu0 %v3752_v19  ;;  %v3761_v20 = vld [vmem:[%s5738_s3 + $0x350] ss:$8 sps:$4 sm:$0xff]  }
  0xb2   : > { %v4902_v3 = vadd.f32 %v5790_v46, %v1029_v18  ;;  %v516_v44 = vmul.f32 %v5791_v63, %v4688_v60  ;;  %v5792_v41 = vrot.slane %v4380_v31, %v4399_v39  ;;  %v5793_v7 = vrot.slane %v4382_v32, %v4399_v39  ;;  %2864 = vmatprep.mubr.bf16.mxu1 %v1164_v37  ;;  %v5801_v22 = vld [vmem:[#allocation4_spill] sm:$0xff]  ;;  %v3767_v46 = vld [vmem:[%s5738_s3 + $0x340] ss:$8 sps:$4 sm:$0xff]  }
  0xb3   : > { %v656_v42 = vadd.f32 %v4696_v52, %v530_v51  ;;  %v5794_v28 = vrot.slane %v4387_v34, %v4399_v39  ;;  %v5795_v52 = vld [vmem:[#allocation5_spill] sm:$0xff]  ;;  %v5797_v48 = vrot.slane %v5796_v33, %v4469_v4  ;;  %2835 = vmatpush1.bf16.msra.mxu1 %v3755_v15  ;;  %2795 = vmatprep.subr.bf16.mxu0 %v3760_v2 }
  0xb4   : > { %v768_v25 = vmul.f32 %v5792_v41, %v4690_v54  ;;  %v894_v30 = vmul.f32 %v5793_v7, %v4752_v1  ;;  %v532_v50 = vadd.f32 %v516_v44, %v4699_v10  ;;  %v3766_v10 = vld [vmem:[%s5738_s3 + $0x244] ss:$8 sps:$4 sm:$0xff]   ;;  %v905_v6 = vadd.f32 %v889_v47, %v779_v0  ;;  %2836 = vmatprep.subr.bf16.mxu1 %v3763_v21  ;;  %v3772_v63 = vld [vmem:[%s5738_s3 + $0x234] ss:$8 sps:$4 sm:$0xff]   ;;  %v3770_v41 = vld [vmem:[%s5738_s3 + $0x230] ss:$8 sps:$4 sm:$0xff]  }
  0xb5   : > { %v1020_v17 = vmul.f32 %v5794_v28, %v4754_v53  ;;  %v403_v62 = vmul.f32 %v5797_v48, %v5795_v52  ;;  %v782_v23 = vadd.f32 %v766_v24, %v656_v42  ;;  %v5798_v58 = vrot.slane %v4370_v27, %v4469_v4  ;;  %2796 = vmatpush1.bf16.msra.mxu0 %v3758_v40 }
  0xb6   : > { %v658_v16 = vadd.f32 %v5799_v5, %v532_v50  ;;  %v5802_v47 = vrot.slane %v5801_v22, %v4469_v4  ;;  %v476_v19 = vrot.slane %v4370_v27, %v4478_v8  ;;  %v602_v18 = vrot.slane %v5801_v22, %v4478_v8  ;;  %2797 = vmatprep.subr.bf16.mxu0 %v3766_v10 }
  0xb7   : > { %v513_v29 = vmul.f32 %v5798_v58, %v4688_v60  ;;  %v1031_v14 = vadd.f32 %v1015_v43, %v905_v6  ;;  %v908_v24 = vadd.f32 %v892_v61, %v782_v23  ;;  %v5803_v15 = vrot.slane %v4380_v31, %v4469_v4  ;;  %2837 = vmatpush1.bf16.msra.mxu1 %v3761_v20 }
  0xb8   : > { %v639_v55 = vmul.f32 %v5802_v47, %v5800_v36  ;;  %v784_v59 = vadd.f32 %v768_v25, %v658_v16  ;;  %v5804_v51 = vrot.slane %v4382_v32, %v4469_v4  ;;  %v5805_v37 = vrot.slane %v5796_v33, %v4326_v11  ;;  %2838 = vmatprep.subr.bf16.mxu1 %v3769_v49  ;;  %v3775_v25 = vld [vmem:[%s5738_s3 + $0x334] ss:$8 sps:$4 sm:$0xff]  }
  0xb9   : > { %v529_v26 = vadd.f32 %v513_v29, %v403_v62  ;;  %v765_v2 = vmul.f32 %v5803_v15, %v4690_v54  ;;  %v5806_v43 = vrot.slane %v4370_v27, %v4326_v11  ;;  %v5807_v44 = vrot.slane %v4443_v56, %v4480_v9  ;;  %2798 = vmatpush1.bf16.msra.mxu0 %v3764_v38  ;;  %v3781_v15 = vld [vmem:[%s5738_s3 + $0x324] ss:$8 sps:$4 sm:$0xff]  }
  0xba   : > { %v891_v57 = vmul.f32 %v5804_v51, %v4752_v1  ;;  %v405_v21 = vmul.f32 %v5805_v37, %v5795_v52  ;;  %v4981_v0 = vadd.f32 %v1018_v45, %v908_v24  ;;  %v910_v7 = vadd.f32 %v894_v30, %v784_v59  ;;  %2799 = vmatprep.subr.bf16.mxu0 %v3772_v63 }
  0xbb   : > { %v515_v61 = vmul.f32 %v5806_v43, %v4688_v60  ;;  %v4979_v40 = vadd.f32 %v5807_v44, %v1031_v14  ;;  %v655_v42 = vadd.f32 %v639_v55, %v529_v26  ;;  %v5808_v56 = vrot.slane %v5801_v22, %v4326_v11  ;;  %2839 = vmatpush1.bf16.msra.mxu1 %v3767_v46  ;;  %v3773_v55 = vld [vmem:[%s5738_s3 + $0x330] ss:$8 sps:$4 sm:$0xff]  }
  0xbc   : > { %v5809_v45 = vrot.slane %v4380_v31, %v4326_v11  ;;  %v5810_v20 = vrot.slane %v4387_v34, %v4469_v4  ;;  %v5811_v30 = vrot.slane %v4382_v32, %v4326_v11  ;;  %v728_v23 = vrot.slane %v4380_v31, %v4478_v8  ;;  %2840 = vmatprep.subr.bf16.mxu1 %v3775_v25  ;;  %v3776_v25 = vld [vmem:[%s5738_s3 + $0x220] ss:$8 sps:$4 sm:$0xff]  }
  0xbd   : > { %v531_v50 = vadd.f32 %v515_v61, %v405_v21  ;;  %v641_v28 = vmul.f32 %v5808_v56, %v5800_v36  ;;  %v781_v62 = vadd.f32 %v765_v2, %v655_v42  ;;  %v1036_v58 = vadd.f32 %v1020_v17, %v910_v7  ;;  %v3778_v17 = vld [vmem:[%s5738_s3 + $0x224] ss:$8 sps:$4 sm:$0xff]   ;;  %2800 = vmatpush1.bf16.msra.mxu0 %v3770_v41  ;;  %v3779_v41 = vld [vmem:[%s5738_s3 + $0x320] ss:$8 sps:$4 sm:$0xff]  }
  0xbe   : > { %v767_v48 = vmul.f32 %v5809_v45, %v4690_v54  ;;  %v1017_v10 = vmul.f32 %v5810_v20, %v4754_v53  ;;  %v893_v6 = vmul.f32 %v5811_v30, %v4752_v1  ;;  %v5812_v49 = vrot.slane %v4387_v34, %v4326_v11  ;;  %v5815_v2 = vld [vmem:[#allocation2_spill] sm:$0xff]  ;;  %2801 = vmatprep.subr.bf16.mxu0 %v3778_v17 }
  0xbf   : > { %v657_v29 = vadd.f32 %v641_v28, %v531_v50  ;;  %v5813_v16 = vrot.slane %v5796_v33, %v4328_v12  ;;  %v907_v38 = vadd.f32 %v891_v57, %v781_v62  ;;  %v5814_v14 = vrot.slane %v4370_v27, %v4328_v12  ;;  %2841 = vmatpush1.bf16.msra.mxu1 %v3773_v55  ;;  %v3784_v62 = vld [vmem:[%s5738_s3 + $0x214] ss:$8 sps:$4 sm:$0xff]  }
  0xc0   : > { %v1019_v5 = vmul.f32 %v5812_v49, %v4754_v53  ;;  %v854_v26 = vrot.slane %v4382_v32, %v4478_v8  ;;  %v5816_v59 = vrot.slane %v5815_v2, %v4399_v39  ;;  %v5817_v57 = vrot.slane %v5801_v22, %v4328_v12  ;;  %2842 = vmatprep.subr.bf16.mxu1 %v3781_v15 }
  0xc1   : > { %v408_v47 = vmul.f32 %v5813_v16, %v5795_v52  ;;  %v518_v24 = vmul.f32 %v5814_v14, %v4688_v60  ;;  %v783_v37 = vadd.f32 %v767_v48, %v657_v29  ;;  %v5818_v43 = vrot.slane %v4380_v31, %v4328_v12  ;;  %2802 = vmatpush1.bf16.msra.mxu0 %v3776_v25  ;;  %v3790_v25 = vld [vmem:[%s5738_s3 + $0x204] ss:$8 sps:$4 sm:$0xff]  }
  0xc2   : > { %v5033_v51 = vadd.f32 %v5816_v59, %v1036_v58  ;;  %v644_v21 = vmul.f32 %v5817_v57, %v5800_v36  ;;  %v5043_v46 = vadd.f32 %v1017_v10, %v907_v38  ;;  %v5819_v39 = vrot.slane %v4382_v32, %v4328_v12  ;;  %v3787_v58 = vld [vmem:[%s5738_s3 + $0x314] ss:$8 sps:$4 sm:$0xff]   ;;  %v3782_v38 = vld [vmem:[%s5738_s3 + $0x210] ss:$8 sps:$4 sm:$0xff]   ;;  %2803 = vmatprep.subr.bf16.mxu0 %v3784_v62 }
  0xc3   : > { %v770_v61 = vmul.f32 %v5818_v43, %v4690_v54  ;;  %v534_v63 = vadd.f32 %v518_v24, %v408_v47  ;;  %v980_v42 = vrot.slane %v4387_v34, %v4478_v8  ;;  %v909_v7 = vadd.f32 %v893_v6, %v783_v37  ;;  %2843 = vmatpush1.bf16.msra.mxu1 %v3779_v41 }
  0xc4   : > { %v896_v44 = vmul.f32 %v5819_v39, %v4752_v1  ;;  %v5820_v50 = vrot.slane %v4387_v34, %v4328_v12  ;;  %v5821_v28 = vrot.slane %v5796_v33, %v4330_v13  ;;  %v374_v48 = vrot.slane %v5796_v33, %v4480_v9  ;;  %2844 = vmatprep.subr.bf16.mxu1 %v3787_v58 }
  0xc5   : > { %v660_v20 = vadd.f32 %v644_v21, %v534_v63  ;;  %v5822_v10 = vrot.slane %v4370_v27, %v4330_v13  ;;  %v484_v6 = vrot.slane %v4370_v27, %v4480_v9  ;;  %v1035_v29 = vadd.f32 %v1019_v5, %v909_v7  ;;  %v3788_v27 = vld [vmem:[%s5738_s3 + $0x200] ss:$8 sps:$4 sm:$0xff]   ;;  %2804 = vmatpush1.bf16.msra.mxu0 %v3782_v38 }
  0xc6   : > { %v1022_v56 = vmul.f32 %v5820_v50, %v4754_v53  ;;  %v410_v45 = vmul.f32 %v5821_v28, %v5795_v52  ;;  %v5823_v49 = vrot.slane %v5801_v22, %v4330_v13  ;;  %v5824_v47 = vrot.slane %v4380_v31, %v4330_v13  ;;  %2805 = vmatprep.subr.bf16.mxu0 %v3790_v25  ;;  %v3815_v25 = vld [vmem:[%s5738_s3 + $0x3c0] ss:$8 sps:$4 sm:$0xff]  }
  0xc7   : > { %v520_v30 = vmul.f32 %v5822_v10, %v4688_v60  ;;  %v610_v17 = vrot.slane %v5801_v22, %v4480_v9  ;;  %v786_v14 = vadd.f32 %v770_v61, %v660_v20  ;;  %v5825_v5 = vrot.slane %v4382_v32, %v4330_v13 }
  0xc8   : > { %v646_v16 = vmul.f32 %v5823_v49, %v5800_v36  ;;  %v772_v55 = vmul.f32 %v5824_v47, %v4690_v54  ;;  %v736_v59 = vrot.slane %v4380_v31, %v4480_v9  ;;  %v5826_v37 = vrot.slane %v5815_v2, %v4326_v11  ;;  %v3785_v11 = vld [vmem:[%s5738_s3 + $0x310] ss:$8 sps:$4 sm:$0xff]   ;;  %v3791_v31 = vld [vmem:[%s5738_s3 + $0x300] ss:$8 sps:$4 sm:$0xff]  }
  0xc9   : > { %v536_v24 = vadd.f32 %v520_v30, %v410_v45  ;;  %v898_v15 = vmul.f32 %v5825_v5, %v4752_v1  ;;  %v5827_v21 = vrot.slane %v4387_v34, %v4330_v13  ;;  %v5828_v61 = vrot.slane %v5796_v33, %v4478_v8  ;;  %2845 = vmatpush1.bf16.msra.mxu1 %v3785_v11  ;;  %v3812_v11 = vld [vmem:[%s5738_s3 + $0x2c0] ss:$8 sps:$4 sm:$0xff]  }
  0xca   : > { %v5101_v57 = vadd.f32 %v5826_v37, %v1035_v29  ;;  %v517_v39 = vmul.f32 %v476_v19, %v4688_v60  ;;  %v912_v7 = vadd.f32 %v896_v44, %v786_v14  ;;  %v862_v33 = vrot.slane %v4382_v32, %v4480_v9  ;;  %v3793_v19 = vld [vmem:[%s5738_s3 + $0x304] ss:$8 sps:$4 sm:$0xff]   ;;  %2806 = vmatpush1.bf16.msra.mxu0 %v3788_v27  ;;  %v3811_v37 = vld [vmem:[%s5738_s3 + $0x3d4] ss:$8 sps:$4 sm:$0xff]   ;;  %v3821_v27 = vld [vmem:[%s5738_s3 + $0x3b0] ss:$8 sps:$4 sm:$0xff]  }
  0xcb   : > { %v1024_v43 = vmul.f32 %v5827_v21, %v4754_v53  ;;  %v407_v63 = vmul.f32 %v5828_v61, %v5795_v52  ;;  %v662_v50 = vadd.f32 %v646_v16, %v536_v24  ;;  %v643_v45 = vmul.f32 %v602_v18, %v5800_v36  ;;  %2846 = vmatprep.subr.bf16.mxu1 %v3793_v19  ;;  %v5167_v16 = vld [vmem:[%s5737_s2 + $0x8] sm:$0xff]  ;;  %v3809_v61 = vld [vmem:[%s5738_s3 + $0x3d0] ss:$8 sps:$4 sm:$0xff]  }
  0xcc   : > { %v769_v32 = vmul.f32 %v728_v23, %v4690_v54  ;;  %v988_v44 = vrot.slane %v4387_v34, %v4480_v9  ;;  %v1038_v41 = vadd.f32 %v1022_v56, %v912_v7  ;;  %v895_v20 = vmul.f32 %v854_v26, %v4752_v1  ;;  %v3796_v34 = vld [vmem:[%s5738_s3 + $0x2f4] ss:$8 sps:$4 sm:$0xff]   ;;  %v3800_v24 = vld [vmem:[%s5738_s3 + $0x2e0] ss:$8 sps:$4 sm:$0xff]   ;;  %v3826_v19 = vld [vmem:[%s5738_s3 + $0x2a4] ss:$8 sps:$4 sm:$0xff]  }
  0xcd   : > { %v533_v28 = vadd.f32 %v517_v39, %v407_v63  ;;  %v788_v62 = vadd.f32 %v772_v55, %v662_v50  ;;  %v1021_v10 = vmul.f32 %v980_v42, %v4754_v53  ;;  %v409_v58 = vmul.f32 %v374_v48, %v5795_v52  ;;  %2847 = vmatpush1.bf16.msra.mxu1 %v3791_v31  ;;  %v3814_v63 = vld [vmem:[%s5738_s3 + $0x2c4] ss:$8 sps:$4 sm:$0xff]   ;;  %v3820_v7 = vld [vmem:[%s5738_s3 + $0x2b4] ss:$8 sps:$4 sm:$0xff]   ;;  %v3836_v31 = vld [vmem:[%s5738_s3 + $0x280] ss:$8 sps:$4 sm:$0xff]  }
  0xce   : > { %v519_v22 = vmul.f32 %v484_v6, %v4688_v60  ;;  %v5829_v18 = vrot.slane %v5815_v2, %v4328_v12  ;;  %v645_v52 = vmul.f32 %v610_v17, %v5800_v36  ;;  %v3799_v60 = vld [vmem:[%s5738_s3 + $0x3f4] ss:$8 sps:$4 sm:$0xff]   ;;  %v771_v48 = vmul.f32 %v736_v59, %v4690_v54  ;;  %v3794_v12 = vld [vmem:[%s5738_s3 + $0x2f0] ss:$8 sps:$4 sm:$0xff]   ;;  %2807 = vmatprep.subr.bf16.mxu0 %v3796_v34  ;;  %v3817_v39 = vld [vmem:[%s5738_s3 + $0x3c4] ss:$8 sps:$4 sm:$0xff]  }
  0xcf   : > { %v659_v30 = vadd.f32 %v643_v45, %v533_v28  ;;  %v914_v26 = vadd.f32 %v898_v15, %v788_v62  ;;  %v897_v6 = vmul.f32 %v862_v33, %v4752_v1  ;;  %v1023_v49 = vmul.f32 %v988_v44, %v4754_v53  ;;  %v3797_v1 = vld [vmem:[%s5738_s3 + $0x3f0] ss:$8 sps:$4 sm:$0xff]   ;;  %v3802_v53 = vld [vmem:[%s5738_s3 + $0x2e4] ss:$8 sps:$4 sm:$0xff]   ;;  %2848 = vmatprep.subr.bf16.mxu1 %v3799_v60  ;;  %v3808_v59 = vld [vmem:[%s5738_s3 + $0x2d4] ss:$8 sps:$4 sm:$0xff]  }
  0xd0   : > { %v5152_v23 = vadd.f32 %v5829_v18, %v1038_v41  ;;  %v535_v56 = vadd.f32 %v519_v22, %v409_v58  ;;  %v1096_v47 = vrot.slane %v5167_v16, %v4478_v8  ;;  %v5830_v55 = vrot.slane %v5815_v2, %v4330_v13  ;;  %v3805_v8 = vld [vmem:[%s5738_s3 + $0x3e4] ss:$8 sps:$4 sm:$0xff]   ;;  %2808 = vmatpush2.bf16.msra.mxu0 %v3794_v12  ;;  %v3803_v2 = vld [vmem:[%s5738_s3 + $0x3e0] ss:$8 sps:$4 sm:$0xff]   ;;  %v3823_v50 = vld [vmem:[%s5738_s3 + $0x3b4] ss:$8 sps:$4 sm:$0xff]  }
  0xd1   : > { %v785_v42 = vadd.f32 %v769_v32, %v659_v30  ;;  %v1040_v29 = vadd.f32 %v1024_v43, %v914_v26  ;;  %v1104_v13 = vrot.slane %v5167_v16, %v4480_v9  ;;  %2849 = vmatpush2.bf16.msra.mxu1 %v3797_v1  ;;  %2809 = vmatprep.subr.bf16.mxu0 %v3802_v53  ;;  %v3806_v9 = vld [vmem:[%s5738_s3 + $0x2d0] ss:$8 sps:$4 sm:$0xff]   ;;  %v3829_v28 = vld [vmem:[%s5738_s3 + $0x3a4] ss:$8 sps:$4 sm:$0xff]   ;;  %v3824_v45 = vld [vmem:[%s5738_s3 + $0x2a0] ss:$8 sps:$4 sm:$0xff]  }
  0xd2   : > { %v661_v54 = vadd.f32 %v645_v52, %v535_v56  ;;  %2850 = vmatprep.subr.bf16.mxu1 %v3805_v8  ;;  %v3818_v33 = vld [vmem:[%s5738_s3 + $0x2b0] ss:$8 sps:$4 sm:$0xff]   ;;  %v3827_v32 = vld [vmem:[%s5738_s3 + $0x3a0] ss:$8 sps:$4 sm:$0xff]   ;;  %v3832_v44 = vld [vmem:[%s5738_s3 + $0x294] ss:$8 sps:$4 sm:$0xff]   ;;  %v1084_v62 = vrot.slane %v5167_v16, %v4389_v35 }
  0xd3   : > { %v911_v36 = vadd.f32 %v895_v20, %v785_v42  ;;  %v5180_v17 = vadd.f32 %v5830_v55, %v1040_v29  ;;  %v3835_v41 = vld [vmem:[%s5738_s3 + $0x394] ss:$8 sps:$4 sm:$0xff]   ;;  %v3830_v20 = vld [vmem:[%s5738_s3 + $0x290] ss:$8 sps:$4 sm:$0xff]   ;;  %v3838_v30 = vld [vmem:[%s5738_s3 + $0x284] ss:$8 sps:$4 sm:$0xff]  }
  0xd4   : > { %v787_v14 = vadd.f32 %v771_v48, %v661_v54  ;;  %2810 = vmatpush2.bf16.msra.mxu0 %v3800_v24  ;;  %v3841_v58 = vld [vmem:[%s5738_s3 + $0x384] ss:$8 sps:$4 sm:$0xff]   ;;  %v1134_v22 = vadd.f32 %v1084_v62, %v4981_v0  ;;  %v3839_v34 = vld [vmem:[%s5738_s3 + $0x380] ss:$8 sps:$4 sm:$0xff]   ;;  %v1145_v18 = vmax.f32 %v4902_v3, 0.0  ;;  %v1147_v0 = vmax.f32 %v4979_v40, 0.0 }
  0xd5   : > { %v1037_v38 = vadd.f32 %v1021_v10, %v911_v36  ;;  %2851 = vmatpush2.bf16.msra.mxu1 %v3803_v2  ;;  %2811 = vmatprep.subr.bf16.mxu0 %v3808_v59  ;;  %v3833_v10 = vld [vmem:[%s5738_s3 + $0x390] ss:$8 sps:$4 sm:$0xff]   ;;  %v3844_v26 = vld [vmem:[%s5738_s3 + $0x474] ss:$8 sps:$4 sm:$0xff]   ;;  %v1152_v56 = vmax.f32 %v5033_v51, 0.0 }
  0xd6   : > { %v913_v15 = vadd.f32 %v897_v6, %v787_v14  ;;  %2852 = vmatprep.subr.bf16.mxu1 %v3811_v37  ;;  %v3847_v52 = vld [vmem:[%s5738_s3 + $0x574] ss:$8 sps:$4 sm:$0xff]   ;;  %v1150_v60 = vmax.f32 %v1134_v22, 0.0  ;;  %v3842_v42 = vld [vmem:[%s5738_s3 + $0x470] ss:$8 sps:$4 sm:$0xff]   ;;  %v1161_v3 = vpack.c.bf16 %v1145_v18, %v1145_v18  ;;  %v1163_v40 = vpack.c.bf16 %v1147_v0, %v1147_v0 }
  0xd7   : > { %v5188_v5 = vadd.f32 %v1096_v47, %v1037_v38  ;;  %v3845_v48 = vld [vmem:[%s5738_s3 + $0x570] ss:$8 sps:$4 sm:$0xff]   ;;  %v3850_v6 = vld [vmem:[%s5738_s3 + $0x464] ss:$8 sps:$4 sm:$0xff]   ;;  %v1168_v51 = vpack.c.bf16 %v1152_v56, %v1152_v56  ;;  %v3851_v36 = vld [vmem:[%s5738_s3 + $0x560] ss:$8 sps:$4 sm:$0xff]  }
  0xd8   : > { %v1039_v21 = vadd.f32 %v1023_v49, %v913_v15  ;;  %2812 = vmatpush2.bf16.msra.mxu0 %v3806_v9  ;;  %v1166_v12 = vpack.c.bf16 %v1150_v60, %v1150_v60  ;;  %v3853_v29 = vld [vmem:[%s5738_s3 + $0x564] ss:$8 sps:$4 sm:$0xff]   ;;  %v3848_v49 = vld [vmem:[%s5738_s3 + $0x460] ss:$8 sps:$4 sm:$0xff]   ;;  %v3856_v47 = vld [vmem:[%s5738_s3 + $0x454] ss:$8 sps:$4 sm:$0xff]  }
  0xd9   : > { %2853 = vmatpush2.bf16.msra.mxu1 %v3809_v61  ;;  %2813 = vmatprep.subr.bf16.mxu0 %v3814_v63  ;;  %v3859_v54 = vld [vmem:[%s5738_s3 + $0x554] ss:$8 sps:$4 sm:$0xff]   ;;  %v3854_v1 = vld [vmem:[%s5738_s3 + $0x450] ss:$8 sps:$4 sm:$0xff]   ;;  %v3862_v55 = vld [vmem:[%s5738_s3 + $0x444] ss:$8 sps:$4 sm:$0xff]  }
  0xda   : > { %v5204_v43 = vadd.f32 %v1104_v13, %v1039_v21  ;;  %2854 = vmatprep.subr.bf16.mxu1 %v3817_v39  ;;  %v3857_v53 = vld [vmem:[%s5738_s3 + $0x550] ss:$8 sps:$4 sm:$0xff]   ;;  %v3865_v8 = vld [vmem:[%s5738_s3 + $0x544] ss:$8 sps:$4 sm:$0xff]   ;;  %v3860_v38 = vld [vmem:[%s5738_s3 + $0x440] ss:$8 sps:$4 sm:$0xff]  }
  0xdb   : > { %v3863_v14 = vld [vmem:[%s5738_s3 + $0x540] ss:$8 sps:$4 sm:$0xff]   ;;  %v3868_v24 = vld [vmem:[%s5738_s3 + $0x434] ss:$8 sps:$4 sm:$0xff]   ;;  %v3866_v13 = vld [vmem:[%s5738_s3 + $0x430] ss:$8 sps:$4 sm:$0xff]  }
  0xdc   : > { %2814 = vmatpush2.bf16.msra.mxu0 %v3812_v11  ;;  %v3871_v15 = vld [vmem:[%s5738_s3 + $0x534] ss:$8 sps:$4 sm:$0xff]   ;;  %v3869_v2 = vld [vmem:[%s5738_s3 + $0x530] ss:$8 sps:$4 sm:$0xff]   ;;  %v3874_v59 = vld [vmem:[%s5738_s3 + $0x424] ss:$8 sps:$4 sm:$0xff]  }
  0xdd   : > { %2855 = vmatpush2.bf16.msra.mxu1 %v3815_v25  ;;  %2815 = vmatprep.subr.bf16.mxu0 %v3820_v7  ;;  %v3877_v37 = vld [vmem:[%s5738_s3 + $0x524] ss:$8 sps:$4 sm:$0xff]   ;;  %v3872_v21 = vld [vmem:[%s5738_s3 + $0x420] ss:$8 sps:$4 sm:$0xff]   ;;  %v3880_v61 = vld [vmem:[%s5738_s3 + $0x414] ss:$8 sps:$4 sm:$0xff]  }
  0xde   : > { %2856 = vmatprep.subr.bf16.mxu1 %v3823_v50  ;;  %v3875_v9 = vld [vmem:[%s5738_s3 + $0x520] ss:$8 sps:$4 sm:$0xff]   ;;  %v3883_v63 = vld [vmem:[%s5738_s3 + $0x514] ss:$8 sps:$4 sm:$0xff]   ;;  %v3878_v39 = vld [vmem:[%s5738_s3 + $0x410] ss:$8 sps:$4 sm:$0xff]  }
  0xdf   : > { %v3881_v11 = vld [vmem:[%s5738_s3 + $0x510] ss:$8 sps:$4 sm:$0xff]   ;;  %v3886_v25 = vld [vmem:[%s5738_s3 + $0x404] ss:$8 sps:$4 sm:$0xff]   ;;  %v3884_v50 = vld [vmem:[%s5738_s3 + $0x400] ss:$8 sps:$4 sm:$0xff]  }
  0xe0   : > { %2816 = vmatpush2.bf16.msra.mxu0 %v3818_v33  ;;  %v3889_v7 = vld [vmem:[%s5738_s3 + $0x504] ss:$8 sps:$4 sm:$0xff]   ;;  %v3887_v33 = vld [vmem:[%s5738_s3 + $0x500] ss:$8 sps:$4 sm:$0xff]   ;;  %v3919_v0 = vld [vmem:[%s5738_s3 + $0x5b4] ss:$8 sps:$4 sm:$0xff]  }
  0xe1   : > { %2857 = vmatpush2.bf16.msra.mxu1 %v3821_v27  ;;  %2817 = vmatprep.subr.bf16.mxu0 %v3826_v19  ;;  %v3892_v27 = vld [vmem:[%s5738_s3 + $0x4f4] ss:$8 sps:$4 sm:$0xff]   ;;  %v3899_v62 = vld [vmem:[%s5738_s3 + $0x5e0] ss:$8 sps:$4 sm:$0xff]   ;;  %v3910_v22 = vld [vmem:[%s5738_s3 + $0x4c4] ss:$8 sps:$4 sm:$0xff]  }
  0xe2   : > { %2858 = vmatprep.subr.bf16.mxu1 %v3829_v28  ;;  %v3895_v19 = vld [vmem:[%s5738_s3 + $0x5f4] ss:$8 sps:$4 sm:$0xff]   ;;  %v3890_v28 = vld [vmem:[%s5738_s3 + $0x4f0] ss:$8 sps:$4 sm:$0xff]   ;;  %v3911_v18 = vld [vmem:[%s5738_s3 + $0x5c0] ss:$8 sps:$4 sm:$0xff]  }
  0xe3   : > { %v3917_v60 = vld [vmem:[%s5738_s3 + $0x5b0] ss:$8 sps:$4 sm:$0xff]   ;;  %v3925_v56 = vld [vmem:[%s5738_s3 + $0x5a4] ss:$8 sps:$4 sm:$0xff]  }
  0xe4   : > { %2818 = vmatpush2.bf16.msra.mxu0 %v3824_v45  ;;  %v3893_v45 = vld [vmem:[%s5738_s3 + $0x5f0] ss:$8 sps:$4 sm:$0xff]  }
  0xe5   : > { %2859 = vmatpush2.bf16.msra.mxu1 %v3827_v32  ;;  %2819 = vmatprep.subr.bf16.mxu0 %v3832_v44  ;;  %v3898_v32 = vld [vmem:[%s5738_s3 + $0x4e4] ss:$8 sps:$4 sm:$0xff]  }
  0xe6   : > { %2860 = vmatprep.subr.bf16.mxu1 %v3835_v41  ;;  %v3901_v44 = vld [vmem:[%s5738_s3 + $0x5e4] ss:$8 sps:$4 sm:$0xff]   ;;  %v3896_v41 = vld [vmem:[%s5738_s3 + $0x4e0] ss:$8 sps:$4 sm:$0xff]  }
  0xe8   : > { %2820 = vmatpush2.bf16.msra.mxu0 %v3830_v20  ;;  %v3904_v20 = vld [vmem:[%s5738_s3 + $0x4d4] ss:$8 sps:$4 sm:$0xff]  }
  0xe9   : > { %2861 = vmatpush2.bf16.msra.mxu1 %v3833_v10  ;;  %2821 = vmatprep.subr.bf16.mxu0 %v3838_v30  ;;  %v3907_v10 = vld [vmem:[%s5738_s3 + $0x5d4] ss:$8 sps:$4 sm:$0xff]   ;;  %v3902_v30 = vld [vmem:[%s5738_s3 + $0x4d0] ss:$8 sps:$4 sm:$0xff]  }
  0xea   : > { %2862 = vmatprep.subr.bf16.mxu1 %v3841_v58  ;;  %v3905_v58 = vld [vmem:[%s5738_s3 + $0x5d0] ss:$8 sps:$4 sm:$0xff]  }
  0xec   : > { %2822 = vmatpush2.bf16.msra.mxu0 %v3836_v31  ;;  %v3913_v31 = vld [vmem:[%s5738_s3 + $0x5c4] ss:$8 sps:$4 sm:$0xff]  }
  0xed   : > { %2863 = vmatpush2.bf16.msra.mxu1 %v3839_v34  ;;  %2873 = vmatprep.subr.bf16.mxu0 %v3844_v26  ;;  %v3908_v34 = vld [vmem:[%s5738_s3 + $0x4c0] ss:$8 sps:$4 sm:$0xff]   ;;  %v3916_v26 = vld [vmem:[%s5738_s3 + $0x4b4] ss:$8 sps:$4 sm:$0xff]  }
  0xee   : > { %2914 = vmatprep.subr.bf16.mxu1 %v3847_v52  ;;  %v3914_v52 = vld [vmem:[%s5738_s3 + $0x4b0] ss:$8 sps:$4 sm:$0xff]  }
  0xef   : > { %2824 = vmatmul.mubr.bf16.vlgmr.msra.gmra.mxu0 %v1161_v3  ;;  %v3920_v3 = vld [vmem:[%s5738_s3 + $0x4a0] ss:$8 sps:$4 sm:$0xff]  }
  0xf0   : > { %2865 = vmatmul.mubr.bf16.vlgmr.msra.gmra.mxu1 %v1163_v40  ;;  %2874 = vmatpush1.bf16.msra.mxu0 %v3842_v42  ;;  %v3922_v42 = vld [vmem:[%s5738_s3 + $0x4a4] ss:$8 sps:$4 sm:$0xff]   ;;  %v3928_v40 = vld [vmem:[%s5738_s3 + $0x494] ss:$8 sps:$4 sm:$0xff]  }
  0xf1   : > { %2905 = vmatprep.mubr.bf16.mxu0 %v1166_v12  ;;  %2915 = vmatpush1.bf16.msra.mxu1 %v3845_v48  ;;  %v3923_v48 = vld [vmem:[%s5738_s3 + $0x5a0] ss:$8 sps:$4 sm:$0xff]   ;;  %v3931_v12 = vld [vmem:[%s5738_s3 + $0x594] ss:$8 sps:$4 sm:$0xff]  }
  0xf2   : > { %2946 = vmatprep.mubr.bf16.mxu1 %v1168_v51  ;;  %2875 = vmatprep.subr.bf16.mxu0 %v3850_v6  ;;  %v1080_v6 = vrot.slane %v5167_v16, %v4469_v4  ;;  %v3929_v51 = vld [vmem:[%s5738_s3 + $0x590] ss:$8 sps:$4 sm:$0xff]   ;;  %v3934_v16 = vld [vmem:[%s5738_s3 + $0x484] ss:$8 sps:$4 sm:$0xff]  }
  0xf3   : > { %2916 = vmatprep.subr.bf16.mxu1 %v3853_v29  ;;  %v3926_v29 = vld [vmem:[%s5738_s3 + $0x490] ss:$8 sps:$4 sm:$0xff]  }
  0xf4   : > { %2876 = vmatpush1.bf16.msra.mxu0 %v3848_v49  ;;  %v1133_v49 = vadd.f32 %v1080_v6, %v5043_v46  ;;  %v3940_v46 = vld [vmem:[%s5738_s3 + $0x674] ss:$8 sps:$4 sm:$0xff]   ;;  %v4001_v6 = vld [vmem:[%s5738_s3 + $0x7d0] ss:$8 sps:$4 sm:$0xff]  }
  0xf5   : > { %2917 = vmatpush1.bf16.msra.mxu1 %v3851_v36  ;;  %2877 = vmatprep.subr.bf16.mxu0 %v3856_v47  ;;  %v3937_v36 = vld [vmem:[%s5738_s3 + $0x584] ss:$8 sps:$4 sm:$0xff]   ;;  %v3932_v47 = vld [vmem:[%s5738_s3 + $0x480] ss:$8 sps:$4 sm:$0xff]  }
  0xf6   : > { %2918 = vmatprep.subr.bf16.mxu1 %v3859_v54  ;;  %v3935_v54 = vld [vmem:[%s5738_s3 + $0x580] ss:$8 sps:$4 sm:$0xff]  }
  0xf8   : > { %2878 = vmatpush1.bf16.msra.mxu0 %v3854_v1  ;;  %v1149_v1 = vmax.f32 %v1133_v49, 0.0  ;;  %v4012_v49 = vld [vmem:[%s5738_s3 + $0x6b4] ss:$8 sps:$4 sm:$0xff]  }
  0xf9   : > { %2919 = vmatpush1.bf16.msra.mxu1 %v3857_v53  ;;  %2879 = vmatprep.subr.bf16.mxu0 %v3862_v55  ;;  %v1151_v53 = vmax.f32 %v5101_v57, 0.0  ;;  %v3943_v55 = vld [vmem:[%s5738_s3 + $0x774] ss:$8 sps:$4 sm:$0xff]   ;;  %v3941_v57 = vld [vmem:[%s5738_s3 + $0x770] ss:$8 sps:$4 sm:$0xff]  }
  0xfa   : > { %2920 = vmatprep.subr.bf16.mxu1 %v3865_v8  ;;  %v1154_v8 = vmax.f32 %v5152_v23, 0.0  ;;  %v3946_v23 = vld [vmem:[%s5738_s3 + $0x664] ss:$8 sps:$4 sm:$0xff]  }
  0xfc   : > { %2880 = vmatpush1.bf16.msra.mxu0 %v3860_v38  ;;  %v3938_v38 = vld [vmem:[%s5738_s3 + $0x670] ss:$8 sps:$4 sm:$0xff]  }
  0xfd   : > { %2921 = vmatpush1.bf16.msra.mxu1 %v3863_v14  ;;  %2881 = vmatprep.subr.bf16.mxu0 %v3868_v24  ;;  %v1156_v14 = vmax.f32 %v5180_v17, 0.0  ;;  %v1165_v24 = vpack.c.bf16 %v1149_v1, %v1149_v1  ;;  %v4018_v1 = vld [vmem:[%s5738_s3 + $0x6a4] ss:$8 sps:$4 sm:$0xff]  }
  0xfe   : > { %2922 = vmatprep.subr.bf16.mxu1 %v3871_v15  ;;  %v1167_v15 = vpack.c.bf16 %v1151_v53, %v1151_v53  ;;  %v4016_v53 = vld [vmem:[%s5738_s3 + $0x6a0] ss:$8 sps:$4 sm:$0xff]  }
  0xff   : > { %v1172_v17 = vpack.c.bf16 %v1156_v14, %v1156_v14  ;;  %v4022_v14 = vld [vmem:[%s5738_s3 + $0x690] ss:$8 sps:$4 sm:$0xff]  }
 0x100   : > { %2882 = vmatpush1.bf16.msra.mxu0 %v3866_v13  ;;  %v1170_v13 = vpack.c.bf16 %v1154_v8, %v1154_v8  ;;  %v4024_v8 = vld [vmem:[%s5738_s3 + $0x694] ss:$8 sps:$4 sm:$0xff]  }
 0x101   : > { %2923 = vmatpush1.bf16.msra.mxu1 %v3869_v2  ;;  %2883 = vmatprep.subr.bf16.mxu0 %v3874_v59  ;;  %v3949_v2 = vld [vmem:[%s5738_s3 + $0x764] ss:$8 sps:$4 sm:$0xff]   ;;  %v3944_v59 = vld [vmem:[%s5738_s3 + $0x660] ss:$8 sps:$4 sm:$0xff]  }
 0x102   : > { %2924 = vmatprep.subr.bf16.mxu1 %v3877_v37  ;;  %v3947_v37 = vld [vmem:[%s5738_s3 + $0x760] ss:$8 sps:$4 sm:$0xff]  }
 0x104   : > { %2884 = vmatpush1.bf16.msra.mxu0 %v3872_v21  ;;  %v3952_v21 = vld [vmem:[%s5738_s3 + $0x654] ss:$8 sps:$4 sm:$0xff]  }
 0x105   : > { %2925 = vmatpush1.bf16.msra.mxu1 %v3875_v9  ;;  %2885 = vmatprep.subr.bf16.mxu0 %v3880_v61  ;;  %v3955_v9 = vld [vmem:[%s5738_s3 + $0x754] ss:$8 sps:$4 sm:$0xff]   ;;  %v3950_v61 = vld [vmem:[%s5738_s3 + $0x650] ss:$8 sps:$4 sm:$0xff]  }
 0x106   : > { %2926 = vmatprep.subr.bf16.mxu1 %v3883_v63  ;;  %v3953_v63 = vld [vmem:[%s5738_s3 + $0x750] ss:$8 sps:$4 sm:$0xff]  }
 0x108   : > { %2886 = vmatpush1.bf16.msra.mxu0 %v3878_v39  ;;  %v3958_v39 = vld [vmem:[%s5738_s3 + $0x644] ss:$8 sps:$4 sm:$0xff]  }
 0x109   : > { %2927 = vmatpush1.bf16.msra.mxu1 %v3881_v11  ;;  %2887 = vmatprep.subr.bf16.mxu0 %v3886_v25  ;;  %v3961_v11 = vld [vmem:[%s5738_s3 + $0x744] ss:$8 sps:$4 sm:$0xff]   ;;  %v3956_v25 = vld [vmem:[%s5738_s3 + $0x640] ss:$8 sps:$4 sm:$0xff]  }
 0x10a   : > { %2928 = vmatprep.subr.bf16.mxu1 %v3889_v7  ;;  %v3959_v7 = vld [vmem:[%s5738_s3 + $0x740] ss:$8 sps:$4 sm:$0xff]  }
 0x10c   : > { %2888 = vmatpush1.bf16.msra.mxu0 %v3884_v50  ;;  %v3964_v50 = vld [vmem:[%s5738_s3 + $0x634] ss:$8 sps:$4 sm:$0xff]  }
 0x10d   : > { %2929 = vmatpush1.bf16.msra.mxu1 %v3887_v33  ;;  %2889 = vmatprep.subr.bf16.mxu0 %v3892_v27  ;;  %v3967_v33 = vld [vmem:[%s5738_s3 + $0x734] ss:$8 sps:$4 sm:$0xff]   ;;  %v3962_v27 = vld [vmem:[%s5738_s3 + $0x630] ss:$8 sps:$4 sm:$0xff]  }
 0x10e   : > { %2930 = vmatprep.subr.bf16.mxu1 %v3895_v19  ;;  %v3965_v19 = vld [vmem:[%s5738_s3 + $0x730] ss:$8 sps:$4 sm:$0xff]  }
 0x110   : > { %2890 = vmatpush2.bf16.msra.mxu0 %v3890_v28  ;;  %v3970_v28 = vld [vmem:[%s5738_s3 + $0x624] ss:$8 sps:$4 sm:$0xff]  }
 0x111   : > { %2931 = vmatpush2.bf16.msra.mxu1 %v3893_v45  ;;  %2891 = vmatprep.subr.bf16.mxu0 %v3898_v32  ;;  %v3973_v45 = vld [vmem:[%s5738_s3 + $0x724] ss:$8 sps:$4 sm:$0xff]   ;;  %v3968_v32 = vld [vmem:[%s5738_s3 + $0x620] ss:$8 sps:$4 sm:$0xff]  }
 0x112   : > { %2932 = vmatprep.subr.bf16.mxu1 %v3901_v44  ;;  %v3971_v44 = vld [vmem:[%s5738_s3 + $0x720] ss:$8 sps:$4 sm:$0xff]  }
 0x114   : > { %2892 = vmatpush2.bf16.msra.mxu0 %v3896_v41  ;;  %v3976_v41 = vld [vmem:[%s5738_s3 + $0x614] ss:$8 sps:$4 sm:$0xff]  }
 0x115   : > { %2933 = vmatpush2.bf16.msra.mxu1 %v3899_v62  ;;  %2893 = vmatprep.subr.bf16.mxu0 %v3904_v20  ;;  %v3979_v62 = vld [vmem:[%s5738_s3 + $0x714] ss:$8 sps:$4 sm:$0xff]   ;;  %v3974_v20 = vld [vmem:[%s5738_s3 + $0x610] ss:$8 sps:$4 sm:$0xff]  }
 0x116   : > { %2934 = vmatprep.subr.bf16.mxu1 %v3907_v10  ;;  %v3977_v10 = vld [vmem:[%s5738_s3 + $0x710] ss:$8 sps:$4 sm:$0xff]  }
 0x118   : > { %2894 = vmatpush2.bf16.msra.mxu0 %v3902_v30  ;;  %v3982_v30 = vld [vmem:[%s5738_s3 + $0x604] ss:$8 sps:$4 sm:$0xff]  }
 0x119   : > { %2935 = vmatpush2.bf16.msra.mxu1 %v3905_v58  ;;  %2895 = vmatprep.subr.bf16.mxu0 %v3910_v22  ;;  %v3985_v58 = vld [vmem:[%s5738_s3 + $0x704] ss:$8 sps:$4 sm:$0xff]   ;;  %v3980_v22 = vld [vmem:[%s5738_s3 + $0x600] ss:$8 sps:$4 sm:$0xff]  }
 0x11a   : > { %2936 = vmatprep.subr.bf16.mxu1 %v3913_v31  ;;  %v3983_v31 = vld [vmem:[%s5738_s3 + $0x700] ss:$8 sps:$4 sm:$0xff]  }
 0x11c   : > { %2896 = vmatpush2.bf16.msra.mxu0 %v3908_v34  ;;  %v3988_v34 = vld [vmem:[%s5738_s3 + $0x6f4] ss:$8 sps:$4 sm:$0xff]  }
 0x11d   : > { %2937 = vmatpush2.bf16.msra.mxu1 %v3911_v18  ;;  %2897 = vmatprep.subr.bf16.mxu0 %v3916_v26  ;;  %v3991_v18 = vld [vmem:[%s5738_s3 + $0x7f4] ss:$8 sps:$4 sm:$0xff]   ;;  %v3986_v26 = vld [vmem:[%s5738_s3 + $0x6f0] ss:$8 sps:$4 sm:$0xff]  }
 0x11e   : > { %2938 = vmatprep.subr.bf16.mxu1 %v3919_v0  ;;  %v3989_v0 = vld [vmem:[%s5738_s3 + $0x7f0] ss:$8 sps:$4 sm:$0xff]  }
 0x120   : > { %2898 = vmatpush2.bf16.msra.mxu0 %v3914_v52  ;;  %v3994_v52 = vld [vmem:[%s5738_s3 + $0x6e4] ss:$8 sps:$4 sm:$0xff]  }
 0x121   : > { %2939 = vmatpush2.bf16.msra.mxu1 %v3917_v60  ;;  %2899 = vmatprep.subr.bf16.mxu0 %v3922_v42  ;;  %v3997_v60 = vld [vmem:[%s5738_s3 + $0x7e4] ss:$8 sps:$4 sm:$0xff]   ;;  %v3992_v42 = vld [vmem:[%s5738_s3 + $0x6e0] ss:$8 sps:$4 sm:$0xff]  }
 0x122   : > { %2940 = vmatprep.subr.bf16.mxu1 %v3925_v56  ;;  %v3995_v56 = vld [vmem:[%s5738_s3 + $0x7e0] ss:$8 sps:$4 sm:$0xff]  }
 0x124   : > { %2900 = vmatpush2.bf16.msra.mxu0 %v3920_v3  ;;  %v4000_v3 = vld [vmem:[%s5738_s3 + $0x6d4] ss:$8 sps:$4 sm:$0xff]  }
 0x125   : > { %2941 = vmatpush2.bf16.msra.mxu1 %v3923_v48  ;;  %2901 = vmatprep.subr.bf16.mxu0 %v3928_v40  ;;  %v4003_v48 = vld [vmem:[%s5738_s3 + $0x7d4] ss:$8 sps:$4 sm:$0xff]   ;;  %v3998_v40 = vld [vmem:[%s5738_s3 + $0x6d0] ss:$8 sps:$4 sm:$0xff]  }
 0x126   : > { %2942 = vmatprep.subr.bf16.mxu1 %v3931_v12  ;;  %v4006_v12 = vld [vmem:[%s5738_s3 + $0x6c4] ss:$8 sps:$4 sm:$0xff]  }
 0x128   : > { %2902 = vmatpush2.bf16.msra.mxu0 %v3926_v29  ;;  %v4009_v29 = vld [vmem:[%s5738_s3 + $0x7c4] ss:$8 sps:$4 sm:$0xff]  }
 0x129   : > { %2943 = vmatpush2.bf16.msra.mxu1 %v3929_v51  ;;  %2903 = vmatprep.subr.bf16.mxu0 %v3934_v16  ;;  %v4004_v51 = vld [vmem:[%s5738_s3 + $0x6c0] ss:$8 sps:$4 sm:$0xff]  }
 0x12a   : > { %2944 = vmatprep.subr.bf16.mxu1 %v3937_v36  ;;  %v4007_v16 = vld [vmem:[%s5738_s3 + $0x7c0] ss:$8 sps:$4 sm:$0xff]   ;;  %v4015_v36 = vld [vmem:[%s5738_s3 + $0x7b4] ss:$8 sps:$4 sm:$0xff]  }
 0x12c   : > { %2904 = vmatpush2.bf16.msra.mxu0 %v3932_v47  ;;  %v4010_v47 = vld [vmem:[%s5738_s3 + $0x6b0] ss:$8 sps:$4 sm:$0xff]  }
 0x12d   : > { %2945 = vmatpush2.bf16.msra.mxu1 %v3935_v54  ;;  %2955 = vmatprep.subr.bf16.mxu0 %v3940_v46  ;;  %v4013_v54 = vld [vmem:[%s5738_s3 + $0x7b0] ss:$8 sps:$4 sm:$0xff]   ;;  %v4021_v46 = vld [vmem:[%s5738_s3 + $0x7a4] ss:$8 sps:$4 sm:$0xff]  }
 0x12e   : > { %2996 = vmatprep.subr.bf16.mxu1 %v3943_v55  ;;  %v4019_v55 = vld [vmem:[%s5738_s3 + $0x7a0] ss:$8 sps:$4 sm:$0xff]  }
 0x12f   : > { %2906 = vmatmul.mubr.bf16.vlgmr.msra.gmra.mxu0 %v1165_v24  ;;  %v4025_v24 = vld [vmem:[%s5738_s3 + $0x790] ss:$8 sps:$4 sm:$0xff]  }
 0x130   : > { %2947 = vmatmul.mubr.bf16.vlgmr.msra.gmra.mxu1 %v1167_v15  ;;  %2956 = vmatpush1.bf16.msra.mxu0 %v3938_v38  ;;  %v4027_v38 = vld [vmem:[%s5738_s3 + $0x794] ss:$8 sps:$4 sm:$0xff]   ;;  %v4033_v15 = vld [vmem:[%s5738_s3 + $0x784] ss:$8 sps:$4 sm:$0xff]  }
 0x131   : > { %2987 = vmatprep.mubr.bf16.mxu0 %v1170_v13  ;;  %2997 = vmatpush1.bf16.msra.mxu1 %v3941_v57  ;;  %v4030_v57 = vld [vmem:[%s5738_s3 + $0x684] ss:$8 sps:$4 sm:$0xff]   ;;  %v4031_v13 = vld [vmem:[%s5738_s3 + $0x780] ss:$8 sps:$4 sm:$0xff]  }
 0x132   : > { %3028 = vmatprep.mubr.bf16.mxu1 %v1172_v17  ;;  %2957 = vmatprep.subr.bf16.mxu0 %v3946_v23  ;;  %v4028_v23 = vld [vmem:[%s5738_s3 + $0x680] ss:$8 sps:$4 sm:$0xff]   ;;  %v1155_v17 = vmax.f32 %v5204_v43, 0.0  ;;  %v4035_v43 = vld [vmem:[%s5741_s6 + $0x38] sm:$0xff]  }
 0x133   : > { %2998 = vmatprep.subr.bf16.mxu1 %v3949_v2  ;;  %v1153_v2 = vmax.f32 %v5188_v5, 0.0  ;;  %v4034_v5 = vld [vmem:[%s5741_s6 + $0x78] sm:$0xff]  }
 0x134   : > { %2958 = vmatpush1.bf16.msra.mxu0 %v3944_v59 }
 0x135   : > { %2999 = vmatpush1.bf16.msra.mxu1 %v3947_v37  ;;  %2959 = vmatprep.subr.bf16.mxu0 %v3952_v21  ;;  %v1169_v59 = vpack.c.bf16 %v1153_v2, %v1153_v2  ;;  %v1171_v37 = vpack.c.bf16 %v1155_v17, %v1155_v17 }
 0x136   : > { %3000 = vmatprep.subr.bf16.mxu1 %v3955_v9 }
 0x138   : > { %2960 = vmatpush1.bf16.msra.mxu0 %v3950_v61 }
 0x139   : > { %3001 = vmatpush1.bf16.msra.mxu1 %v3953_v63  ;;  %2961 = vmatprep.subr.bf16.mxu0 %v3958_v39 }
 0x13a   : > { %3002 = vmatprep.subr.bf16.mxu1 %v3961_v11 }
 0x13c   : > { %2962 = vmatpush1.bf16.msra.mxu0 %v3956_v25 }
 0x13d   : > { %3003 = vmatpush1.bf16.msra.mxu1 %v3959_v7  ;;  %2963 = vmatprep.subr.bf16.mxu0 %v3964_v50 }
 0x13e   : > { %3004 = vmatprep.subr.bf16.mxu1 %v3967_v33 }
 0x140   : > { %2964 = vmatpush1.bf16.msra.mxu0 %v3962_v27  ;;  %v4036_v27 = vld [vmem:[%s5741_s6 + $0x70] sm:$0xff]  }
 0x141   : > { %3005 = vmatpush1.bf16.msra.mxu1 %v3965_v19  ;;  %2965 = vmatprep.subr.bf16.mxu0 %v3970_v28  ;;  %v4037_v19 = vld [vmem:[%s5741_s6 + $0x30] sm:$0xff]   ;;  %v4038_v28 = vld [vmem:[%s5741_s6 + $0x68] sm:$0xff]  }
 0x142   : > { %3006 = vmatprep.subr.bf16.mxu1 %v3973_v45  ;;  %v4039_v45 = vld [vmem:[%s5741_s6 + $0x28] sm:$0xff]  }
 0x144   : > { %2966 = vmatpush1.bf16.msra.mxu0 %v3968_v32  ;;  %v4040_v32 = vld [vmem:[%s5741_s6 + $0x60] sm:$0xff]  }
 0x145   : > { %3007 = vmatpush1.bf16.msra.mxu1 %v3971_v44  ;;  %2967 = vmatprep.subr.bf16.mxu0 %v3976_v41  ;;  %v4041_v44 = vld [vmem:[%s5741_s6 + $0x20] sm:$0xff]  }
 0x146   : > { %3008 = vmatprep.subr.bf16.mxu1 %v3979_v62 }
 0x148   : > { %2968 = vmatpush1.bf16.msra.mxu0 %v3974_v20 }
 0x149   : > { %3009 = vmatpush1.bf16.msra.mxu1 %v3977_v10  ;;  %2969 = vmatprep.subr.bf16.mxu0 %v3982_v30 }
 0x14a   : > { %3010 = vmatprep.subr.bf16.mxu1 %v3985_v58 }
 0x14c   : > { %2970 = vmatpush1.bf16.msra.mxu0 %v3980_v22 }
 0x14d   : > { %3011 = vmatpush1.bf16.msra.mxu1 %v3983_v31  ;;  %2971 = vmatprep.subr.bf16.mxu0 %v3988_v34 }
 0x14e   : > { %3012 = vmatprep.subr.bf16.mxu1 %v3991_v18 }
 0x150   : > { %2972 = vmatpush2.bf16.msra.mxu0 %v3986_v26 }
 0x151   : > { %3013 = vmatpush2.bf16.msra.mxu1 %v3989_v0  ;;  %2973 = vmatprep.subr.bf16.mxu0 %v3994_v52  ;;  %v4042_v52 = vld [vmem:[%s5741_s6 + $0x58] sm:$0xff]  }
 0x152   : > { %3014 = vmatprep.subr.bf16.mxu1 %v3997_v60  ;;  %v4043_v60 = vld [vmem:[%s5741_s6 + $0x18] sm:$0xff]  }
 0x154   : > { %2974 = vmatpush2.bf16.msra.mxu0 %v3992_v42  ;;  %v4044_v42 = vld [vmem:[%s5741_s6 + $0x50] sm:$0xff]  }
 0x155   : > { %3015 = vmatpush2.bf16.msra.mxu1 %v3995_v56  ;;  %2975 = vmatprep.subr.bf16.mxu0 %v4000_v3  ;;  %v4045_v56 = vld [vmem:[%s5741_s6 + $0x10] sm:$0xff]   ;;  %v4046_v3 = vld [vmem:[%s5741_s6 + $0x48] sm:$0xff]  }
 0x156   : > { %3016 = vmatprep.subr.bf16.mxu1 %v4003_v48  ;;  %v4047_v48 = vld [vmem:[%s5741_s6 + $0x8] sm:$0xff]  }
 0x158   : > { %2976 = vmatpush2.bf16.msra.mxu0 %v3998_v40  ;;  %v4048_v40 = vld [vmem:[%s5741_s6 + $0x40] sm:$0xff]  }
 0x159   : > { %3017 = vmatpush2.bf16.msra.mxu1 %v4001_v6  ;;  %2977 = vmatprep.subr.bf16.mxu0 %v4006_v12  ;;  %v4049_v6 = vld [vmem:[%s5741_s6] sm:$0xff]  }
 0x15a   : > { %3018 = vmatprep.subr.bf16.mxu1 %v4009_v29 }
 0x15c   : > { %2978 = vmatpush2.bf16.msra.mxu0 %v4004_v51 }
 0x15d   : > { %3019 = vmatpush2.bf16.msra.mxu1 %v4007_v16  ;;  %2979 = vmatprep.subr.bf16.mxu0 %v4012_v49 }
 0x15e   : > { %3020 = vmatprep.subr.bf16.mxu1 %v4015_v36 }
 0x160   : > { %2980 = vmatpush2.bf16.msra.mxu0 %v4010_v47 }
 0x161   : > { %3021 = vmatpush2.bf16.msra.mxu1 %v4013_v54  ;;  %2981 = vmatprep.subr.bf16.mxu0 %v4018_v1 }
 0x162   : > { %3022 = vmatprep.subr.bf16.mxu1 %v4021_v46 }
 0x164   : > { %2982 = vmatpush2.bf16.msra.mxu0 %v4016_v53 }
 0x165   : > { %3023 = vmatpush2.bf16.msra.mxu1 %v4019_v55  ;;  %2983 = vmatprep.subr.bf16.mxu0 %v4024_v8  ;;  %v3037_v55 = vld [vmem:[%s5739_s4] sm:$0x3] }
 0x166   : > { %3024 = vmatprep.subr.bf16.mxu1 %v4027_v38  ;;  %v3051_v38 = vld [vmem:[%s5740_s5] sm:$0x3] }
 0x167   : > { %v3056_v2 = vrot.slane %v3051_v38, %v4469_v4 }
 0x168   : > { %2984 = vmatpush2.bf16.msra.mxu0 %v4022_v14 }
 0x169   : > { %3025 = vmatpush2.bf16.msra.mxu1 %v4025_v24  ;;  %2985 = vmatprep.subr.bf16.mxu0 %v4030_v57 }
 0x16a   : > { %3026 = vmatprep.subr.bf16.mxu1 %v4033_v15  ;;  %v3042_v15 = vrot.slane %v3037_v55, %v4469_v4 }
 0x16c   : > { %2986 = vmatpush2.bf16.msra.mxu0 %v4028_v23  ;;  %v2743_v21 = vpop.f32.mrf.mxu0 }
 0x16d   : > { %3027 = vmatpush2.bf16.msra.mxu1 %v4031_v13  ;;  %v2784_v9 = vpop.f32.mrf.mxu1  ;;  %3608 = vmatprep.subr.bf16.mxu0 %v4034_v5 }
 0x16e   : > { %v2785_v61 = vadd.f32 %v2784_v9, %v2743_v21  ;;  %v2745_v63 = vpop.f32.mrf.mxu0 }
 0x16f   : > { %2988 = vmatmul.mubr.bf16.vlgmr.msra.gmra.mxu0 %v1169_v59  ;;  %v2786_v39 = vpop.f32.mrf.mxu1 }
 0x170   : > { %3029 = vmatmul.mubr.bf16.vlgmr.msra.gmra.mxu1 %v1171_v37  ;;  %v2787_v11 = vadd.f32 %v2786_v39, %v2745_v63  ;;  %v2747_v25 = vpop.f32.mrf.mxu0  ;;  %3609 = vmatpush3.bf16.msra.mxu0 %v4035_v43  ;;  %v3046_v37 = vrot.slane %v3037_v55, %v4389_v35  ;;  %v3060_v63 = vrot.slane %v3051_v38, %v4389_v35 }
 0x171   : > { %v2788_v7 = vpop.f32.mrf.mxu1  ;;  %3610 = vmatprep.subr.bf16.mxu0 %v4036_v27 }
 0x172   : > { %v2748_v50 = vpop.f32.mrf.mxu0 }
 0x173   : > { %v2789_v33 = vpop.f32.mrf.mxu1 }
 0x174   : > { %3611 = vmatpush3.bf16.msra.mxu0 %v4037_v19 }
 0x175   : > { %3612 = vmatprep.subr.bf16.mxu0 %v4038_v28  ;;  %v3588_v28 = vld [vmem:[%s5742_s7] ss:$0 sm:$0xff] }
 0x178   : > { %3613 = vmatpush3.bf16.msra.mxu0 %v4039_v45 }
 0x179   : > { %3614 = vmatprep.subr.bf16.mxu0 %v4040_v32 }
 0x17c   : > { %3615 = vmatpush3.bf16.msra.mxu0 %v4041_v44 }
 0x17d   : > { %3616 = vmatprep.subr.bf16.mxu0 %v4042_v52 }
 0x180   : > { %3617 = vmatpush3.bf16.msra.mxu0 %v4043_v60 }
 0x181   : > { %3618 = vmatprep.subr.bf16.mxu0 %v4044_v42 }
 0x184   : > { %3619 = vmatpush3.bf16.msra.mxu0 %v4045_v56 }
 0x185   : > { %3620 = vmatprep.subr.bf16.mxu0 %v4046_v3 }
 0x188   : > { %3621 = vmatpush3.bf16.msra.mxu0 %v4047_v48 }
 0x189   : > { %3622 = vmatprep.subr.bf16.mxu0 %v4048_v40 }
 0x18c   : > { %3623 = vmatpush3.bf16.msra.mxu0 %v4049_v6 }
 0x1af   : > { %v2825_v41 = vpop.f32.mrf.mxu0 }
 0x1b0   : > { %v2826_v62 = vadd.f32 %v2825_v41, %v2785_v61  ;;  %v2866_v20 = vpop.f32.mrf.mxu1 }
 0x1b1   : > { %v2827_v10 = vpop.f32.mrf.mxu0 }
 0x1b2   : > { %v2867_v30 = vadd.f32 %v2866_v20, %v2826_v62  ;;  %v2828_v58 = vadd.f32 %v2827_v10, %v2787_v11  ;;  %v2868_v22 = vpop.f32.mrf.mxu1 }
 0x1b3   : > { %v2829_v31 = vpop.f32.mrf.mxu0 }
 0x1b4   : > { %v2869_v34 = vadd.f32 %v2868_v22, %v2828_v58  ;;  %v2870_v18 = vpop.f32.mrf.mxu1 }
 0x1b5   : > { %v2830_v26 = vpop.f32.mrf.mxu0 }
 0x1b6   : > { %v2871_v0 = vpop.f32.mrf.mxu1 }
 0x1ef   : > { %v2907_v12 = vpop.f32.mrf.mxu0 }
 0x1f0   : > { %v2908_v29 = vadd.f32 %v2907_v12, %v2867_v30  ;;  %v2948_v51 = vpop.f32.mrf.mxu1 }
 0x1f1   : > { %v2909_v16 = vpop.f32.mrf.mxu0 }
 0x1f2   : > { %v2949_v49 = vadd.f32 %v2948_v51, %v2908_v29  ;;  %v2950_v36 = vpop.f32.mrf.mxu1  ;;  %v2910_v53 = vadd.f32 %v2909_v16, %v2869_v34 }
 0x1f3   : > { %v2911_v47 = vpop.f32.mrf.mxu0 }
 0x1f4   : > { %v2952_v54 = vpop.f32.mrf.mxu1  ;;  %v2951_v14 = vadd.f32 %v2950_v36, %v2910_v53 }
 0x1f5   : > { %v2912_v1 = vpop.f32.mrf.mxu0 }
 0x1f6   : > { %v2953_v46 = vpop.f32.mrf.mxu1 }
 0x22f   : > { %v2989_v8 = vpop.f32.mrf.mxu0 }
 0x230   : > { %v2990_v24 = vadd.f32 %v2989_v8, %v2949_v49  ;;  %v3030_v57 = vpop.f32.mrf.mxu1 }
 0x231   : > { %v2991_v23 = vpop.f32.mrf.mxu0 }
 0x232   : > { %v3031_v13 = vadd.f32 %v3030_v57, %v2990_v24  ;;  %v2992_v17 = vadd.f32 %v2991_v23, %v2951_v14  ;;  %v3032_v59 = vpop.f32.mrf.mxu1 }
 0x233   : > { %v2993_v21 = vpop.f32.mrf.mxu0 }
 0x234   : > { %v3049_v9 = vmul.f32 %v3042_v15, %v3031_v13  ;;  %v3033_v61 = vadd.f32 %v3032_v59, %v2992_v17  ;;  %v3034_v39 = vpop.f32.mrf.mxu1 }
 0x235   : > { %v2994_v11 = vpop.f32.mrf.mxu0 }
 0x236   : > { %v3063_v25 = vadd.f32 %v3056_v2, %v3049_v9  ;;  %v3050_v7 = vmul.f32 %v3046_v37, %v3033_v61  ;;  %v3035_v50 = vpop.f32.mrf.mxu1 }
 0x238   : > { %v3064_v33 = vadd.f32 %v3060_v63, %v3050_v7  ;;  %v3065_v5 = vmax.f32 %v3063_v25, 0.0 }
 0x23a   : > { %v3066_v43 = vmax.f32 %v3064_v33, 0.0  ;;  %v3067_v19 = vpack.c.bf16 %v3065_v5, %v3065_v5 }
 0x23c   : > { %v3068_v27 = vpack.c.bf16 %v3066_v43, %v3066_v43 }
 0x23e   : > { %3236 = vmatprep.mubr.bf16.mxu0 %v3068_v27 }
 0x23f   : > { %3237 = vmatmul.mubr.bf16.vlgmr.msra.gmra.mxu0 %v3067_v19 }
 0x2ff   : > { %v3624_v4 = vpop.f32.mrf.mxu0 }
 0x301   : > { %v3625_v45 = vpop.f32.mrf.mxu0 }
 0x302   : > { %v3626_v35 = vadd.f32 %v3625_v45, %v3624_v4 }
 0x303   : > { %v3627_v32 = vpop.f32.mrf.mxu0 }
 0x304   : > { %v3239_v44 = vadd.f32 %v3626_v35, %v3588_v28 }
 0x305   : > { %v3628_v41 = vpop.f32.mrf.mxu0 }
 0x306   : > { %v3244_v62 = vrot.slane %v3239_v44, 4 }
 0x308   : > { %v3245_v20 = vmax.f32 %v3239_v44, %v3244_v62 }
 0x30a   : > { %v3246_v10 = vrot.slane %v3245_v20, 2 }
 0x30c   : > { %v3247_v30 = vmax.f32 %v3245_v20, %v3246_v10 }
 0x30e   : > { %v3248_v58 = vrot.slane %v3247_v30, 1 }
 0x310   : > { %v3249_v22 = vmax.f32 %v3247_v30, %v3248_v58 }
 0x312   : > { %v3605_v31 = vmul.f32 -1.442695, %v3249_v22 }
 0x314   : > { %4050 = vpow2.f32 %v3605_v31 }
 0x321   : > { %v4051_v34 = vpop.eup %4050 }
 0x322   : > { %v3253_v18 = vadd.f32 1.0, %v4051_v34 }
 0x324   : > { %4052 = vrcp.f32 %v3253_v18 }
 0x331   : > { %v4053_v26 = vpop.eup %4052 }
 0x332   : > { %3256 = vst [vmem:[%s298_s17] sm:$0x1] %v4053_v26 }
 0x333 PF: > { %s18_s27 = sadd.s32 1, %s4061_s27  }
 0x334   : > { %p15_p4 = scmp.ge.s32.totalorder %s18_s27, 4  }
 0x336   :  { %17 = sbr.rel (!%p15_p4) target bundleno = 1 (0x1), region = 93 }

</bundles_post_ra>
